<compile_context>
chip_gen: v7x
topology: tpu7x:2x2x1
jax: 0.10.0
libtpu: 0.0.40
codegen_flags: <defaults>
</compile_context>

<pallas_src>
import functools

import jax
import jax.numpy as jnp
from jax import lax
from jax.experimental import pallas as pl
from jax.experimental.pallas import tpu as pltpu


# ----------------------------------------------------------------------------
# Wrapper-side weight re-layouts (tiny, one-time XLA ops).
# ----------------------------------------------------------------------------
def _split_strided_weight(w, s):
    """HWIO (k,k,Ci,Co) strided-conv weight -> per-(phase, tap) matrices.

    Returns (s*s*ks*ks, Co, Ci); row ((s*rh+rw)*ks*ks + ks*jh+jw) holds
    w[rh+s*jh, rw+s*jw, :, :] transposed to (co, ci)."""
    k, _, ci, co = w.shape
    ks = k // s
    wr = w.reshape(ks, s, ks, s, ci, co)          # [jh, rh, jw, rw, ci, co]
    wr = wr.transpose(1, 3, 0, 2, 5, 4)           # [rh, rw, jh, jw, co, ci]
    return wr.reshape(s * s * ks * ks, co, ci)


def _split_deconv_weight(w, s):
    """Equivalent-correlation HWIO deconv weight -> phase-stacked tap matrices.

    Returns (ks*ks, s*s*Co, Ci): tap t = ks*jh+jw, row (s*ph+pw)*Co+co holds
    w[r_h+s*jh, r_w+s*jw, ci, co] with r_h = s-1-ph, r_w = s-1-pw."""
    k, _, ci, co = w.shape
    ks = k // s
    wr = w.reshape(ks, s, ks, s, ci, co)          # [jh, r_h, jw, r_w, ci, co]
    wr = wr[:, ::-1, :, ::-1]                     # r -> phase = s-1-r
    wr = wr.transpose(0, 2, 1, 3, 5, 4)           # [jh, jw, ph, pw, co, ci]
    return wr.reshape(ks * ks, s * s * co, ci)


# ----------------------------------------------------------------------------
# The single fused EDPU kernel (one grid step == one image).
#
# Intermediate representation: a "slab" is a (C, M) matrix with C channels in
# sublanes and flattened low-res spatial in lanes, where the lane index is
# m = i*Wp + j (row stride Wp inherited from the 10-wide padded phases); lanes
# with j >= Wl are garbage and are masked to zero before they can feed padding
# columns of the next stage.  Because every padded phase buffer in the chain
# has the same width Wp (guaranteed by k == 2p + s), repacking a slab into the
# next stage's padded phase buffer is just mask + lane shift.
# ----------------------------------------------------------------------------
def _edpu_kernel(x1p_ref, w1_ref, wd_ref, w2_ref, w11_ref, ba_ref, mask_ref,
                 o_ref, *, s, ks, C, Hl, Wl, Wp, pp):
    P = s * s                        # spatial phases
    nt = ks * ks                     # taps per phase sub-kernel
    Fp = (Hl + 2 * pp) * Wp          # flattened padded low-res phase length
    M = (Hl - 1) * Wp + Wl           # slab lane count
    off = pp * (Wp + 1)              # interior offset inside a padded phase
    Mout = Hl * Wp                   # lane-padded output slab width
    cdt = x1p_ref.dtype              # matmul operand dtype (pre-cast in wrapper)

    mask = mask_ref[...]             # (1, M) f32, 1.0 on valid slab lanes
    ba = ba_ref[...]                 # (9, C, 1) f32: biases + PReLU alphas
    b1, bdc, b2, b111, b112 = ba[0], ba[1], ba[2], ba[3], ba[4]
    a1, a2, a3, a4 = ba[5], ba[6], ba[7], ba[8]
    w11 = w11_ref[...]               # (2, C, C)  [co, ci] for the 1x1 convs
    w1 = w1_ref[...]                 # (P*nt, C, C)
    wd = wd_ref[...]                 # (nt, P*C, C)
    w2 = w2_ref[...]                 # (P*nt, C, C)
    x1_ph = x1p_ref[0]               # (P, C, Fp)  padded low-res phases of x1

    def prelu(y, a):
        return jnp.where(y >= 0, y, a * y)

    def conv_accum(bufs, w_taps, rows):
        # Unrolled per-tap accumulation of small lane-dense MXU matmuls,
        # f32 accumulation.  Each tap window is a static lane slice (the slab
        # keeps the padded-phase row stride, so no width compaction is needed).
        acc = jnp.zeros((rows, M), jnp.float32)
        for g, buf in enumerate(bufs):
            for t in range(nt):
                d = (t // ks) * Wp + (t % ks)
                acc = acc + jnp.dot(w_taps[g * nt + t], buf[:, d:d + M],
                                    preferred_element_type=jnp.float32)
        return acc

    def repack(y):
        # (C, M) slab -> zero garbage lanes -> pp-padded (C, Fp) phase buffer.
        ym = y * mask
        if off:
            z = jnp.zeros((C, off), jnp.float32)
            ym = jnp.concatenate([z, ym, z], axis=1)
        return ym.astype(cdt)

    # Stage A: x2 = PReLU1(conv1(x1)) -- the stride-s conv done as P stride-1
    # sub-convs over the pre-split padded phases of x1.
    x2 = prelu(conv_accum([x1_ph[g] for g in range(P)], w1, C) + b1, a1)
    xp2 = repack(x2)                                        # (C, Fp)

    # Stage B: all s*s ConvTranspose output phases as ONE stacked accumulation
    # (P*C output rows) over the shared padded x2; then per output phase
    # subtract PReLU2(conv1_1_1(x1)) (dense (C,C)x(C,M) matmul).
    d_acc = conv_accum([xp2], wd, P * C)                    # (P*C, M)
    xp3 = []
    for g in range(P):
        d_g = d_acc[g * C:(g + 1) * C, :] + bdc
        r_g = prelu(jnp.dot(w11[0], x1_ph[g][:, off:off + M],
                            preferred_element_type=jnp.float32) + b111, a2)
        xp3.append(repack(d_g - r_g))                       # x3 phase g, padded

    # Stage C: x4 = PReLU3(conv2(x3)) + PReLU4(conv1_1_2(x2)); conv2 consumes
    # x3 directly in phase-split form (x3 is never interleaved to full res).
    y = prelu(conv_accum(xp3, w2, C) + b2, a3)
    r2 = prelu(jnp.dot(w11[1], xp2[:, off:off + M],
                       preferred_element_type=jnp.float32) + b112, a4)
    x4 = y + r2                                             # (C, M) f32

    # Lane-dense store of the (C, Hl*Wp) slab; wrapper strips the pad columns.
    if Mout > M:
        x4 = jnp.concatenate([x4, jnp.zeros((C, Mout - M), jnp.float32)],
                             axis=1)
    o_ref[0] = x4.astype(o_ref.dtype)


# ----------------------------------------------------------------------------
# Wrapper: one pallas_call for the whole EDPU forward.
# ----------------------------------------------------------------------------
def edpu_forward(x1, params, *, k, s, p, compute_dtype=jnp.float32):
    """EDPU forward (ConvTranspose2d path), fully fused into one Pallas kernel.

    x1: (N, H, W, C) NHWC.  The deconv is parameterized by the equivalent HWIO
    correlation kernel of the lhs-dilated conv (a PyTorch ConvTranspose2d
    weight (Ci,Co,kh,kw) maps to w_equiv[a,b,ci,co] = w_pt[ci,co,k-1-a,k-1-b]).
    Returns (N, H//s, W//s, C) NHWC.
    """
    N, H, W, C = x1.shape
    # Geometry restrictions of the fused phase-space implementation.
    # TODO(synk): general (k, s, p) geometries and the use_pixel_shuffle=True
    #             branch (Conv2d + PixelShuffle x2) are not implemented.
    assert (k % s == 0 and p % s == 0 and H % s == 0 and W % s == 0
            and k == 2 * p + s), f"unsupported EDPU geometry k={k} s={s} p={p}"

    ks, pp = k // s, p // s
    P, nt = s * s, (k // s) ** 2
    Hl, Wl = H // s, W // s                  # low-res (phase) spatial size
    Hp, Wp = Hl + 2 * pp, Wl + 2 * pp        # padded phase size
    Fp = Hp * Wp
    M = (Hl - 1) * Wp + Wl
    Mout = Hl * Wp
    f32 = jnp.float32

    # One-time input prep (tiny XLA ops on the kernel INPUT only): pad, split
    # into s*s phases, channels-first, spatial flattened into the lane axis.
    xpad = jnp.pad(x1, ((0, 0), (p, p), (p, p), (0, 0)))
    xpad = xpad.reshape(N, Hp, s, Wp, s, C).transpose(0, 2, 4, 5, 1, 3)
    x1p = xpad.reshape(N, P, C, Fp).astype(compute_dtype)

    # Weights pre-laid-out and pre-cast in the wrapper (nothing per grid step).
    w1 = _split_strided_weight(jnp.asarray(params['w_conv1'], f32),
                               s).astype(compute_dtype)
    w2 = _split_strided_weight(jnp.asarray(params['w_conv2'], f32),
                               s).astype(compute_dtype)
    wd = _split_deconv_weight(jnp.asarray(params['w_deconv1'], f32),
                              s).astype(compute_dtype)
    w11 = jnp.stack([jnp.asarray(params['w_111'], f32).T,
                     jnp.asarray(params['w_112'], f32).T]).astype(compute_dtype)

    def col(v):
        return jnp.asarray(v, f32).reshape(C, 1)

    def acol(v):
        return jnp.broadcast_to(jnp.asarray(v, f32).ravel(), (C,)).reshape(C, 1)

    ba = jnp.stack([col(params['b_conv1']), col(params['b_deconv1']),
                    col(params['b_conv2']), col(params['b_111']),
                    col(params['b_112']),
                    acol(params['a1']), acol(params['a2']),
                    acol(params['a3']), acol(params['a4'])])       # (9, C, 1)

    mask = ((jnp.arange(M) % Wp) < Wl).astype(f32).reshape(1, M)

    kernel = functools.partial(_edpu_kernel, s=s, ks=ks, C=C, Hl=Hl, Wl=Wl,
                               Wp=Wp, pp=pp)

    out = pl.pallas_call(
        kernel,
        out_shape=jax.ShapeDtypeStruct((N, C, Mout), f32),
        grid_spec=pltpu.PrefetchScalarGridSpec(
            num_scalar_prefetch=0,
            grid=(N,),
            in_specs=[
                pl.BlockSpec((1, P, C, Fp), lambda n: (n, 0, 0, 0)),
                pl.BlockSpec((P * nt, C, C), lambda n: (0, 0, 0)),   # conv1 W
                pl.BlockSpec((nt, P * C, C), lambda n: (0, 0, 0)),   # deconv W
                pl.BlockSpec((P * nt, C, C), lambda n: (0, 0, 0)),   # conv2 W
                pl.BlockSpec((2, C, C), lambda n: (0, 0, 0)),        # 1x1 Ws
                pl.BlockSpec((9, C, 1), lambda n: (0, 0, 0)),        # biases+alphas
                pl.BlockSpec((1, M), lambda n: (0, 0)),              # valid mask
            ],
            out_specs=pl.BlockSpec((1, C, Mout), lambda n: (n, 0, 0))),
        compiler_params=pltpu.CompilerParams(
            dimension_semantics=("parallel",)),
    )(x1p, w1, wd, w2, w11, ba, mask)

    # Strip pad columns and return NHWC.
    return out.reshape(N, C, Hl, Wp)[:, :, :, :Wl].transpose(0, 2, 3, 1)


# ----------------------------------------------------------------------------
# Pure-JAX reference (lax convs) for the correctness check.
# ----------------------------------------------------------------------------
def edpu_ref(x1, params, k, s, p):
    dn = ('NHWC', 'HWIO', 'NHWC')

    def prelu(x, a):
        return jnp.where(x >= 0, x, a * x)

    def conv(x, w, b, stride, pad, lhs_dil=(1, 1)):
        return lax.conv_general_dilated(
            x, w, (stride, stride), [(pad, pad)] * 2,
            lhs_dilation=lhs_dil, dimension_numbers=dn) + b

    x2 = prelu(conv(x1, params['w_conv1'], params['b_conv1'], s, p),
               params['a1'])
    x3u = conv(x2, params['w_deconv1'], params['b_deconv1'], 1, k - 1 - p,
               lhs_dil=(s, s))
    y111 = jnp.einsum('nhwc,co->nhwo', x1, params['w_111']) + params['b_111']
    x3 = x3u - prelu(y111, params['a2'])
    x4 = prelu(conv(x3, params['w_conv2'], params['b_conv2'], s, p),
               params['a3'])
    y112 = jnp.einsum('nhwc,co->nhwo', x2, params['w_112']) + params['b_112']
    return x4 + prelu(y112, params['a4'])


# ----------------------------------------------------------------------------
if __name__ == "__main__":
    # EDPU(channels=4, kernel_size=6, stride=2, padding=2); NCHW equiv (2,4,16,16)
    N, C, H, W = 2, 4, 16, 16
    k, s, p = 6, 2, 2

    keys = jax.random.split(jax.random.PRNGKey(0), 12)
    x1 = jax.random.normal(keys[0], (N, H, W, C), jnp.float32)

    params = {
        'w_conv1':   0.1 * jax.random.normal(keys[1], (k, k, C, C), jnp.float32),
        'b_conv1':   0.1 * jax.random.normal(keys[2], (C,), jnp.float32),
        'w_deconv1': 0.1 * jax.random.normal(keys[3], (k, k, C, C), jnp.float32),
        'b_deconv1': 0.1 * jax.random.normal(keys[4], (C,), jnp.float32),
        'w_conv2':   0.1 * jax.random.normal(keys[5], (k, k, C, C), jnp.float32),
        'b_conv2':   0.1 * jax.random.normal(keys[6], (C,), jnp.float32),
        'w_111':     0.1 * jax.random.normal(keys[7], (C, C), jnp.float32),
        'b_111':     0.1 * jax.random.normal(keys[8], (C,), jnp.float32),
        'w_112':     0.1 * jax.random.normal(keys[9], (C, C), jnp.float32),
        'b_112':     0.1 * jax.random.normal(keys[10], (C,), jnp.float32),
        # PReLU(num_parameters=1, init=0.25): scalar alpha broadcast over C.
        'a1': jnp.full((1, C), 0.25, jnp.float32),
        'a2': jnp.full((1, C), 0.25, jnp.float32),
        'a3': jnp.full((1, C), 0.25, jnp.float32),
        'a4': jnp.full((1, C), 0.25, jnp.float32),
    }

    ref = edpu_ref(x1, params, k, s, p)

    # f32 path: strict check against the lax reference.
    fwd = jax.jit(functools.partial(edpu_forward, k=k, s=s, p=p,
                                    compute_dtype=jnp.float32))
    out = jax.block_until_ready(fwd(x1, params))
    assert out.shape == (N, H // s, W // s, C), out.shape
    err = float(jnp.max(jnp.abs(out - ref)))
    assert err < 1e-3, f"f32 mismatch vs reference: {err}"

    # bf16-operand path (native MXU input dtype on v5e/v6e/v7x): relaxed
    # tolerance -- operands (incl. x1 and the 1x1 residuals) are rounded to
    # bf16 through three chained 6x6 convs; accumulation stays f32.
    fwd_bf16 = jax.jit(functools.partial(edpu_forward, k=k, s=s, p=p,
                                         compute_dtype=jnp.bfloat16))
    out_bf16 = jax.block_until_ready(fwd_bf16(x1, params))
    err_bf16 = float(jnp.max(jnp.abs(out_bf16 - ref)))
    assert err_bf16 < 1e-1, f"bf16 mismatch vs reference: {err_bf16}"

    print("KERNEL_OK")
</pallas_src>

<mosaic_0001>
module attributes {stable_mosaic.version = 11 : i64} {
  func.func @_edpu_kernel(%arg0: i32, %arg1: memref<1x4x4x100xf32, #tpu.memory_space<vmem>>, %arg2: memref<36x4x4xf32, #tpu.memory_space<vmem>>, %arg3: memref<9x16x4xf32, #tpu.memory_space<vmem>>, %arg4: memref<36x4x4xf32, #tpu.memory_space<vmem>>, %arg5: memref<2x4x4xf32, #tpu.memory_space<vmem>>, %arg6: memref<9x4x1xf32, #tpu.memory_space<vmem>>, %arg7: memref<1x78xf32, #tpu.memory_space<vmem>>, %arg8: memref<1x4x80xf32, #tpu.memory_space<vmem>>) attributes {dimension_semantics = [#tpu.dimension_semantics<parallel>], iteration_bounds = array<i64: 2>, scalar_prefetch = 0 : i64, scratch_operands = 0 : i64, tpu.core_type = #tpu.core_type<tc>, window_params = [{transform_indices = @transform_0, window_bounds = array<i64: 1, 4, 4, 100>}, {pipeline_mode = #tpu.pipeline_mode<synchronous>, transform_indices = @transform_1, window_bounds = array<i64: 36, 4, 4>}, {pipeline_mode = #tpu.pipeline_mode<synchronous>, transform_indices = @transform_2, window_bounds = array<i64: 9, 16, 4>}, {pipeline_mode = #tpu.pipeline_mode<synchronous>, transform_indices = @transform_3, window_bounds = array<i64: 36, 4, 4>}, {pipeline_mode = #tpu.pipeline_mode<synchronous>, transform_indices = @transform_4, window_bounds = array<i64: 2, 4, 4>}, {pipeline_mode = #tpu.pipeline_mode<synchronous>, transform_indices = @transform_5, window_bounds = array<i64: 9, 4, 1>}, {pipeline_mode = #tpu.pipeline_mode<synchronous>, transform_indices = @transform_6, window_bounds = array<i64: 1, 78>}, {transform_indices = @transform_7, window_bounds = array<i64: 1, 4, 80>}]} {
    %c0 = arith.constant 0 : index
    %c0_0 = arith.constant 0 : index
    %0 = vector.load %arg7[%c0, %c0_0] : memref<1x78xf32, #tpu.memory_space<vmem>>, vector<1x78xf32>
    %c0_1 = arith.constant 0 : index
    %c0_2 = arith.constant 0 : index
    %c0_3 = arith.constant 0 : index
    %1 = vector.load %arg6[%c0_1, %c0_2, %c0_3] : memref<9x4x1xf32, #tpu.memory_space<vmem>>, vector<9x4x1xf32>
    %2 = vector.extract_strided_slice %1 {offsets = [0, 0, 0], sizes = [1, 4, 1], strides = [1, 1, 1]} : vector<9x4x1xf32> to vector<1x4x1xf32>
    %3 = vector.shape_cast %2 : vector<1x4x1xf32> to vector<4x1xf32>
    %4 = vector.extract_strided_slice %1 {offsets = [1, 0, 0], sizes = [1, 4, 1], strides = [1, 1, 1]} : vector<9x4x1xf32> to vector<1x4x1xf32>
    %5 = vector.shape_cast %4 : vector<1x4x1xf32> to vector<4x1xf32>
    %6 = vector.extract_strided_slice %1 {offsets = [2, 0, 0], sizes = [1, 4, 1], strides = [1, 1, 1]} : vector<9x4x1xf32> to vector<1x4x1xf32>
    %7 = vector.shape_cast %6 : vector<1x4x1xf32> to vector<4x1xf32>
    %8 = vector.extract_strided_slice %1 {offsets = [3, 0, 0], sizes = [1, 4, 1], strides = [1, 1, 1]} : vector<9x4x1xf32> to vector<1x4x1xf32>
    %9 = vector.shape_cast %8 : vector<1x4x1xf32> to vector<4x1xf32>
    %10 = vector.extract_strided_slice %1 {offsets = [4, 0, 0], sizes = [1, 4, 1], strides = [1, 1, 1]} : vector<9x4x1xf32> to vector<1x4x1xf32>
    %11 = vector.shape_cast %10 : vector<1x4x1xf32> to vector<4x1xf32>
    %12 = vector.extract_strided_slice %1 {offsets = [5, 0, 0], sizes = [1, 4, 1], strides = [1, 1, 1]} : vector<9x4x1xf32> to vector<1x4x1xf32>
    %13 = vector.shape_cast %12 : vector<1x4x1xf32> to vector<4x1xf32>
    %14 = vector.extract_strided_slice %1 {offsets = [6, 0, 0], sizes = [1, 4, 1], strides = [1, 1, 1]} : vector<9x4x1xf32> to vector<1x4x1xf32>
    %15 = vector.shape_cast %14 : vector<1x4x1xf32> to vector<4x1xf32>
    %16 = vector.extract_strided_slice %1 {offsets = [7, 0, 0], sizes = [1, 4, 1], strides = [1, 1, 1]} : vector<9x4x1xf32> to vector<1x4x1xf32>
    %17 = vector.shape_cast %16 : vector<1x4x1xf32> to vector<4x1xf32>
    %18 = vector.extract_strided_slice %1 {offsets = [8, 0, 0], sizes = [1, 4, 1], strides = [1, 1, 1]} : vector<9x4x1xf32> to vector<1x4x1xf32>
    %19 = vector.shape_cast %18 : vector<1x4x1xf32> to vector<4x1xf32>
    %c0_4 = arith.constant 0 : index
    %c0_5 = arith.constant 0 : index
    %c0_6 = arith.constant 0 : index
    %20 = vector.load %arg5[%c0_4, %c0_5, %c0_6] : memref<2x4x4xf32, #tpu.memory_space<vmem>>, vector<2x4x4xf32>
    %c0_7 = arith.constant 0 : index
    %c0_8 = arith.constant 0 : index
    %c0_9 = arith.constant 0 : index
    %21 = vector.load %arg2[%c0_7, %c0_8, %c0_9] : memref<36x4x4xf32, #tpu.memory_space<vmem>>, vector<36x4x4xf32>
    %c0_10 = arith.constant 0 : index
    %c0_11 = arith.constant 0 : index
    %c0_12 = arith.constant 0 : index
    %22 = vector.load %arg3[%c0_10, %c0_11, %c0_12] : memref<9x16x4xf32, #tpu.memory_space<vmem>>, vector<9x16x4xf32>
    %c0_13 = arith.constant 0 : index
    %c0_14 = arith.constant 0 : index
    %c0_15 = arith.constant 0 : index
    %23 = vector.load %arg4[%c0_13, %c0_14, %c0_15] : memref<36x4x4xf32, #tpu.memory_space<vmem>>, vector<36x4x4xf32>
    %c0_16 = arith.constant 0 : index
    %c0_17 = arith.constant 0 : index
    %c0_18 = arith.constant 0 : index
    %c0_19 = arith.constant 0 : index
    %24 = vector.load %arg1[%c0_16, %c0_17, %c0_18, %c0_19] : memref<1x4x4x100xf32, #tpu.memory_space<vmem>>, vector<1x4x4x100xf32>
    %25 = vector.shape_cast %24 : vector<1x4x4x100xf32> to vector<4x4x100xf32>
    %26 = vector.extract_strided_slice %25 {offsets = [0, 0, 0], sizes = [1, 4, 100], strides = [1, 1, 1]} : vector<4x4x100xf32> to vector<1x4x100xf32>
    %27 = vector.shape_cast %26 : vector<1x4x100xf32> to vector<4x100xf32>
    %28 = vector.extract_strided_slice %25 {offsets = [1, 0, 0], sizes = [1, 4, 100], strides = [1, 1, 1]} : vector<4x4x100xf32> to vector<1x4x100xf32>
    %29 = vector.shape_cast %28 : vector<1x4x100xf32> to vector<4x100xf32>
    %30 = vector.extract_strided_slice %25 {offsets = [2, 0, 0], sizes = [1, 4, 100], strides = [1, 1, 1]} : vector<4x4x100xf32> to vector<1x4x100xf32>
    %31 = vector.shape_cast %30 : vector<1x4x100xf32> to vector<4x100xf32>
    %32 = vector.extract_strided_slice %25 {offsets = [3, 0, 0], sizes = [1, 4, 100], strides = [1, 1, 1]} : vector<4x4x100xf32> to vector<1x4x100xf32>
    %33 = vector.shape_cast %32 : vector<1x4x100xf32> to vector<4x100xf32>
    %cst = arith.constant 0.000000e+00 : f32
    %34 = vector.broadcast %cst : f32 to vector<4x78xf32>
    %35 = vector.extract_strided_slice %21 {offsets = [0, 0, 0], sizes = [1, 4, 4], strides = [1, 1, 1]} : vector<36x4x4xf32> to vector<1x4x4xf32>
    %36 = vector.shape_cast %35 : vector<1x4x4xf32> to vector<4x4xf32>
    %37 = vector.extract_strided_slice %27 {offsets = [0, 0], sizes = [4, 78], strides = [1, 1]} : vector<4x100xf32> to vector<4x78xf32>
    %cst_20 = arith.constant dense<0.000000e+00> : vector<4x78xf32>
    %38 = tpu.matmul %36, %37, %cst_20 {dimension_numbers = #tpu.dot_dimension_numbers<[1], [0], [0], [1], [0, 0, 1, 1], [], []>} : vector<4x4xf32>, vector<4x78xf32>, vector<4x78xf32> -> vector<4x78xf32>
    %39 = arith.addf %34, %38 : vector<4x78xf32>
    %40 = vector.extract_strided_slice %21 {offsets = [1, 0, 0], sizes = [1, 4, 4], strides = [1, 1, 1]} : vector<36x4x4xf32> to vector<1x4x4xf32>
    %41 = vector.shape_cast %40 : vector<1x4x4xf32> to vector<4x4xf32>
    %42 = vector.extract_strided_slice %27 {offsets = [0, 1], sizes = [4, 78], strides = [1, 1]} : vector<4x100xf32> to vector<4x78xf32>
    %cst_21 = arith.constant dense<0.000000e+00> : vector<4x78xf32>
    %43 = tpu.matmul %41, %42, %cst_21 {dimension_numbers = #tpu.dot_dimension_numbers<[1], [0], [0], [1], [0, 0, 1, 1], [], []>} : vector<4x4xf32>, vector<4x78xf32>, vector<4x78xf32> -> vector<4x78xf32>
    %44 = arith.addf %39, %43 : vector<4x78xf32>
    %45 = vector.extract_strided_slice %21 {offsets = [2, 0, 0], sizes = [1, 4, 4], strides = [1, 1, 1]} : vector<36x4x4xf32> to vector<1x4x4xf32>
    %46 = vector.shape_cast %45 : vector<1x4x4xf32> to vector<4x4xf32>
    %47 = vector.extract_strided_slice %27 {offsets = [0, 2], sizes = [4, 78], strides = [1, 1]} : vector<4x100xf32> to vector<4x78xf32>
    %cst_22 = arith.constant dense<0.000000e+00> : vector<4x78xf32>
    %48 = tpu.matmul %46, %47, %cst_22 {dimension_numbers = #tpu.dot_dimension_numbers<[1], [0], [0], [1], [0, 0, 1, 1], [], []>} : vector<4x4xf32>, vector<4x78xf32>, vector<4x78xf32> -> vector<4x78xf32>
    %49 = arith.addf %44, %48 : vector<4x78xf32>
    %50 = vector.extract_strided_slice %21 {offsets = [3, 0, 0], sizes = [1, 4, 4], strides = [1, 1, 1]} : vector<36x4x4xf32> to vector<1x4x4xf32>
    %51 = vector.shape_cast %50 : vector<1x4x4xf32> to vector<4x4xf32>
    %52 = vector.extract_strided_slice %27 {offsets = [0, 10], sizes = [4, 78], strides = [1, 1]} : vector<4x100xf32> to vector<4x78xf32>
    %cst_23 = arith.constant dense<0.000000e+00> : vector<4x78xf32>
    %53 = tpu.matmul %51, %52, %cst_23 {dimension_numbers = #tpu.dot_dimension_numbers<[1], [0], [0], [1], [0, 0, 1, 1], [], []>} : vector<4x4xf32>, vector<4x78xf32>, vector<4x78xf32> -> vector<4x78xf32>
    %54 = arith.addf %49, %53 : vector<4x78xf32>
    %55 = vector.extract_strided_slice %21 {offsets = [4, 0, 0], sizes = [1, 4, 4], strides = [1, 1, 1]} : vector<36x4x4xf32> to vector<1x4x4xf32>
    %56 = vector.shape_cast %55 : vector<1x4x4xf32> to vector<4x4xf32>
    %57 = vector.extract_strided_slice %27 {offsets = [0, 11], sizes = [4, 78], strides = [1, 1]} : vector<4x100xf32> to vector<4x78xf32>
    %cst_24 = arith.constant dense<0.000000e+00> : vector<4x78xf32>
    %58 = tpu.matmul %56, %57, %cst_24 {dimension_numbers = #tpu.dot_dimension_numbers<[1], [0], [0], [1], [0, 0, 1, 1], [], []>} : vector<4x4xf32>, vector<4x78xf32>, vector<4x78xf32> -> vector<4x78xf32>
    %59 = arith.addf %54, %58 : vector<4x78xf32>
    %60 = vector.extract_strided_slice %21 {offsets = [5, 0, 0], sizes = [1, 4, 4], strides = [1, 1, 1]} : vector<36x4x4xf32> to vector<1x4x4xf32>
    %61 = vector.shape_cast %60 : vector<1x4x4xf32> to vector<4x4xf32>
    %62 = vector.extract_strided_slice %27 {offsets = [0, 12], sizes = [4, 78], strides = [1, 1]} : vector<4x100xf32> to vector<4x78xf32>
    %cst_25 = arith.constant dense<0.000000e+00> : vector<4x78xf32>
    %63 = tpu.matmul %61, %62, %cst_25 {dimension_numbers = #tpu.dot_dimension_numbers<[1], [0], [0], [1], [0, 0, 1, 1], [], []>} : vector<4x4xf32>, vector<4x78xf32>, vector<4x78xf32> -> vector<4x78xf32>
    %64 = arith.addf %59, %63 : vector<4x78xf32>
    %65 = vector.extract_strided_slice %21 {offsets = [6, 0, 0], sizes = [1, 4, 4], strides = [1, 1, 1]} : vector<36x4x4xf32> to vector<1x4x4xf32>
    %66 = vector.shape_cast %65 : vector<1x4x4xf32> to vector<4x4xf32>
    %67 = vector.extract_strided_slice %27 {offsets = [0, 20], sizes = [4, 78], strides = [1, 1]} : vector<4x100xf32> to vector<4x78xf32>
    %cst_26 = arith.constant dense<0.000000e+00> : vector<4x78xf32>
    %68 = tpu.matmul %66, %67, %cst_26 {dimension_numbers = #tpu.dot_dimension_numbers<[1], [0], [0], [1], [0, 0, 1, 1], [], []>} : vector<4x4xf32>, vector<4x78xf32>, vector<4x78xf32> -> vector<4x78xf32>
    %69 = arith.addf %64, %68 : vector<4x78xf32>
    %70 = vector.extract_strided_slice %21 {offsets = [7, 0, 0], sizes = [1, 4, 4], strides = [1, 1, 1]} : vector<36x4x4xf32> to vector<1x4x4xf32>
    %71 = vector.shape_cast %70 : vector<1x4x4xf32> to vector<4x4xf32>
    %72 = vector.extract_strided_slice %27 {offsets = [0, 21], sizes = [4, 78], strides = [1, 1]} : vector<4x100xf32> to vector<4x78xf32>
    %cst_27 = arith.constant dense<0.000000e+00> : vector<4x78xf32>
    %73 = tpu.matmul %71, %72, %cst_27 {dimension_numbers = #tpu.dot_dimension_numbers<[1], [0], [0], [1], [0, 0, 1, 1], [], []>} : vector<4x4xf32>, vector<4x78xf32>, vector<4x78xf32> -> vector<4x78xf32>
    %74 = arith.addf %69, %73 : vector<4x78xf32>
    %75 = vector.extract_strided_slice %21 {offsets = [8, 0, 0], sizes = [1, 4, 4], strides = [1, 1, 1]} : vector<36x4x4xf32> to vector<1x4x4xf32>
    %76 = vector.shape_cast %75 : vector<1x4x4xf32> to vector<4x4xf32>
    %77 = vector.extract_strided_slice %27 {offsets = [0, 22], sizes = [4, 78], strides = [1, 1]} : vector<4x100xf32> to vector<4x78xf32>
    %cst_28 = arith.constant dense<0.000000e+00> : vector<4x78xf32>
    %78 = tpu.matmul %76, %77, %cst_28 {dimension_numbers = #tpu.dot_dimension_numbers<[1], [0], [0], [1], [0, 0, 1, 1], [], []>} : vector<4x4xf32>, vector<4x78xf32>, vector<4x78xf32> -> vector<4x78xf32>
    %79 = arith.addf %74, %78 : vector<4x78xf32>
    %80 = vector.extract_strided_slice %21 {offsets = [9, 0, 0], sizes = [1, 4, 4], strides = [1, 1, 1]} : vector<36x4x4xf32> to vector<1x4x4xf32>
    %81 = vector.shape_cast %80 : vector<1x4x4xf32> to vector<4x4xf32>
    %82 = vector.extract_strided_slice %29 {offsets = [0, 0], sizes = [4, 78], strides = [1, 1]} : vector<4x100xf32> to vector<4x78xf32>
    %cst_29 = arith.constant dense<0.000000e+00> : vector<4x78xf32>
    %83 = tpu.matmul %81, %82, %cst_29 {dimension_numbers = #tpu.dot_dimension_numbers<[1], [0], [0], [1], [0, 0, 1, 1], [], []>} : vector<4x4xf32>, vector<4x78xf32>, vector<4x78xf32> -> vector<4x78xf32>
    %84 = arith.addf %79, %83 : vector<4x78xf32>
    %85 = vector.extract_strided_slice %21 {offsets = [10, 0, 0], sizes = [1, 4, 4], strides = [1, 1, 1]} : vector<36x4x4xf32> to vector<1x4x4xf32>
    %86 = vector.shape_cast %85 : vector<1x4x4xf32> to vector<4x4xf32>
    %87 = vector.extract_strided_slice %29 {offsets = [0, 1], sizes = [4, 78], strides = [1, 1]} : vector<4x100xf32> to vector<4x78xf32>
    %cst_30 = arith.constant dense<0.000000e+00> : vector<4x78xf32>
    %88 = tpu.matmul %86, %87, %cst_30 {dimension_numbers = #tpu.dot_dimension_numbers<[1], [0], [0], [1], [0, 0, 1, 1], [], []>} : vector<4x4xf32>, vector<4x78xf32>, vector<4x78xf32> -> vector<4x78xf32>
    %89 = arith.addf %84, %88 : vector<4x78xf32>
    %90 = vector.extract_strided_slice %21 {offsets = [11, 0, 0], sizes = [1, 4, 4], strides = [1, 1, 1]} : vector<36x4x4xf32> to vector<1x4x4xf32>
    %91 = vector.shape_cast %90 : vector<1x4x4xf32> to vector<4x4xf32>
    %92 = vector.extract_strided_slice %29 {offsets = [0, 2], sizes = [4, 78], strides = [1, 1]} : vector<4x100xf32> to vector<4x78xf32>
    %cst_31 = arith.constant dense<0.000000e+00> : vector<4x78xf32>
    %93 = tpu.matmul %91, %92, %cst_31 {dimension_numbers = #tpu.dot_dimension_numbers<[1], [0], [0], [1], [0, 0, 1, 1], [], []>} : vector<4x4xf32>, vector<4x78xf32>, vector<4x78xf32> -> vector<4x78xf32>
    %94 = arith.addf %89, %93 : vector<4x78xf32>
    %95 = vector.extract_strided_slice %21 {offsets = [12, 0, 0], sizes = [1, 4, 4], strides = [1, 1, 1]} : vector<36x4x4xf32> to vector<1x4x4xf32>
    %96 = vector.shape_cast %95 : vector<1x4x4xf32> to vector<4x4xf32>
    %97 = vector.extract_strided_slice %29 {offsets = [0, 10], sizes = [4, 78], strides = [1, 1]} : vector<4x100xf32> to vector<4x78xf32>
    %cst_32 = arith.constant dense<0.000000e+00> : vector<4x78xf32>
    %98 = tpu.matmul %96, %97, %cst_32 {dimension_numbers = #tpu.dot_dimension_numbers<[1], [0], [0], [1], [0, 0, 1, 1], [], []>} : vector<4x4xf32>, vector<4x78xf32>, vector<4x78xf32> -> vector<4x78xf32>
    %99 = arith.addf %94, %98 : vector<4x78xf32>
    %100 = vector.extract_strided_slice %21 {offsets = [13, 0, 0], sizes = [1, 4, 4], strides = [1, 1, 1]} : vector<36x4x4xf32> to vector<1x4x4xf32>
    %101 = vector.shape_cast %100 : vector<1x4x4xf32> to vector<4x4xf32>
    %102 = vector.extract_strided_slice %29 {offsets = [0, 11], sizes = [4, 78], strides = [1, 1]} : vector<4x100xf32> to vector<4x78xf32>
    %cst_33 = arith.constant dense<0.000000e+00> : vector<4x78xf32>
    %103 = tpu.matmul %101, %102, %cst_33 {dimension_numbers = #tpu.dot_dimension_numbers<[1], [0], [0], [1], [0, 0, 1, 1], [], []>} : vector<4x4xf32>, vector<4x78xf32>, vector<4x78xf32> -> vector<4x78xf32>
    %104 = arith.addf %99, %103 : vector<4x78xf32>
    %105 = vector.extract_strided_slice %21 {offsets = [14, 0, 0], sizes = [1, 4, 4], strides = [1, 1, 1]} : vector<36x4x4xf32> to vector<1x4x4xf32>
    %106 = vector.shape_cast %105 : vector<1x4x4xf32> to vector<4x4xf32>
    %107 = vector.extract_strided_slice %29 {offsets = [0, 12], sizes = [4, 78], strides = [1, 1]} : vector<4x100xf32> to vector<4x78xf32>
    %cst_34 = arith.constant dense<0.000000e+00> : vector<4x78xf32>
    %108 = tpu.matmul %106, %107, %cst_34 {dimension_numbers = #tpu.dot_dimension_numbers<[1], [0], [0], [1], [0, 0, 1, 1], [], []>} : vector<4x4xf32>, vector<4x78xf32>, vector<4x78xf32> -> vector<4x78xf32>
    %109 = arith.addf %104, %108 : vector<4x78xf32>
    %110 = vector.extract_strided_slice %21 {offsets = [15, 0, 0], sizes = [1, 4, 4], strides = [1, 1, 1]} : vector<36x4x4xf32> to vector<1x4x4xf32>
    %111 = vector.shape_cast %110 : vector<1x4x4xf32> to vector<4x4xf32>
    %112 = vector.extract_strided_slice %29 {offsets = [0, 20], sizes = [4, 78], strides = [1, 1]} : vector<4x100xf32> to vector<4x78xf32>
    %cst_35 = arith.constant dense<0.000000e+00> : vector<4x78xf32>
    %113 = tpu.matmul %111, %112, %cst_35 {dimension_numbers = #tpu.dot_dimension_numbers<[1], [0], [0], [1], [0, 0, 1, 1], [], []>} : vector<4x4xf32>, vector<4x78xf32>, vector<4x78xf32> -> vector<4x78xf32>
    %114 = arith.addf %109, %113 : vector<4x78xf32>
    %115 = vector.extract_strided_slice %21 {offsets = [16, 0, 0], sizes = [1, 4, 4], strides = [1, 1, 1]} : vector<36x4x4xf32> to vector<1x4x4xf32>
    %116 = vector.shape_cast %115 : vector<1x4x4xf32> to vector<4x4xf32>
    %117 = vector.extract_strided_slice %29 {offsets = [0, 21], sizes = [4, 78], strides = [1, 1]} : vector<4x100xf32> to vector<4x78xf32>
    %cst_36 = arith.constant dense<0.000000e+00> : vector<4x78xf32>
    %118 = tpu.matmul %116, %117, %cst_36 {dimension_numbers = #tpu.dot_dimension_numbers<[1], [0], [0], [1], [0, 0, 1, 1], [], []>} : vector<4x4xf32>, vector<4x78xf32>, vector<4x78xf32> -> vector<4x78xf32>
    %119 = arith.addf %114, %118 : vector<4x78xf32>
    %120 = vector.extract_strided_slice %21 {offsets = [17, 0, 0], sizes = [1, 4, 4], strides = [1, 1, 1]} : vector<36x4x4xf32> to vector<1x4x4xf32>
    %121 = vector.shape_cast %120 : vector<1x4x4xf32> to vector<4x4xf32>
    %122 = vector.extract_strided_slice %29 {offsets = [0, 22], sizes = [4, 78], strides = [1, 1]} : vector<4x100xf32> to vector<4x78xf32>
    %cst_37 = arith.constant dense<0.000000e+00> : vector<4x78xf32>
    %123 = tpu.matmul %121, %122, %cst_37 {dimension_numbers = #tpu.dot_dimension_numbers<[1], [0], [0], [1], [0, 0, 1, 1], [], []>} : vector<4x4xf32>, vector<4x78xf32>, vector<4x78xf32> -> vector<4x78xf32>
    %124 = arith.addf %119, %123 : vector<4x78xf32>
    %125 = vector.extract_strided_slice %21 {offsets = [18, 0, 0], sizes = [1, 4, 4], strides = [1, 1, 1]} : vector<36x4x4xf32> to vector<1x4x4xf32>
    %126 = vector.shape_cast %125 : vector<1x4x4xf32> to vector<4x4xf32>
    %127 = vector.extract_strided_slice %31 {offsets = [0, 0], sizes = [4, 78], strides = [1, 1]} : vector<4x100xf32> to vector<4x78xf32>
    %cst_38 = arith.constant dense<0.000000e+00> : vector<4x78xf32>
    %128 = tpu.matmul %126, %127, %cst_38 {dimension_numbers = #tpu.dot_dimension_numbers<[1], [0], [0], [1], [0, 0, 1, 1], [], []>} : vector<4x4xf32>, vector<4x78xf32>, vector<4x78xf32> -> vector<4x78xf32>
    %129 = arith.addf %124, %128 : vector<4x78xf32>
    %130 = vector.extract_strided_slice %21 {offsets = [19, 0, 0], sizes = [1, 4, 4], strides = [1, 1, 1]} : vector<36x4x4xf32> to vector<1x4x4xf32>
    %131 = vector.shape_cast %130 : vector<1x4x4xf32> to vector<4x4xf32>
    %132 = vector.extract_strided_slice %31 {offsets = [0, 1], sizes = [4, 78], strides = [1, 1]} : vector<4x100xf32> to vector<4x78xf32>
    %cst_39 = arith.constant dense<0.000000e+00> : vector<4x78xf32>
    %133 = tpu.matmul %131, %132, %cst_39 {dimension_numbers = #tpu.dot_dimension_numbers<[1], [0], [0], [1], [0, 0, 1, 1], [], []>} : vector<4x4xf32>, vector<4x78xf32>, vector<4x78xf32> -> vector<4x78xf32>
    %134 = arith.addf %129, %133 : vector<4x78xf32>
    %135 = vector.extract_strided_slice %21 {offsets = [20, 0, 0], sizes = [1, 4, 4], strides = [1, 1, 1]} : vector<36x4x4xf32> to vector<1x4x4xf32>
    %136 = vector.shape_cast %135 : vector<1x4x4xf32> to vector<4x4xf32>
    %137 = vector.extract_strided_slice %31 {offsets = [0, 2], sizes = [4, 78], strides = [1, 1]} : vector<4x100xf32> to vector<4x78xf32>
    %cst_40 = arith.constant dense<0.000000e+00> : vector<4x78xf32>
    %138 = tpu.matmul %136, %137, %cst_40 {dimension_numbers = #tpu.dot_dimension_numbers<[1], [0], [0], [1], [0, 0, 1, 1], [], []>} : vector<4x4xf32>, vector<4x78xf32>, vector<4x78xf32> -> vector<4x78xf32>
    %139 = arith.addf %134, %138 : vector<4x78xf32>
    %140 = vector.extract_strided_slice %21 {offsets = [21, 0, 0], sizes = [1, 4, 4], strides = [1, 1, 1]} : vector<36x4x4xf32> to vector<1x4x4xf32>
    %141 = vector.shape_cast %140 : vector<1x4x4xf32> to vector<4x4xf32>
    %142 = vector.extract_strided_slice %31 {offsets = [0, 10], sizes = [4, 78], strides = [1, 1]} : vector<4x100xf32> to vector<4x78xf32>
    %cst_41 = arith.constant dense<0.000000e+00> : vector<4x78xf32>
    %143 = tpu.matmul %141, %142, %cst_41 {dimension_numbers = #tpu.dot_dimension_numbers<[1], [0], [0], [1], [0, 0, 1, 1], [], []>} : vector<4x4xf32>, vector<4x78xf32>, vector<4x78xf32> -> vector<4x78xf32>
    %144 = arith.addf %139, %143 : vector<4x78xf32>
    %145 = vector.extract_strided_slice %21 {offsets = [22, 0, 0], sizes = [1, 4, 4], strides = [1, 1, 1]} : vector<36x4x4xf32> to vector<1x4x4xf32>
    %146 = vector.shape_cast %145 : vector<1x4x4xf32> to vector<4x4xf32>
    %147 = vector.extract_strided_slice %31 {offsets = [0, 11], sizes = [4, 78], strides = [1, 1]} : vector<4x100xf32> to vector<4x78xf32>
    %cst_42 = arith.constant dense<0.000000e+00> : vector<4x78xf32>
    %148 = tpu.matmul %146, %147, %cst_42 {dimension_numbers = #tpu.dot_dimension_numbers<[1], [0], [0], [1], [0, 0, 1, 1], [], []>} : vector<4x4xf32>, vector<4x78xf32>, vector<4x78xf32> -> vector<4x78xf32>
    %149 = arith.addf %144, %148 : vector<4x78xf32>
    %150 = vector.extract_strided_slice %21 {offsets = [23, 0, 0], sizes = [1, 4, 4], strides = [1, 1, 1]} : vector<36x4x4xf32> to vector<1x4x4xf32>
    %151 = vector.shape_cast %150 : vector<1x4x4xf32> to vector<4x4xf32>
    %152 = vector.extract_strided_slice %31 {offsets = [0, 12], sizes = [4, 78], strides = [1, 1]} : vector<4x100xf32> to vector<4x78xf32>
    %cst_43 = arith.constant dense<0.000000e+00> : vector<4x78xf32>
    %153 = tpu.matmul %151, %152, %cst_43 {dimension_numbers = #tpu.dot_dimension_numbers<[1], [0], [0], [1], [0, 0, 1, 1], [], []>} : vector<4x4xf32>, vector<4x78xf32>, vector<4x78xf32> -> vector<4x78xf32>
    %154 = arith.addf %149, %153 : vector<4x78xf32>
    %155 = vector.extract_strided_slice %21 {offsets = [24, 0, 0], sizes = [1, 4, 4], strides = [1, 1, 1]} : vector<36x4x4xf32> to vector<1x4x4xf32>
    %156 = vector.shape_cast %155 : vector<1x4x4xf32> to vector<4x4xf32>
    %157 = vector.extract_strided_slice %31 {offsets = [0, 20], sizes = [4, 78], strides = [1, 1]} : vector<4x100xf32> to vector<4x78xf32>
    %cst_44 = arith.constant dense<0.000000e+00> : vector<4x78xf32>
    %158 = tpu.matmul %156, %157, %cst_44 {dimension_numbers = #tpu.dot_dimension_numbers<[1], [0], [0], [1], [0, 0, 1, 1], [], []>} : vector<4x4xf32>, vector<4x78xf32>, vector<4x78xf32> -> vector<4x78xf32>
    %159 = arith.addf %154, %158 : vector<4x78xf32>
    %160 = vector.extract_strided_slice %21 {offsets = [25, 0, 0], sizes = [1, 4, 4], strides = [1, 1, 1]} : vector<36x4x4xf32> to vector<1x4x4xf32>
    %161 = vector.shape_cast %160 : vector<1x4x4xf32> to vector<4x4xf32>
    %162 = vector.extract_strided_slice %31 {offsets = [0, 21], sizes = [4, 78], strides = [1, 1]} : vector<4x100xf32> to vector<4x78xf32>
    %cst_45 = arith.constant dense<0.000000e+00> : vector<4x78xf32>
    %163 = tpu.matmul %161, %162, %cst_45 {dimension_numbers = #tpu.dot_dimension_numbers<[1], [0], [0], [1], [0, 0, 1, 1], [], []>} : vector<4x4xf32>, vector<4x78xf32>, vector<4x78xf32> -> vector<4x78xf32>
    %164 = arith.addf %159, %163 : vector<4x78xf32>
    %165 = vector.extract_strided_slice %21 {offsets = [26, 0, 0], sizes = [1, 4, 4], strides = [1, 1, 1]} : vector<36x4x4xf32> to vector<1x4x4xf32>
    %166 = vector.shape_cast %165 : vector<1x4x4xf32> to vector<4x4xf32>
    %167 = vector.extract_strided_slice %31 {offsets = [0, 22], sizes = [4, 78], strides = [1, 1]} : vector<4x100xf32> to vector<4x78xf32>
    %cst_46 = arith.constant dense<0.000000e+00> : vector<4x78xf32>
    %168 = tpu.matmul %166, %167, %cst_46 {dimension_numbers = #tpu.dot_dimension_numbers<[1], [0], [0], [1], [0, 0, 1, 1], [], []>} : vector<4x4xf32>, vector<4x78xf32>, vector<4x78xf32> -> vector<4x78xf32>
    %169 = arith.addf %164, %168 : vector<4x78xf32>
    %170 = vector.extract_strided_slice %21 {offsets = [27, 0, 0], sizes = [1, 4, 4], strides = [1, 1, 1]} : vector<36x4x4xf32> to vector<1x4x4xf32>
    %171 = vector.shape_cast %170 : vector<1x4x4xf32> to vector<4x4xf32>
    %172 = vector.extract_strided_slice %33 {offsets = [0, 0], sizes = [4, 78], strides = [1, 1]} : vector<4x100xf32> to vector<4x78xf32>
    %cst_47 = arith.constant dense<0.000000e+00> : vector<4x78xf32>
    %173 = tpu.matmul %171, %172, %cst_47 {dimension_numbers = #tpu.dot_dimension_numbers<[1], [0], [0], [1], [0, 0, 1, 1], [], []>} : vector<4x4xf32>, vector<4x78xf32>, vector<4x78xf32> -> vector<4x78xf32>
    %174 = arith.addf %169, %173 : vector<4x78xf32>
    %175 = vector.extract_strided_slice %21 {offsets = [28, 0, 0], sizes = [1, 4, 4], strides = [1, 1, 1]} : vector<36x4x4xf32> to vector<1x4x4xf32>
    %176 = vector.shape_cast %175 : vector<1x4x4xf32> to vector<4x4xf32>
    %177 = vector.extract_strided_slice %33 {offsets = [0, 1], sizes = [4, 78], strides = [1, 1]} : vector<4x100xf32> to vector<4x78xf32>
    %cst_48 = arith.constant dense<0.000000e+00> : vector<4x78xf32>
    %178 = tpu.matmul %176, %177, %cst_48 {dimension_numbers = #tpu.dot_dimension_numbers<[1], [0], [0], [1], [0, 0, 1, 1], [], []>} : vector<4x4xf32>, vector<4x78xf32>, vector<4x78xf32> -> vector<4x78xf32>
    %179 = arith.addf %174, %178 : vector<4x78xf32>
    %180 = vector.extract_strided_slice %21 {offsets = [29, 0, 0], sizes = [1, 4, 4], strides = [1, 1, 1]} : vector<36x4x4xf32> to vector<1x4x4xf32>
    %181 = vector.shape_cast %180 : vector<1x4x4xf32> to vector<4x4xf32>
    %182 = vector.extract_strided_slice %33 {offsets = [0, 2], sizes = [4, 78], strides = [1, 1]} : vector<4x100xf32> to vector<4x78xf32>
    %cst_49 = arith.constant dense<0.000000e+00> : vector<4x78xf32>
    %183 = tpu.matmul %181, %182, %cst_49 {dimension_numbers = #tpu.dot_dimension_numbers<[1], [0], [0], [1], [0, 0, 1, 1], [], []>} : vector<4x4xf32>, vector<4x78xf32>, vector<4x78xf32> -> vector<4x78xf32>
    %184 = arith.addf %179, %183 : vector<4x78xf32>
    %185 = vector.extract_strided_slice %21 {offsets = [30, 0, 0], sizes = [1, 4, 4], strides = [1, 1, 1]} : vector<36x4x4xf32> to vector<1x4x4xf32>
    %186 = vector.shape_cast %185 : vector<1x4x4xf32> to vector<4x4xf32>
    %187 = vector.extract_strided_slice %33 {offsets = [0, 10], sizes = [4, 78], strides = [1, 1]} : vector<4x100xf32> to vector<4x78xf32>
    %cst_50 = arith.constant dense<0.000000e+00> : vector<4x78xf32>
    %188 = tpu.matmul %186, %187, %cst_50 {dimension_numbers = #tpu.dot_dimension_numbers<[1], [0], [0], [1], [0, 0, 1, 1], [], []>} : vector<4x4xf32>, vector<4x78xf32>, vector<4x78xf32> -> vector<4x78xf32>
    %189 = arith.addf %184, %188 : vector<4x78xf32>
    %190 = vector.extract_strided_slice %21 {offsets = [31, 0, 0], sizes = [1, 4, 4], strides = [1, 1, 1]} : vector<36x4x4xf32> to vector<1x4x4xf32>
    %191 = vector.shape_cast %190 : vector<1x4x4xf32> to vector<4x4xf32>
    %192 = vector.extract_strided_slice %33 {offsets = [0, 11], sizes = [4, 78], strides = [1, 1]} : vector<4x100xf32> to vector<4x78xf32>
    %cst_51 = arith.constant dense<0.000000e+00> : vector<4x78xf32>
    %193 = tpu.matmul %191, %192, %cst_51 {dimension_numbers = #tpu.dot_dimension_numbers<[1], [0], [0], [1], [0, 0, 1, 1], [], []>} : vector<4x4xf32>, vector<4x78xf32>, vector<4x78xf32> -> vector<4x78xf32>
    %194 = arith.addf %189, %193 : vector<4x78xf32>
    %195 = vector.extract_strided_slice %21 {offsets = [32, 0, 0], sizes = [1, 4, 4], strides = [1, 1, 1]} : vector<36x4x4xf32> to vector<1x4x4xf32>
    %196 = vector.shape_cast %195 : vector<1x4x4xf32> to vector<4x4xf32>
    %197 = vector.extract_strided_slice %33 {offsets = [0, 12], sizes = [4, 78], strides = [1, 1]} : vector<4x100xf32> to vector<4x78xf32>
    %cst_52 = arith.constant dense<0.000000e+00> : vector<4x78xf32>
    %198 = tpu.matmul %196, %197, %cst_52 {dimension_numbers = #tpu.dot_dimension_numbers<[1], [0], [0], [1], [0, 0, 1, 1], [], []>} : vector<4x4xf32>, vector<4x78xf32>, vector<4x78xf32> -> vector<4x78xf32>
    %199 = arith.addf %194, %198 : vector<4x78xf32>
    %200 = vector.extract_strided_slice %21 {offsets = [33, 0, 0], sizes = [1, 4, 4], strides = [1, 1, 1]} : vector<36x4x4xf32> to vector<1x4x4xf32>
    %201 = vector.shape_cast %200 : vector<1x4x4xf32> to vector<4x4xf32>
    %202 = vector.extract_strided_slice %33 {offsets = [0, 20], sizes = [4, 78], strides = [1, 1]} : vector<4x100xf32> to vector<4x78xf32>
    %cst_53 = arith.constant dense<0.000000e+00> : vector<4x78xf32>
    %203 = tpu.matmul %201, %202, %cst_53 {dimension_numbers = #tpu.dot_dimension_numbers<[1], [0], [0], [1], [0, 0, 1, 1], [], []>} : vector<4x4xf32>, vector<4x78xf32>, vector<4x78xf32> -> vector<4x78xf32>
    %204 = arith.addf %199, %203 : vector<4x78xf32>
    %205 = vector.extract_strided_slice %21 {offsets = [34, 0, 0], sizes = [1, 4, 4], strides = [1, 1, 1]} : vector<36x4x4xf32> to vector<1x4x4xf32>
    %206 = vector.shape_cast %205 : vector<1x4x4xf32> to vector<4x4xf32>
    %207 = vector.extract_strided_slice %33 {offsets = [0, 21], sizes = [4, 78], strides = [1, 1]} : vector<4x100xf32> to vector<4x78xf32>
    %cst_54 = arith.constant dense<0.000000e+00> : vector<4x78xf32>
    %208 = tpu.matmul %206, %207, %cst_54 {dimension_numbers = #tpu.dot_dimension_numbers<[1], [0], [0], [1], [0, 0, 1, 1], [], []>} : vector<4x4xf32>, vector<4x78xf32>, vector<4x78xf32> -> vector<4x78xf32>
    %209 = arith.addf %204, %208 : vector<4x78xf32>
    %210 = vector.extract_strided_slice %21 {offsets = [35, 0, 0], sizes = [1, 4, 4], strides = [1, 1, 1]} : vector<36x4x4xf32> to vector<1x4x4xf32>
    %211 = vector.shape_cast %210 : vector<1x4x4xf32> to vector<4x4xf32>
    %212 = vector.extract_strided_slice %33 {offsets = [0, 22], sizes = [4, 78], strides = [1, 1]} : vector<4x100xf32> to vector<4x78xf32>
    %cst_55 = arith.constant dense<0.000000e+00> : vector<4x78xf32>
    %213 = tpu.matmul %211, %212, %cst_55 {dimension_numbers = #tpu.dot_dimension_numbers<[1], [0], [0], [1], [0, 0, 1, 1], [], []>} : vector<4x4xf32>, vector<4x78xf32>, vector<4x78xf32> -> vector<4x78xf32>
    %214 = arith.addf %209, %213 : vector<4x78xf32>
    %215 = vector.broadcast %3 : vector<4x1xf32> to vector<4x78xf32>
    %216 = arith.addf %214, %215 : vector<4x78xf32>
    %cst_56 = arith.constant 0.000000e+00 : f32
    %217 = vector.broadcast %cst_56 : f32 to vector<4x78xf32>
    %218 = arith.cmpf oge, %216, %217 : vector<4x78xf32>
    %219 = vector.broadcast %13 : vector<4x1xf32> to vector<4x78xf32>
    %220 = arith.mulf %219, %216 : vector<4x78xf32>
    %221 = arith.select %218, %216, %220 : vector<4x78xi1>, vector<4x78xf32>
    %222 = vector.broadcast %0 : vector<1x78xf32> to vector<4x78xf32>
    %223 = arith.mulf %221, %222 : vector<4x78xf32>
    %cst_57 = arith.constant 0.000000e+00 : f32
    %224 = vector.broadcast %cst_57 : f32 to vector<4x11xf32>
    %225 = tpu.concatenate %224, %223, %224 in 1 : vector<4x11xf32>, vector<4x78xf32>, vector<4x11xf32> -> vector<4x100xf32>
    %cst_58 = arith.constant 0.000000e+00 : f32
    %226 = vector.broadcast %cst_58 : f32 to vector<16x78xf32>
    %227 = vector.extract_strided_slice %22 {offsets = [0, 0, 0], sizes = [1, 16, 4], strides = [1, 1, 1]} : vector<9x16x4xf32> to vector<1x16x4xf32>
    %228 = vector.shape_cast %227 : vector<1x16x4xf32> to vector<16x4xf32>
    %229 = vector.extract_strided_slice %225 {offsets = [0, 0], sizes = [4, 78], strides = [1, 1]} : vector<4x100xf32> to vector<4x78xf32>
    %cst_59 = arith.constant dense<0.000000e+00> : vector<16x78xf32>
    %230 = tpu.matmul %228, %229, %cst_59 {dimension_numbers = #tpu.dot_dimension_numbers<[1], [0], [0], [1], [0, 0, 1, 1], [], []>} : vector<16x4xf32>, vector<4x78xf32>, vector<16x78xf32> -> vector<16x78xf32>
    %231 = arith.addf %226, %230 : vector<16x78xf32>
    %232 = vector.extract_strided_slice %22 {offsets = [1, 0, 0], sizes = [1, 16, 4], strides = [1, 1, 1]} : vector<9x16x4xf32> to vector<1x16x4xf32>
    %233 = vector.shape_cast %232 : vector<1x16x4xf32> to vector<16x4xf32>
    %234 = vector.extract_strided_slice %225 {offsets = [0, 1], sizes = [4, 78], strides = [1, 1]} : vector<4x100xf32> to vector<4x78xf32>
    %cst_60 = arith.constant dense<0.000000e+00> : vector<16x78xf32>
    %235 = tpu.matmul %233, %234, %cst_60 {dimension_numbers = #tpu.dot_dimension_numbers<[1], [0], [0], [1], [0, 0, 1, 1], [], []>} : vector<16x4xf32>, vector<4x78xf32>, vector<16x78xf32> -> vector<16x78xf32>
    %236 = arith.addf %231, %235 : vector<16x78xf32>
    %237 = vector.extract_strided_slice %22 {offsets = [2, 0, 0], sizes = [1, 16, 4], strides = [1, 1, 1]} : vector<9x16x4xf32> to vector<1x16x4xf32>
    %238 = vector.shape_cast %237 : vector<1x16x4xf32> to vector<16x4xf32>
    %239 = vector.extract_strided_slice %225 {offsets = [0, 2], sizes = [4, 78], strides = [1, 1]} : vector<4x100xf32> to vector<4x78xf32>
    %cst_61 = arith.constant dense<0.000000e+00> : vector<16x78xf32>
    %240 = tpu.matmul %238, %239, %cst_61 {dimension_numbers = #tpu.dot_dimension_numbers<[1], [0], [0], [1], [0, 0, 1, 1], [], []>} : vector<16x4xf32>, vector<4x78xf32>, vector<16x78xf32> -> vector<16x78xf32>
    %241 = arith.addf %236, %240 : vector<16x78xf32>
    %242 = vector.extract_strided_slice %22 {offsets = [3, 0, 0], sizes = [1, 16, 4], strides = [1, 1, 1]} : vector<9x16x4xf32> to vector<1x16x4xf32>
    %243 = vector.shape_cast %242 : vector<1x16x4xf32> to vector<16x4xf32>
    %244 = vector.extract_strided_slice %225 {offsets = [0, 10], sizes = [4, 78], strides = [1, 1]} : vector<4x100xf32> to vector<4x78xf32>
    %cst_62 = arith.constant dense<0.000000e+00> : vector<16x78xf32>
    %245 = tpu.matmul %243, %244, %cst_62 {dimension_numbers = #tpu.dot_dimension_numbers<[1], [0], [0], [1], [0, 0, 1, 1], [], []>} : vector<16x4xf32>, vector<4x78xf32>, vector<16x78xf32> -> vector<16x78xf32>
    %246 = arith.addf %241, %245 : vector<16x78xf32>
    %247 = vector.extract_strided_slice %22 {offsets = [4, 0, 0], sizes = [1, 16, 4], strides = [1, 1, 1]} : vector<9x16x4xf32> to vector<1x16x4xf32>
    %248 = vector.shape_cast %247 : vector<1x16x4xf32> to vector<16x4xf32>
    %249 = vector.extract_strided_slice %225 {offsets = [0, 11], sizes = [4, 78], strides = [1, 1]} : vector<4x100xf32> to vector<4x78xf32>
    %cst_63 = arith.constant dense<0.000000e+00> : vector<16x78xf32>
    %250 = tpu.matmul %248, %249, %cst_63 {dimension_numbers = #tpu.dot_dimension_numbers<[1], [0], [0], [1], [0, 0, 1, 1], [], []>} : vector<16x4xf32>, vector<4x78xf32>, vector<16x78xf32> -> vector<16x78xf32>
    %251 = arith.addf %246, %250 : vector<16x78xf32>
    %252 = vector.extract_strided_slice %22 {offsets = [5, 0, 0], sizes = [1, 16, 4], strides = [1, 1, 1]} : vector<9x16x4xf32> to vector<1x16x4xf32>
    %253 = vector.shape_cast %252 : vector<1x16x4xf32> to vector<16x4xf32>
    %254 = vector.extract_strided_slice %225 {offsets = [0, 12], sizes = [4, 78], strides = [1, 1]} : vector<4x100xf32> to vector<4x78xf32>
    %cst_64 = arith.constant dense<0.000000e+00> : vector<16x78xf32>
    %255 = tpu.matmul %253, %254, %cst_64 {dimension_numbers = #tpu.dot_dimension_numbers<[1], [0], [0], [1], [0, 0, 1, 1], [], []>} : vector<16x4xf32>, vector<4x78xf32>, vector<16x78xf32> -> vector<16x78xf32>
    %256 = arith.addf %251, %255 : vector<16x78xf32>
    %257 = vector.extract_strided_slice %22 {offsets = [6, 0, 0], sizes = [1, 16, 4], strides = [1, 1, 1]} : vector<9x16x4xf32> to vector<1x16x4xf32>
    %258 = vector.shape_cast %257 : vector<1x16x4xf32> to vector<16x4xf32>
    %259 = vector.extract_strided_slice %225 {offsets = [0, 20], sizes = [4, 78], strides = [1, 1]} : vector<4x100xf32> to vector<4x78xf32>
    %cst_65 = arith.constant dense<0.000000e+00> : vector<16x78xf32>
    %260 = tpu.matmul %258, %259, %cst_65 {dimension_numbers = #tpu.dot_dimension_numbers<[1], [0], [0], [1], [0, 0, 1, 1], [], []>} : vector<16x4xf32>, vector<4x78xf32>, vector<16x78xf32> -> vector<16x78xf32>
    %261 = arith.addf %256, %260 : vector<16x78xf32>
    %262 = vector.extract_strided_slice %22 {offsets = [7, 0, 0], sizes = [1, 16, 4], strides = [1, 1, 1]} : vector<9x16x4xf32> to vector<1x16x4xf32>
    %263 = vector.shape_cast %262 : vector<1x16x4xf32> to vector<16x4xf32>
    %264 = vector.extract_strided_slice %225 {offsets = [0, 21], sizes = [4, 78], strides = [1, 1]} : vector<4x100xf32> to vector<4x78xf32>
    %cst_66 = arith.constant dense<0.000000e+00> : vector<16x78xf32>
    %265 = tpu.matmul %263, %264, %cst_66 {dimension_numbers = #tpu.dot_dimension_numbers<[1], [0], [0], [1], [0, 0, 1, 1], [], []>} : vector<16x4xf32>, vector<4x78xf32>, vector<16x78xf32> -> vector<16x78xf32>
    %266 = arith.addf %261, %265 : vector<16x78xf32>
    %267 = vector.extract_strided_slice %22 {offsets = [8, 0, 0], sizes = [1, 16, 4], strides = [1, 1, 1]} : vector<9x16x4xf32> to vector<1x16x4xf32>
    %268 = vector.shape_cast %267 : vector<1x16x4xf32> to vector<16x4xf32>
    %269 = vector.extract_strided_slice %225 {offsets = [0, 22], sizes = [4, 78], strides = [1, 1]} : vector<4x100xf32> to vector<4x78xf32>
    %cst_67 = arith.constant dense<0.000000e+00> : vector<16x78xf32>
    %270 = tpu.matmul %268, %269, %cst_67 {dimension_numbers = #tpu.dot_dimension_numbers<[1], [0], [0], [1], [0, 0, 1, 1], [], []>} : vector<16x4xf32>, vector<4x78xf32>, vector<16x78xf32> -> vector<16x78xf32>
    %271 = arith.addf %266, %270 : vector<16x78xf32>
    %272 = vector.extract_strided_slice %271 {offsets = [0, 0], sizes = [4, 78], strides = [1, 1]} : vector<16x78xf32> to vector<4x78xf32>
    %273 = vector.broadcast %5 : vector<4x1xf32> to vector<4x78xf32>
    %274 = arith.addf %272, %273 : vector<4x78xf32>
    %275 = vector.extract_strided_slice %20 {offsets = [0, 0, 0], sizes = [1, 4, 4], strides = [1, 1, 1]} : vector<2x4x4xf32> to vector<1x4x4xf32>
    %276 = vector.shape_cast %275 : vector<1x4x4xf32> to vector<4x4xf32>
    %277 = vector.extract_strided_slice %25 {offsets = [0, 0, 0], sizes = [1, 4, 100], strides = [1, 1, 1]} : vector<4x4x100xf32> to vector<1x4x100xf32>
    %278 = vector.shape_cast %277 : vector<1x4x100xf32> to vector<4x100xf32>
    %279 = vector.extract_strided_slice %278 {offsets = [0, 11], sizes = [4, 78], strides = [1, 1]} : vector<4x100xf32> to vector<4x78xf32>
    %cst_68 = arith.constant dense<0.000000e+00> : vector<4x78xf32>
    %280 = tpu.matmul %276, %279, %cst_68 {dimension_numbers = #tpu.dot_dimension_numbers<[1], [0], [0], [1], [0, 0, 1, 1], [], []>} : vector<4x4xf32>, vector<4x78xf32>, vector<4x78xf32> -> vector<4x78xf32>
    %281 = vector.broadcast %9 : vector<4x1xf32> to vector<4x78xf32>
    %282 = arith.addf %280, %281 : vector<4x78xf32>
    %cst_69 = arith.constant 0.000000e+00 : f32
    %283 = vector.broadcast %cst_69 : f32 to vector<4x78xf32>
    %284 = arith.cmpf oge, %282, %283 : vector<4x78xf32>
    %285 = vector.broadcast %15 : vector<4x1xf32> to vector<4x78xf32>
    %286 = arith.mulf %285, %282 : vector<4x78xf32>
    %287 = arith.select %284, %282, %286 : vector<4x78xi1>, vector<4x78xf32>
    %288 = arith.subf %274, %287 : vector<4x78xf32>
    %289 = vector.broadcast %0 : vector<1x78xf32> to vector<4x78xf32>
    %290 = arith.mulf %288, %289 : vector<4x78xf32>
    %cst_70 = arith.constant 0.000000e+00 : f32
    %291 = vector.broadcast %cst_70 : f32 to vector<4x11xf32>
    %292 = tpu.concatenate %291, %290, %291 in 1 : vector<4x11xf32>, vector<4x78xf32>, vector<4x11xf32> -> vector<4x100xf32>
    %293 = vector.extract_strided_slice %271 {offsets = [4, 0], sizes = [4, 78], strides = [1, 1]} : vector<16x78xf32> to vector<4x78xf32>
    %294 = vector.broadcast %5 : vector<4x1xf32> to vector<4x78xf32>
    %295 = arith.addf %293, %294 : vector<4x78xf32>
    %296 = vector.extract_strided_slice %20 {offsets = [0, 0, 0], sizes = [1, 4, 4], strides = [1, 1, 1]} : vector<2x4x4xf32> to vector<1x4x4xf32>
    %297 = vector.shape_cast %296 : vector<1x4x4xf32> to vector<4x4xf32>
    %298 = vector.extract_strided_slice %25 {offsets = [1, 0, 0], sizes = [1, 4, 100], strides = [1, 1, 1]} : vector<4x4x100xf32> to vector<1x4x100xf32>
    %299 = vector.shape_cast %298 : vector<1x4x100xf32> to vector<4x100xf32>
    %300 = vector.extract_strided_slice %299 {offsets = [0, 11], sizes = [4, 78], strides = [1, 1]} : vector<4x100xf32> to vector<4x78xf32>
    %cst_71 = arith.constant dense<0.000000e+00> : vector<4x78xf32>
    %301 = tpu.matmul %297, %300, %cst_71 {dimension_numbers = #tpu.dot_dimension_numbers<[1], [0], [0], [1], [0, 0, 1, 1], [], []>} : vector<4x4xf32>, vector<4x78xf32>, vector<4x78xf32> -> vector<4x78xf32>
    %302 = vector.broadcast %9 : vector<4x1xf32> to vector<4x78xf32>
    %303 = arith.addf %301, %302 : vector<4x78xf32>
    %cst_72 = arith.constant 0.000000e+00 : f32
    %304 = vector.broadcast %cst_72 : f32 to vector<4x78xf32>
    %305 = arith.cmpf oge, %303, %304 : vector<4x78xf32>
    %306 = vector.broadcast %15 : vector<4x1xf32> to vector<4x78xf32>
    %307 = arith.mulf %306, %303 : vector<4x78xf32>
    %308 = arith.select %305, %303, %307 : vector<4x78xi1>, vector<4x78xf32>
    %309 = arith.subf %295, %308 : vector<4x78xf32>
    %310 = vector.broadcast %0 : vector<1x78xf32> to vector<4x78xf32>
    %311 = arith.mulf %309, %310 : vector<4x78xf32>
    %cst_73 = arith.constant 0.000000e+00 : f32
    %312 = vector.broadcast %cst_73 : f32 to vector<4x11xf32>
    %313 = tpu.concatenate %312, %311, %312 in 1 : vector<4x11xf32>, vector<4x78xf32>, vector<4x11xf32> -> vector<4x100xf32>
    %314 = vector.extract_strided_slice %271 {offsets = [8, 0], sizes = [4, 78], strides = [1, 1]} : vector<16x78xf32> to vector<4x78xf32>
    %315 = vector.broadcast %5 : vector<4x1xf32> to vector<4x78xf32>
    %316 = arith.addf %314, %315 : vector<4x78xf32>
    %317 = vector.extract_strided_slice %20 {offsets = [0, 0, 0], sizes = [1, 4, 4], strides = [1, 1, 1]} : vector<2x4x4xf32> to vector<1x4x4xf32>
    %318 = vector.shape_cast %317 : vector<1x4x4xf32> to vector<4x4xf32>
    %319 = vector.extract_strided_slice %25 {offsets = [2, 0, 0], sizes = [1, 4, 100], strides = [1, 1, 1]} : vector<4x4x100xf32> to vector<1x4x100xf32>
    %320 = vector.shape_cast %319 : vector<1x4x100xf32> to vector<4x100xf32>
    %321 = vector.extract_strided_slice %320 {offsets = [0, 11], sizes = [4, 78], strides = [1, 1]} : vector<4x100xf32> to vector<4x78xf32>
    %cst_74 = arith.constant dense<0.000000e+00> : vector<4x78xf32>
    %322 = tpu.matmul %318, %321, %cst_74 {dimension_numbers = #tpu.dot_dimension_numbers<[1], [0], [0], [1], [0, 0, 1, 1], [], []>} : vector<4x4xf32>, vector<4x78xf32>, vector<4x78xf32> -> vector<4x78xf32>
    %323 = vector.broadcast %9 : vector<4x1xf32> to vector<4x78xf32>
    %324 = arith.addf %322, %323 : vector<4x78xf32>
    %cst_75 = arith.constant 0.000000e+00 : f32
    %325 = vector.broadcast %cst_75 : f32 to vector<4x78xf32>
    %326 = arith.cmpf oge, %324, %325 : vector<4x78xf32>
    %327 = vector.broadcast %15 : vector<4x1xf32> to vector<4x78xf32>
    %328 = arith.mulf %327, %324 : vector<4x78xf32>
    %329 = arith.select %326, %324, %328 : vector<4x78xi1>, vector<4x78xf32>
    %330 = arith.subf %316, %329 : vector<4x78xf32>
    %331 = vector.broadcast %0 : vector<1x78xf32> to vector<4x78xf32>
    %332 = arith.mulf %330, %331 : vector<4x78xf32>
    %cst_76 = arith.constant 0.000000e+00 : f32
    %333 = vector.broadcast %cst_76 : f32 to vector<4x11xf32>
    %334 = tpu.concatenate %333, %332, %333 in 1 : vector<4x11xf32>, vector<4x78xf32>, vector<4x11xf32> -> vector<4x100xf32>
    %335 = vector.extract_strided_slice %271 {offsets = [12, 0], sizes = [4, 78], strides = [1, 1]} : vector<16x78xf32> to vector<4x78xf32>
    %336 = vector.broadcast %5 : vector<4x1xf32> to vector<4x78xf32>
    %337 = arith.addf %335, %336 : vector<4x78xf32>
    %338 = vector.extract_strided_slice %20 {offsets = [0, 0, 0], sizes = [1, 4, 4], strides = [1, 1, 1]} : vector<2x4x4xf32> to vector<1x4x4xf32>
    %339 = vector.shape_cast %338 : vector<1x4x4xf32> to vector<4x4xf32>
    %340 = vector.extract_strided_slice %25 {offsets = [3, 0, 0], sizes = [1, 4, 100], strides = [1, 1, 1]} : vector<4x4x100xf32> to vector<1x4x100xf32>
    %341 = vector.shape_cast %340 : vector<1x4x100xf32> to vector<4x100xf32>
    %342 = vector.extract_strided_slice %341 {offsets = [0, 11], sizes = [4, 78], strides = [1, 1]} : vector<4x100xf32> to vector<4x78xf32>
    %cst_77 = arith.constant dense<0.000000e+00> : vector<4x78xf32>
    %343 = tpu.matmul %339, %342, %cst_77 {dimension_numbers = #tpu.dot_dimension_numbers<[1], [0], [0], [1], [0, 0, 1, 1], [], []>} : vector<4x4xf32>, vector<4x78xf32>, vector<4x78xf32> -> vector<4x78xf32>
    %344 = vector.broadcast %9 : vector<4x1xf32> to vector<4x78xf32>
    %345 = arith.addf %343, %344 : vector<4x78xf32>
    %cst_78 = arith.constant 0.000000e+00 : f32
    %346 = vector.broadcast %cst_78 : f32 to vector<4x78xf32>
    %347 = arith.cmpf oge, %345, %346 : vector<4x78xf32>
    %348 = vector.broadcast %15 : vector<4x1xf32> to vector<4x78xf32>
    %349 = arith.mulf %348, %345 : vector<4x78xf32>
    %350 = arith.select %347, %345, %349 : vector<4x78xi1>, vector<4x78xf32>
    %351 = arith.subf %337, %350 : vector<4x78xf32>
    %352 = vector.broadcast %0 : vector<1x78xf32> to vector<4x78xf32>
    %353 = arith.mulf %351, %352 : vector<4x78xf32>
    %cst_79 = arith.constant 0.000000e+00 : f32
    %354 = vector.broadcast %cst_79 : f32 to vector<4x11xf32>
    %355 = tpu.concatenate %354, %353, %354 in 1 : vector<4x11xf32>, vector<4x78xf32>, vector<4x11xf32> -> vector<4x100xf32>
    %cst_80 = arith.constant 0.000000e+00 : f32
    %356 = vector.broadcast %cst_80 : f32 to vector<4x78xf32>
    %357 = vector.extract_strided_slice %23 {offsets = [0, 0, 0], sizes = [1, 4, 4], strides = [1, 1, 1]} : vector<36x4x4xf32> to vector<1x4x4xf32>
    %358 = vector.shape_cast %357 : vector<1x4x4xf32> to vector<4x4xf32>
    %359 = vector.extract_strided_slice %292 {offsets = [0, 0], sizes = [4, 78], strides = [1, 1]} : vector<4x100xf32> to vector<4x78xf32>
    %cst_81 = arith.constant dense<0.000000e+00> : vector<4x78xf32>
    %360 = tpu.matmul %358, %359, %cst_81 {dimension_numbers = #tpu.dot_dimension_numbers<[1], [0], [0], [1], [0, 0, 1, 1], [], []>} : vector<4x4xf32>, vector<4x78xf32>, vector<4x78xf32> -> vector<4x78xf32>
    %361 = arith.addf %356, %360 : vector<4x78xf32>
    %362 = vector.extract_strided_slice %23 {offsets = [1, 0, 0], sizes = [1, 4, 4], strides = [1, 1, 1]} : vector<36x4x4xf32> to vector<1x4x4xf32>
    %363 = vector.shape_cast %362 : vector<1x4x4xf32> to vector<4x4xf32>
    %364 = vector.extract_strided_slice %292 {offsets = [0, 1], sizes = [4, 78], strides = [1, 1]} : vector<4x100xf32> to vector<4x78xf32>
    %cst_82 = arith.constant dense<0.000000e+00> : vector<4x78xf32>
    %365 = tpu.matmul %363, %364, %cst_82 {dimension_numbers = #tpu.dot_dimension_numbers<[1], [0], [0], [1], [0, 0, 1, 1], [], []>} : vector<4x4xf32>, vector<4x78xf32>, vector<4x78xf32> -> vector<4x78xf32>
    %366 = arith.addf %361, %365 : vector<4x78xf32>
    %367 = vector.extract_strided_slice %23 {offsets = [2, 0, 0], sizes = [1, 4, 4], strides = [1, 1, 1]} : vector<36x4x4xf32> to vector<1x4x4xf32>
    %368 = vector.shape_cast %367 : vector<1x4x4xf32> to vector<4x4xf32>
    %369 = vector.extract_strided_slice %292 {offsets = [0, 2], sizes = [4, 78], strides = [1, 1]} : vector<4x100xf32> to vector<4x78xf32>
    %cst_83 = arith.constant dense<0.000000e+00> : vector<4x78xf32>
    %370 = tpu.matmul %368, %369, %cst_83 {dimension_numbers = #tpu.dot_dimension_numbers<[1], [0], [0], [1], [0, 0, 1, 1], [], []>} : vector<4x4xf32>, vector<4x78xf32>, vector<4x78xf32> -> vector<4x78xf32>
    %371 = arith.addf %366, %370 : vector<4x78xf32>
    %372 = vector.extract_strided_slice %23 {offsets = [3, 0, 0], sizes = [1, 4, 4], strides = [1, 1, 1]} : vector<36x4x4xf32> to vector<1x4x4xf32>
    %373 = vector.shape_cast %372 : vector<1x4x4xf32> to vector<4x4xf32>
    %374 = vector.extract_strided_slice %292 {offsets = [0, 10], sizes = [4, 78], strides = [1, 1]} : vector<4x100xf32> to vector<4x78xf32>
    %cst_84 = arith.constant dense<0.000000e+00> : vector<4x78xf32>
    %375 = tpu.matmul %373, %374, %cst_84 {dimension_numbers = #tpu.dot_dimension_numbers<[1], [0], [0], [1], [0, 0, 1, 1], [], []>} : vector<4x4xf32>, vector<4x78xf32>, vector<4x78xf32> -> vector<4x78xf32>
    %376 = arith.addf %371, %375 : vector<4x78xf32>
    %377 = vector.extract_strided_slice %23 {offsets = [4, 0, 0], sizes = [1, 4, 4], strides = [1, 1, 1]} : vector<36x4x4xf32> to vector<1x4x4xf32>
    %378 = vector.shape_cast %377 : vector<1x4x4xf32> to vector<4x4xf32>
    %379 = vector.extract_strided_slice %292 {offsets = [0, 11], sizes = [4, 78], strides = [1, 1]} : vector<4x100xf32> to vector<4x78xf32>
    %cst_85 = arith.constant dense<0.000000e+00> : vector<4x78xf32>
    %380 = tpu.matmul %378, %379, %cst_85 {dimension_numbers = #tpu.dot_dimension_numbers<[1], [0], [0], [1], [0, 0, 1, 1], [], []>} : vector<4x4xf32>, vector<4x78xf32>, vector<4x78xf32> -> vector<4x78xf32>
    %381 = arith.addf %376, %380 : vector<4x78xf32>
    %382 = vector.extract_strided_slice %23 {offsets = [5, 0, 0], sizes = [1, 4, 4], strides = [1, 1, 1]} : vector<36x4x4xf32> to vector<1x4x4xf32>
    %383 = vector.shape_cast %382 : vector<1x4x4xf32> to vector<4x4xf32>
    %384 = vector.extract_strided_slice %292 {offsets = [0, 12], sizes = [4, 78], strides = [1, 1]} : vector<4x100xf32> to vector<4x78xf32>
    %cst_86 = arith.constant dense<0.000000e+00> : vector<4x78xf32>
    %385 = tpu.matmul %383, %384, %cst_86 {dimension_numbers = #tpu.dot_dimension_numbers<[1], [0], [0], [1], [0, 0, 1, 1], [], []>} : vector<4x4xf32>, vector<4x78xf32>, vector<4x78xf32> -> vector<4x78xf32>
    %386 = arith.addf %381, %385 : vector<4x78xf32>
    %387 = vector.extract_strided_slice %23 {offsets = [6, 0, 0], sizes = [1, 4, 4], strides = [1, 1, 1]} : vector<36x4x4xf32> to vector<1x4x4xf32>
    %388 = vector.shape_cast %387 : vector<1x4x4xf32> to vector<4x4xf32>
    %389 = vector.extract_strided_slice %292 {offsets = [0, 20], sizes = [4, 78], strides = [1, 1]} : vector<4x100xf32> to vector<4x78xf32>
    %cst_87 = arith.constant dense<0.000000e+00> : vector<4x78xf32>
    %390 = tpu.matmul %388, %389, %cst_87 {dimension_numbers = #tpu.dot_dimension_numbers<[1], [0], [0], [1], [0, 0, 1, 1], [], []>} : vector<4x4xf32>, vector<4x78xf32>, vector<4x78xf32> -> vector<4x78xf32>
    %391 = arith.addf %386, %390 : vector<4x78xf32>
    %392 = vector.extract_strided_slice %23 {offsets = [7, 0, 0], sizes = [1, 4, 4], strides = [1, 1, 1]} : vector<36x4x4xf32> to vector<1x4x4xf32>
    %393 = vector.shape_cast %392 : vector<1x4x4xf32> to vector<4x4xf32>
    %394 = vector.extract_strided_slice %292 {offsets = [0, 21], sizes = [4, 78], strides = [1, 1]} : vector<4x100xf32> to vector<4x78xf32>
    %cst_88 = arith.constant dense<0.000000e+00> : vector<4x78xf32>
    %395 = tpu.matmul %393, %394, %cst_88 {dimension_numbers = #tpu.dot_dimension_numbers<[1], [0], [0], [1], [0, 0, 1, 1], [], []>} : vector<4x4xf32>, vector<4x78xf32>, vector<4x78xf32> -> vector<4x78xf32>
    %396 = arith.addf %391, %395 : vector<4x78xf32>
    %397 = vector.extract_strided_slice %23 {offsets = [8, 0, 0], sizes = [1, 4, 4], strides = [1, 1, 1]} : vector<36x4x4xf32> to vector<1x4x4xf32>
    %398 = vector.shape_cast %397 : vector<1x4x4xf32> to vector<4x4xf32>
    %399 = vector.extract_strided_slice %292 {offsets = [0, 22], sizes = [4, 78], strides = [1, 1]} : vector<4x100xf32> to vector<4x78xf32>
    %cst_89 = arith.constant dense<0.000000e+00> : vector<4x78xf32>
    %400 = tpu.matmul %398, %399, %cst_89 {dimension_numbers = #tpu.dot_dimension_numbers<[1], [0], [0], [1], [0, 0, 1, 1], [], []>} : vector<4x4xf32>, vector<4x78xf32>, vector<4x78xf32> -> vector<4x78xf32>
    %401 = arith.addf %396, %400 : vector<4x78xf32>
    %402 = vector.extract_strided_slice %23 {offsets = [9, 0, 0], sizes = [1, 4, 4], strides = [1, 1, 1]} : vector<36x4x4xf32> to vector<1x4x4xf32>
    %403 = vector.shape_cast %402 : vector<1x4x4xf32> to vector<4x4xf32>
    %404 = vector.extract_strided_slice %313 {offsets = [0, 0], sizes = [4, 78], strides = [1, 1]} : vector<4x100xf32> to vector<4x78xf32>
    %cst_90 = arith.constant dense<0.000000e+00> : vector<4x78xf32>
    %405 = tpu.matmul %403, %404, %cst_90 {dimension_numbers = #tpu.dot_dimension_numbers<[1], [0], [0], [1], [0, 0, 1, 1], [], []>} : vector<4x4xf32>, vector<4x78xf32>, vector<4x78xf32> -> vector<4x78xf32>
    %406 = arith.addf %401, %405 : vector<4x78xf32>
    %407 = vector.extract_strided_slice %23 {offsets = [10, 0, 0], sizes = [1, 4, 4], strides = [1, 1, 1]} : vector<36x4x4xf32> to vector<1x4x4xf32>
    %408 = vector.shape_cast %407 : vector<1x4x4xf32> to vector<4x4xf32>
    %409 = vector.extract_strided_slice %313 {offsets = [0, 1], sizes = [4, 78], strides = [1, 1]} : vector<4x100xf32> to vector<4x78xf32>
    %cst_91 = arith.constant dense<0.000000e+00> : vector<4x78xf32>
    %410 = tpu.matmul %408, %409, %cst_91 {dimension_numbers = #tpu.dot_dimension_numbers<[1], [0], [0], [1], [0, 0, 1, 1], [], []>} : vector<4x4xf32>, vector<4x78xf32>, vector<4x78xf32> -> vector<4x78xf32>
    %411 = arith.addf %406, %410 : vector<4x78xf32>
    %412 = vector.extract_strided_slice %23 {offsets = [11, 0, 0], sizes = [1, 4, 4], strides = [1, 1, 1]} : vector<36x4x4xf32> to vector<1x4x4xf32>
    %413 = vector.shape_cast %412 : vector<1x4x4xf32> to vector<4x4xf32>
    %414 = vector.extract_strided_slice %313 {offsets = [0, 2], sizes = [4, 78], strides = [1, 1]} : vector<4x100xf32> to vector<4x78xf32>
    %cst_92 = arith.constant dense<0.000000e+00> : vector<4x78xf32>
    %415 = tpu.matmul %413, %414, %cst_92 {dimension_numbers = #tpu.dot_dimension_numbers<[1], [0], [0], [1], [0, 0, 1, 1], [], []>} : vector<4x4xf32>, vector<4x78xf32>, vector<4x78xf32> -> vector<4x78xf32>
    %416 = arith.addf %411, %415 : vector<4x78xf32>
    %417 = vector.extract_strided_slice %23 {offsets = [12, 0, 0], sizes = [1, 4, 4], strides = [1, 1, 1]} : vector<36x4x4xf32> to vector<1x4x4xf32>
    %418 = vector.shape_cast %417 : vector<1x4x4xf32> to vector<4x4xf32>
    %419 = vector.extract_strided_slice %313 {offsets = [0, 10], sizes = [4, 78], strides = [1, 1]} : vector<4x100xf32> to vector<4x78xf32>
    %cst_93 = arith.constant dense<0.000000e+00> : vector<4x78xf32>
    %420 = tpu.matmul %418, %419, %cst_93 {dimension_numbers = #tpu.dot_dimension_numbers<[1], [0], [0], [1], [0, 0, 1, 1], [], []>} : vector<4x4xf32>, vector<4x78xf32>, vector<4x78xf32> -> vector<4x78xf32>
    %421 = arith.addf %416, %420 : vector<4x78xf32>
    %422 = vector.extract_strided_slice %23 {offsets = [13, 0, 0], sizes = [1, 4, 4], strides = [1, 1, 1]} : vector<36x4x4xf32> to vector<1x4x4xf32>
    %423 = vector.shape_cast %422 : vector<1x4x4xf32> to vector<4x4xf32>
    %424 = vector.extract_strided_slice %313 {offsets = [0, 11], sizes = [4, 78], strides = [1, 1]} : vector<4x100xf32> to vector<4x78xf32>
    %cst_94 = arith.constant dense<0.000000e+00> : vector<4x78xf32>
    %425 = tpu.matmul %423, %424, %cst_94 {dimension_numbers = #tpu.dot_dimension_numbers<[1], [0], [0], [1], [0, 0, 1, 1], [], []>} : vector<4x4xf32>, vector<4x78xf32>, vector<4x78xf32> -> vector<4x78xf32>
    %426 = arith.addf %421, %425 : vector<4x78xf32>
    %427 = vector.extract_strided_slice %23 {offsets = [14, 0, 0], sizes = [1, 4, 4], strides = [1, 1, 1]} : vector<36x4x4xf32> to vector<1x4x4xf32>
    %428 = vector.shape_cast %427 : vector<1x4x4xf32> to vector<4x4xf32>
    %429 = vector.extract_strided_slice %313 {offsets = [0, 12], sizes = [4, 78], strides = [1, 1]} : vector<4x100xf32> to vector<4x78xf32>
    %cst_95 = arith.constant dense<0.000000e+00> : vector<4x78xf32>
    %430 = tpu.matmul %428, %429, %cst_95 {dimension_numbers = #tpu.dot_dimension_numbers<[1], [0], [0], [1], [0, 0, 1, 1], [], []>} : vector<4x4xf32>, vector<4x78xf32>, vector<4x78xf32> -> vector<4x78xf32>
    %431 = arith.addf %426, %430 : vector<4x78xf32>
    %432 = vector.extract_strided_slice %23 {offsets = [15, 0, 0], sizes = [1, 4, 4], strides = [1, 1, 1]} : vector<36x4x4xf32> to vector<1x4x4xf32>
    %433 = vector.shape_cast %432 : vector<1x4x4xf32> to vector<4x4xf32>
    %434 = vector.extract_strided_slice %313 {offsets = [0, 20], sizes = [4, 78], strides = [1, 1]} : vector<4x100xf32> to vector<4x78xf32>
    %cst_96 = arith.constant dense<0.000000e+00> : vector<4x78xf32>
    %435 = tpu.matmul %433, %434, %cst_96 {dimension_numbers = #tpu.dot_dimension_numbers<[1], [0], [0], [1], [0, 0, 1, 1], [], []>} : vector<4x4xf32>, vector<4x78xf32>, vector<4x78xf32> -> vector<4x78xf32>
    %436 = arith.addf %431, %435 : vector<4x78xf32>
    %437 = vector.extract_strided_slice %23 {offsets = [16, 0, 0], sizes = [1, 4, 4], strides = [1, 1, 1]} : vector<36x4x4xf32> to vector<1x4x4xf32>
    %438 = vector.shape_cast %437 : vector<1x4x4xf32> to vector<4x4xf32>
    %439 = vector.extract_strided_slice %313 {offsets = [0, 21], sizes = [4, 78], strides = [1, 1]} : vector<4x100xf32> to vector<4x78xf32>
    %cst_97 = arith.constant dense<0.000000e+00> : vector<4x78xf32>
    %440 = tpu.matmul %438, %439, %cst_97 {dimension_numbers = #tpu.dot_dimension_numbers<[1], [0], [0], [1], [0, 0, 1, 1], [], []>} : vector<4x4xf32>, vector<4x78xf32>, vector<4x78xf32> -> vector<4x78xf32>
    %441 = arith.addf %436, %440 : vector<4x78xf32>
    %442 = vector.extract_strided_slice %23 {offsets = [17, 0, 0], sizes = [1, 4, 4], strides = [1, 1, 1]} : vector<36x4x4xf32> to vector<1x4x4xf32>
    %443 = vector.shape_cast %442 : vector<1x4x4xf32> to vector<4x4xf32>
    %444 = vector.extract_strided_slice %313 {offsets = [0, 22], sizes = [4, 78], strides = [1, 1]} : vector<4x100xf32> to vector<4x78xf32>
    %cst_98 = arith.constant dense<0.000000e+00> : vector<4x78xf32>
    %445 = tpu.matmul %443, %444, %cst_98 {dimension_numbers = #tpu.dot_dimension_numbers<[1], [0], [0], [1], [0, 0, 1, 1], [], []>} : vector<4x4xf32>, vector<4x78xf32>, vector<4x78xf32> -> vector<4x78xf32>
    %446 = arith.addf %441, %445 : vector<4x78xf32>
    %447 = vector.extract_strided_slice %23 {offsets = [18, 0, 0], sizes = [1, 4, 4], strides = [1, 1, 1]} : vector<36x4x4xf32> to vector<1x4x4xf32>
    %448 = vector.shape_cast %447 : vector<1x4x4xf32> to vector<4x4xf32>
    %449 = vector.extract_strided_slice %334 {offsets = [0, 0], sizes = [4, 78], strides = [1, 1]} : vector<4x100xf32> to vector<4x78xf32>
    %cst_99 = arith.constant dense<0.000000e+00> : vector<4x78xf32>
    %450 = tpu.matmul %448, %449, %cst_99 {dimension_numbers = #tpu.dot_dimension_numbers<[1], [0], [0], [1], [0, 0, 1, 1], [], []>} : vector<4x4xf32>, vector<4x78xf32>, vector<4x78xf32> -> vector<4x78xf32>
    %451 = arith.addf %446, %450 : vector<4x78xf32>
    %452 = vector.extract_strided_slice %23 {offsets = [19, 0, 0], sizes = [1, 4, 4], strides = [1, 1, 1]} : vector<36x4x4xf32> to vector<1x4x4xf32>
    %453 = vector.shape_cast %452 : vector<1x4x4xf32> to vector<4x4xf32>
    %454 = vector.extract_strided_slice %334 {offsets = [0, 1], sizes = [4, 78], strides = [1, 1]} : vector<4x100xf32> to vector<4x78xf32>
    %cst_100 = arith.constant dense<0.000000e+00> : vector<4x78xf32>
    %455 = tpu.matmul %453, %454, %cst_100 {dimension_numbers = #tpu.dot_dimension_numbers<[1], [0], [0], [1], [0, 0, 1, 1], [], []>} : vector<4x4xf32>, vector<4x78xf32>, vector<4x78xf32> -> vector<4x78xf32>
    %456 = arith.addf %451, %455 : vector<4x78xf32>
    %457 = vector.extract_strided_slice %23 {offsets = [20, 0, 0], sizes = [1, 4, 4], strides = [1, 1, 1]} : vector<36x4x4xf32> to vector<1x4x4xf32>
    %458 = vector.shape_cast %457 : vector<1x4x4xf32> to vector<4x4xf32>
    %459 = vector.extract_strided_slice %334 {offsets = [0, 2], sizes = [4, 78], strides = [1, 1]} : vector<4x100xf32> to vector<4x78xf32>
    %cst_101 = arith.constant dense<0.000000e+00> : vector<4x78xf32>
    %460 = tpu.matmul %458, %459, %cst_101 {dimension_numbers = #tpu.dot_dimension_numbers<[1], [0], [0], [1], [0, 0, 1, 1], [], []>} : vector<4x4xf32>, vector<4x78xf32>, vector<4x78xf32> -> vector<4x78xf32>
    %461 = arith.addf %456, %460 : vector<4x78xf32>
    %462 = vector.extract_strided_slice %23 {offsets = [21, 0, 0], sizes = [1, 4, 4], strides = [1, 1, 1]} : vector<36x4x4xf32> to vector<1x4x4xf32>
    %463 = vector.shape_cast %462 : vector<1x4x4xf32> to vector<4x4xf32>
    %464 = vector.extract_strided_slice %334 {offsets = [0, 10], sizes = [4, 78], strides = [1, 1]} : vector<4x100xf32> to vector<4x78xf32>
    %cst_102 = arith.constant dense<0.000000e+00> : vector<4x78xf32>
    %465 = tpu.matmul %463, %464, %cst_102 {dimension_numbers = #tpu.dot_dimension_numbers<[1], [0], [0], [1], [0, 0, 1, 1], [], []>} : vector<4x4xf32>, vector<4x78xf32>, vector<4x78xf32> -> vector<4x78xf32>
    %466 = arith.addf %461, %465 : vector<4x78xf32>
    %467 = vector.extract_strided_slice %23 {offsets = [22, 0, 0], sizes = [1, 4, 4], strides = [1, 1, 1]} : vector<36x4x4xf32> to vector<1x4x4xf32>
    %468 = vector.shape_cast %467 : vector<1x4x4xf32> to vector<4x4xf32>
    %469 = vector.extract_strided_slice %334 {offsets = [0, 11], sizes = [4, 78], strides = [1, 1]} : vector<4x100xf32> to vector<4x78xf32>
    %cst_103 = arith.constant dense<0.000000e+00> : vector<4x78xf32>
    %470 = tpu.matmul %468, %469, %cst_103 {dimension_numbers = #tpu.dot_dimension_numbers<[1], [0], [0], [1], [0, 0, 1, 1], [], []>} : vector<4x4xf32>, vector<4x78xf32>, vector<4x78xf32> -> vector<4x78xf32>
    %471 = arith.addf %466, %470 : vector<4x78xf32>
    %472 = vector.extract_strided_slice %23 {offsets = [23, 0, 0], sizes = [1, 4, 4], strides = [1, 1, 1]} : vector<36x4x4xf32> to vector<1x4x4xf32>
    %473 = vector.shape_cast %472 : vector<1x4x4xf32> to vector<4x4xf32>
    %474 = vector.extract_strided_slice %334 {offsets = [0, 12], sizes = [4, 78], strides = [1, 1]} : vector<4x100xf32> to vector<4x78xf32>
    %cst_104 = arith.constant dense<0.000000e+00> : vector<4x78xf32>
    %475 = tpu.matmul %473, %474, %cst_104 {dimension_numbers = #tpu.dot_dimension_numbers<[1], [0], [0], [1], [0, 0, 1, 1], [], []>} : vector<4x4xf32>, vector<4x78xf32>, vector<4x78xf32> -> vector<4x78xf32>
    %476 = arith.addf %471, %475 : vector<4x78xf32>
    %477 = vector.extract_strided_slice %23 {offsets = [24, 0, 0], sizes = [1, 4, 4], strides = [1, 1, 1]} : vector<36x4x4xf32> to vector<1x4x4xf32>
    %478 = vector.shape_cast %477 : vector<1x4x4xf32> to vector<4x4xf32>
    %479 = vector.extract_strided_slice %334 {offsets = [0, 20], sizes = [4, 78], strides = [1, 1]} : vector<4x100xf32> to vector<4x78xf32>
    %cst_105 = arith.constant dense<0.000000e+00> : vector<4x78xf32>
    %480 = tpu.matmul %478, %479, %cst_105 {dimension_numbers = #tpu.dot_dimension_numbers<[1], [0], [0], [1], [0, 0, 1, 1], [], []>} : vector<4x4xf32>, vector<4x78xf32>, vector<4x78xf32> -> vector<4x78xf32>
    %481 = arith.addf %476, %480 : vector<4x78xf32>
    %482 = vector.extract_strided_slice %23 {offsets = [25, 0, 0], sizes = [1, 4, 4], strides = [1, 1, 1]} : vector<36x4x4xf32> to vector<1x4x4xf32>
    %483 = vector.shape_cast %482 : vector<1x4x4xf32> to vector<4x4xf32>
    %484 = vector.extract_strided_slice %334 {offsets = [0, 21], sizes = [4, 78], strides = [1, 1]} : vector<4x100xf32> to vector<4x78xf32>
    %cst_106 = arith.constant dense<0.000000e+00> : vector<4x78xf32>
    %485 = tpu.matmul %483, %484, %cst_106 {dimension_numbers = #tpu.dot_dimension_numbers<[1], [0], [0], [1], [0, 0, 1, 1], [], []>} : vector<4x4xf32>, vector<4x78xf32>, vector<4x78xf32> -> vector<4x78xf32>
    %486 = arith.addf %481, %485 : vector<4x78xf32>
    %487 = vector.extract_strided_slice %23 {offsets = [26, 0, 0], sizes = [1, 4, 4], strides = [1, 1, 1]} : vector<36x4x4xf32> to vector<1x4x4xf32>
    %488 = vector.shape_cast %487 : vector<1x4x4xf32> to vector<4x4xf32>
    %489 = vector.extract_strided_slice %334 {offsets = [0, 22], sizes = [4, 78], strides = [1, 1]} : vector<4x100xf32> to vector<4x78xf32>
    %cst_107 = arith.constant dense<0.000000e+00> : vector<4x78xf32>
    %490 = tpu.matmul %488, %489, %cst_107 {dimension_numbers = #tpu.dot_dimension_numbers<[1], [0], [0], [1], [0, 0, 1, 1], [], []>} : vector<4x4xf32>, vector<4x78xf32>, vector<4x78xf32> -> vector<4x78xf32>
    %491 = arith.addf %486, %490 : vector<4x78xf32>
    %492 = vector.extract_strided_slice %23 {offsets = [27, 0, 0], sizes = [1, 4, 4], strides = [1, 1, 1]} : vector<36x4x4xf32> to vector<1x4x4xf32>
    %493 = vector.shape_cast %492 : vector<1x4x4xf32> to vector<4x4xf32>
    %494 = vector.extract_strided_slice %355 {offsets = [0, 0], sizes = [4, 78], strides = [1, 1]} : vector<4x100xf32> to vector<4x78xf32>
    %cst_108 = arith.constant dense<0.000000e+00> : vector<4x78xf32>
    %495 = tpu.matmul %493, %494, %cst_108 {dimension_numbers = #tpu.dot_dimension_numbers<[1], [0], [0], [1], [0, 0, 1, 1], [], []>} : vector<4x4xf32>, vector<4x78xf32>, vector<4x78xf32> -> vector<4x78xf32>
    %496 = arith.addf %491, %495 : vector<4x78xf32>
    %497 = vector.extract_strided_slice %23 {offsets = [28, 0, 0], sizes = [1, 4, 4], strides = [1, 1, 1]} : vector<36x4x4xf32> to vector<1x4x4xf32>
    %498 = vector.shape_cast %497 : vector<1x4x4xf32> to vector<4x4xf32>
    %499 = vector.extract_strided_slice %355 {offsets = [0, 1], sizes = [4, 78], strides = [1, 1]} : vector<4x100xf32> to vector<4x78xf32>
    %cst_109 = arith.constant dense<0.000000e+00> : vector<4x78xf32>
    %500 = tpu.matmul %498, %499, %cst_109 {dimension_numbers = #tpu.dot_dimension_numbers<[1], [0], [0], [1], [0, 0, 1, 1], [], []>} : vector<4x4xf32>, vector<4x78xf32>, vector<4x78xf32> -> vector<4x78xf32>
    %501 = arith.addf %496, %500 : vector<4x78xf32>
    %502 = vector.extract_strided_slice %23 {offsets = [29, 0, 0], sizes = [1, 4, 4], strides = [1, 1, 1]} : vector<36x4x4xf32> to vector<1x4x4xf32>
    %503 = vector.shape_cast %502 : vector<1x4x4xf32> to vector<4x4xf32>
    %504 = vector.extract_strided_slice %355 {offsets = [0, 2], sizes = [4, 78], strides = [1, 1]} : vector<4x100xf32> to vector<4x78xf32>
    %cst_110 = arith.constant dense<0.000000e+00> : vector<4x78xf32>
    %505 = tpu.matmul %503, %504, %cst_110 {dimension_numbers = #tpu.dot_dimension_numbers<[1], [0], [0], [1], [0, 0, 1, 1], [], []>} : vector<4x4xf32>, vector<4x78xf32>, vector<4x78xf32> -> vector<4x78xf32>
    %506 = arith.addf %501, %505 : vector<4x78xf32>
    %507 = vector.extract_strided_slice %23 {offsets = [30, 0, 0], sizes = [1, 4, 4], strides = [1, 1, 1]} : vector<36x4x4xf32> to vector<1x4x4xf32>
    %508 = vector.shape_cast %507 : vector<1x4x4xf32> to vector<4x4xf32>
    %509 = vector.extract_strided_slice %355 {offsets = [0, 10], sizes = [4, 78], strides = [1, 1]} : vector<4x100xf32> to vector<4x78xf32>
    %cst_111 = arith.constant dense<0.000000e+00> : vector<4x78xf32>
    %510 = tpu.matmul %508, %509, %cst_111 {dimension_numbers = #tpu.dot_dimension_numbers<[1], [0], [0], [1], [0, 0, 1, 1], [], []>} : vector<4x4xf32>, vector<4x78xf32>, vector<4x78xf32> -> vector<4x78xf32>
    %511 = arith.addf %506, %510 : vector<4x78xf32>
    %512 = vector.extract_strided_slice %23 {offsets = [31, 0, 0], sizes = [1, 4, 4], strides = [1, 1, 1]} : vector<36x4x4xf32> to vector<1x4x4xf32>
    %513 = vector.shape_cast %512 : vector<1x4x4xf32> to vector<4x4xf32>
    %514 = vector.extract_strided_slice %355 {offsets = [0, 11], sizes = [4, 78], strides = [1, 1]} : vector<4x100xf32> to vector<4x78xf32>
    %cst_112 = arith.constant dense<0.000000e+00> : vector<4x78xf32>
    %515 = tpu.matmul %513, %514, %cst_112 {dimension_numbers = #tpu.dot_dimension_numbers<[1], [0], [0], [1], [0, 0, 1, 1], [], []>} : vector<4x4xf32>, vector<4x78xf32>, vector<4x78xf32> -> vector<4x78xf32>
    %516 = arith.addf %511, %515 : vector<4x78xf32>
    %517 = vector.extract_strided_slice %23 {offsets = [32, 0, 0], sizes = [1, 4, 4], strides = [1, 1, 1]} : vector<36x4x4xf32> to vector<1x4x4xf32>
    %518 = vector.shape_cast %517 : vector<1x4x4xf32> to vector<4x4xf32>
    %519 = vector.extract_strided_slice %355 {offsets = [0, 12], sizes = [4, 78], strides = [1, 1]} : vector<4x100xf32> to vector<4x78xf32>
    %cst_113 = arith.constant dense<0.000000e+00> : vector<4x78xf32>
    %520 = tpu.matmul %518, %519, %cst_113 {dimension_numbers = #tpu.dot_dimension_numbers<[1], [0], [0], [1], [0, 0, 1, 1], [], []>} : vector<4x4xf32>, vector<4x78xf32>, vector<4x78xf32> -> vector<4x78xf32>
    %521 = arith.addf %516, %520 : vector<4x78xf32>
    %522 = vector.extract_strided_slice %23 {offsets = [33, 0, 0], sizes = [1, 4, 4], strides = [1, 1, 1]} : vector<36x4x4xf32> to vector<1x4x4xf32>
    %523 = vector.shape_cast %522 : vector<1x4x4xf32> to vector<4x4xf32>
    %524 = vector.extract_strided_slice %355 {offsets = [0, 20], sizes = [4, 78], strides = [1, 1]} : vector<4x100xf32> to vector<4x78xf32>
    %cst_114 = arith.constant dense<0.000000e+00> : vector<4x78xf32>
    %525 = tpu.matmul %523, %524, %cst_114 {dimension_numbers = #tpu.dot_dimension_numbers<[1], [0], [0], [1], [0, 0, 1, 1], [], []>} : vector<4x4xf32>, vector<4x78xf32>, vector<4x78xf32> -> vector<4x78xf32>
    %526 = arith.addf %521, %525 : vector<4x78xf32>
    %527 = vector.extract_strided_slice %23 {offsets = [34, 0, 0], sizes = [1, 4, 4], strides = [1, 1, 1]} : vector<36x4x4xf32> to vector<1x4x4xf32>
    %528 = vector.shape_cast %527 : vector<1x4x4xf32> to vector<4x4xf32>
    %529 = vector.extract_strided_slice %355 {offsets = [0, 21], sizes = [4, 78], strides = [1, 1]} : vector<4x100xf32> to vector<4x78xf32>
    %cst_115 = arith.constant dense<0.000000e+00> : vector<4x78xf32>
    %530 = tpu.matmul %528, %529, %cst_115 {dimension_numbers = #tpu.dot_dimension_numbers<[1], [0], [0], [1], [0, 0, 1, 1], [], []>} : vector<4x4xf32>, vector<4x78xf32>, vector<4x78xf32> -> vector<4x78xf32>
    %531 = arith.addf %526, %530 : vector<4x78xf32>
    %532 = vector.extract_strided_slice %23 {offsets = [35, 0, 0], sizes = [1, 4, 4], strides = [1, 1, 1]} : vector<36x4x4xf32> to vector<1x4x4xf32>
    %533 = vector.shape_cast %532 : vector<1x4x4xf32> to vector<4x4xf32>
    %534 = vector.extract_strided_slice %355 {offsets = [0, 22], sizes = [4, 78], strides = [1, 1]} : vector<4x100xf32> to vector<4x78xf32>
    %cst_116 = arith.constant dense<0.000000e+00> : vector<4x78xf32>
    %535 = tpu.matmul %533, %534, %cst_116 {dimension_numbers = #tpu.dot_dimension_numbers<[1], [0], [0], [1], [0, 0, 1, 1], [], []>} : vector<4x4xf32>, vector<4x78xf32>, vector<4x78xf32> -> vector<4x78xf32>
    %536 = arith.addf %531, %535 : vector<4x78xf32>
    %537 = vector.broadcast %7 : vector<4x1xf32> to vector<4x78xf32>
    %538 = arith.addf %536, %537 : vector<4x78xf32>
    %cst_117 = arith.constant 0.000000e+00 : f32
    %539 = vector.broadcast %cst_117 : f32 to vector<4x78xf32>
    %540 = arith.cmpf oge, %538, %539 : vector<4x78xf32>
    %541 = vector.broadcast %17 : vector<4x1xf32> to vector<4x78xf32>
    %542 = arith.mulf %541, %538 : vector<4x78xf32>
    %543 = arith.select %540, %538, %542 : vector<4x78xi1>, vector<4x78xf32>
    %544 = vector.extract_strided_slice %20 {offsets = [1, 0, 0], sizes = [1, 4, 4], strides = [1, 1, 1]} : vector<2x4x4xf32> to vector<1x4x4xf32>
    %545 = vector.shape_cast %544 : vector<1x4x4xf32> to vector<4x4xf32>
    %546 = vector.extract_strided_slice %225 {offsets = [0, 11], sizes = [4, 78], strides = [1, 1]} : vector<4x100xf32> to vector<4x78xf32>
    %cst_118 = arith.constant dense<0.000000e+00> : vector<4x78xf32>
    %547 = tpu.matmul %545, %546, %cst_118 {dimension_numbers = #tpu.dot_dimension_numbers<[1], [0], [0], [1], [0, 0, 1, 1], [], []>} : vector<4x4xf32>, vector<4x78xf32>, vector<4x78xf32> -> vector<4x78xf32>
    %548 = vector.broadcast %11 : vector<4x1xf32> to vector<4x78xf32>
    %549 = arith.addf %547, %548 : vector<4x78xf32>
    %cst_119 = arith.constant 0.000000e+00 : f32
    %550 = vector.broadcast %cst_119 : f32 to vector<4x78xf32>
    %551 = arith.cmpf oge, %549, %550 : vector<4x78xf32>
    %552 = vector.broadcast %19 : vector<4x1xf32> to vector<4x78xf32>
    %553 = arith.mulf %552, %549 : vector<4x78xf32>
    %554 = arith.select %551, %549, %553 : vector<4x78xi1>, vector<4x78xf32>
    %555 = arith.addf %543, %554 : vector<4x78xf32>
    %cst_120 = arith.constant 0.000000e+00 : f32
    %556 = vector.broadcast %cst_120 : f32 to vector<4x2xf32>
    %557 = tpu.concatenate %555, %556 in 1 : vector<4x78xf32>, vector<4x2xf32> -> vector<4x80xf32>
    %c0_121 = arith.constant 0 : index
    %c0_122 = arith.constant 0 : index
    %c0_123 = arith.constant 0 : index
    %558 = vector.load %arg8[%c0_121, %c0_122, %c0_123] : memref<1x4x80xf32, #tpu.memory_space<vmem>>, vector<1x4x80xf32>
    %559 = vector.shape_cast %558 : vector<1x4x80xf32> to vector<4x80xf32>
    %560 = vector.shape_cast %557 : vector<4x80xf32> to vector<1x4x80xf32>
    tpu.vector_store %arg8[%c0_121, %c0_122, %c0_123], %560 {strides = array<i32>} : memref<1x4x80xf32, #tpu.memory_space<vmem>>, vector<1x4x80xf32>,
    return
  }
  func.func @transform_0(%arg0: i32) -> (i32, i32, i32, i32) {
    %c0_i32 = arith.constant 0 : i32
    %c0_i32_0 = arith.constant 0 : i32
    %c0_i32_1 = arith.constant 0 : i32
    %c0_i32_2 = arith.constant 0 : i32
    return %arg0, %c0_i32, %c0_i32_0, %c0_i32_1 : i32, i32, i32, i32
  }
  func.func @transform_1(%arg0: i32) -> (i32, i32, i32) {
    %c0_i32 = arith.constant 0 : i32
    %c0_i32_0 = arith.constant 0 : i32
    %c0_i32_1 = arith.constant 0 : i32
    %c0_i32_2 = arith.constant 0 : i32
    return %c0_i32, %c0_i32_0, %c0_i32_1 : i32, i32, i32
  }
  func.func @transform_2(%arg0: i32) -> (i32, i32, i32) {
    %c0_i32 = arith.constant 0 : i32
    %c0_i32_0 = arith.constant 0 : i32
    %c0_i32_1 = arith.constant 0 : i32
    %c0_i32_2 = arith.constant 0 : i32
    return %c0_i32, %c0_i32_0, %c0_i32_1 : i32, i32, i32
  }
  func.func @transform_3(%arg0: i32) -> (i32, i32, i32) {
    %c0_i32 = arith.constant 0 : i32
    %c0_i32_0 = arith.constant 0 : i32
    %c0_i32_1 = arith.constant 0 : i32
    %c0_i32_2 = arith.constant 0 : i32
    return %c0_i32, %c0_i32_0, %c0_i32_1 : i32, i32, i32
  }
  func.func @transform_4(%arg0: i32) -> (i32, i32, i32) {
    %c0_i32 = arith.constant 0 : i32
    %c0_i32_0 = arith.constant 0 : i32
    %c0_i32_1 = arith.constant 0 : i32
    %c0_i32_2 = arith.constant 0 : i32
    return %c0_i32, %c0_i32_0, %c0_i32_1 : i32, i32, i32
  }
  func.func @transform_5(%arg0: i32) -> (i32, i32, i32) {
    %c0_i32 = arith.constant 0 : i32
    %c0_i32_0 = arith.constant 0 : i32
    %c0_i32_1 = arith.constant 0 : i32
    %c0_i32_2 = arith.constant 0 : i32
    return %c0_i32, %c0_i32_0, %c0_i32_1 : i32, i32, i32
  }
  func.func @transform_6(%arg0: i32) -> (i32, i32) {
    %c0_i32 = arith.constant 0 : i32
    %c0_i32_0 = arith.constant 0 : i32
    %c0_i32_1 = arith.constant 0 : i32
    return %c0_i32, %c0_i32_0 : i32, i32
  }
  func.func @transform_7(%arg0: i32) -> (i32, i32, i32) {
    %c0_i32 = arith.constant 0 : i32
    %c0_i32_0 = arith.constant 0 : i32
    %c0_i32_1 = arith.constant 0 : i32
    return %arg0, %c0_i32, %c0_i32_0 : i32, i32, i32
  }
}

</mosaic_0001>

<bundles_post_ra>
// kernel: edpu_forward.1
= control target key start
LH: loop header
LB: loop body
LE: loop exit
PB: predicated region body
PF: predicated region fallthrough
CT: control target
= control target key end

     0   :  { %s8212_s24 = smov 0   ;;  %s9159_s0 = inlined_call_operand.vmem [shape: f32[2,4,4,100], index: 0, kind: input, shape index: {}]   ;;  %s9160_s1 = inlined_call_operand.vmem [shape: f32[36,4,4], index: 1, kind: input, shape index: {}]   ;;  %s9161_s2 = inlined_call_operand.vmem [shape: f32[9,16,4], index: 2, kind: input, shape index: {}]   ;;  %s9162_s3 = inlined_call_operand.vmem [shape: f32[36,4,4], index: 3, kind: input, shape index: {}]   ;;  %s9163_s4 = inlined_call_operand.vmem [shape: f32[2,4,4], index: 4, kind: input, shape index: {}]   ;;  %s9164_s5 = inlined_call_operand.vmem [shape: f32[9,4,1], index: 5, kind: input, shape index: {}]   ;;  %s9165_s6 = inlined_call_operand.vmem [shape: f32[1,78], index: 6, kind: input, shape index: {}]   ;;  %s9166_s7 = inlined_call_operand.vmem [shape: f32[2,4,80], index: 7, kind: output, shape index: {}]  }
   0x1 LB: > { %s7310_s25 = sadd.s32 4294967295, %s8158_s24   ;;  %p7314_p0 = scmp.ge.s32.totalorder %s8158_s24, 1  ;;  %s8158_s24 = sphi %s8212_s24, %s17_s24  }
   0x2   : > { %p237_p1 = scmp.lt.s32.totalorder %s8158_s24, 3 }
   0x4   : > { %p238_p2 = pnand %p7314_p0, %p237_p1 }
   0x5   : > { %p268_p3 = scmp.lt.s32.totalorder (!%p238_p2), %s7310_s25, 1  ;;  %v8160_v0 = vmov (!%p238_p2), 0.0   ;;  %vm8161_vm0 = vmmov (!%p238_p2), 0   ;;  %vm390_vm1 = vcmask (!%p238_p2), 1043456   ;;  %vm386_vm2 = vcmask (!%p238_p2), 31744   ;;  %s8162_s9 = smov (!%p238_p2), 127  }
   0x6   : > { %241 = sbr.rel (%p238_p2) target bundleno = 1475 (0x5c3), region = 48  ;;  %7684 = vmatprep.subr.mxu0 (!%p238_p2), %v8160_v0  ;;  %7689 = vmatprep.subr.mxu1 (!%p238_p2), %v8160_v0  ;;  %v289_v2 = vld [vmem:[%s9160_s1] sm:$0xf] (!%p238_p2)  ;;  %s8163_s10 = smov (!%p238_p2), 118   ;;  %v283_v7 = vld [vmem:[%s9164_s5 + $0x14] sm:$0xf] (!%p238_p2) }
   0x7   : > { %7686 = vmatprep.mubr.msk.f32.mxu0 (!%p238_p2), %vm8161_vm0, %v8160_v0  ;;  %7691 = vmatprep.mubr.msk.f32.mxu1 (!%p238_p2), %vm8161_vm0, %v8160_v0  ;;  %s8164_s11 = smov (!%p238_p2), 126   ;;  %s8165_s12 = smov (!%p238_p2), 117   ;;  %v278_v6 = vld [vmem:[%s9164_s5] sm:$0xf] (!%p238_p2)  ;;  %v8170_v8 = vmov (!%p238_p2), 0   ;;  %vm3212_vm4 = vcmask (!%p238_p2), 89088  }
   0x8   : > { %s8166_s13 = smov (!%p238_p2), 116   ;;  %s8167_s14 = smov (!%p238_p2), 108   ;;  %8150 = vset.pattern.permute.xlu0 (!%p238_p2), %v8170_v8  ;;  %8151 = vset.pattern.permute.xlu1 (!%p238_p2), %v8170_v8  ;;  %v290_v9 = vld [vmem:[%s9160_s1 + $0x4] sm:$0xf] (!%p238_p2)  ;;  %v292_v12 = vld [vmem:[%s9160_s1 + $0xc] sm:$0xf] (!%p238_p2) }
   0x9   : > { %s8168_s15 = smov (!%p238_p2), 107   ;;  %s8169_s16 = smov (!%p238_p2), 106   ;;  %v291_v13 = vld [vmem:[%s9160_s1 + $0x8] sm:$0xf] (!%p238_p2)  ;;  %v293_v16 = vld [vmem:[%s9160_s1 + $0x10] sm:$0xf] (!%p238_p2) }
   0xa   : > { %v294_v17 = vld [vmem:[%s9160_s1 + $0x14] sm:$0xf] (!%p238_p2)  ;;  %v295_v20 = vld [vmem:[%s9160_s1 + $0x18] sm:$0xf] (!%p238_p2)  ;;  %v296_v21 = vld [vmem:[%s9160_s1 + $0x1c] sm:$0xf] (!%p238_p2) }
   0xb   : > { %v297_v24 = vld [vmem:[%s9160_s1 + $0x20] sm:$0xf] (!%p238_p2)  ;;  %v298_v25 = vld [vmem:[%s9160_s1 + $0x24] sm:$0xf] (!%p238_p2)  ;;  %v299_v28 = vld [vmem:[%s9160_s1 + $0x28] sm:$0xf] (!%p238_p2) }
   0xc   : > { %v300_v29 = vld [vmem:[%s9160_s1 + $0x2c] sm:$0xf] (!%p238_p2)  ;;  %v301_v32 = vld [vmem:[%s9160_s1 + $0x30] sm:$0xf] (!%p238_p2)  ;;  %v302_v33 = vld [vmem:[%s9160_s1 + $0x34] sm:$0xf] (!%p238_p2) }
   0xd   : > { %s9168_s25 = smov (!%p268_p3, %s7310_s25), 1  ;;  %v303_v36 = vld [vmem:[%s9160_s1 + $0x38] sm:$0xf]  ;;  %v304_v37 = vld [vmem:[%s9160_s1 + $0x3c] sm:$0xf]  ;;  %s8171_s17 = smov 11  }
   0xe   : > { %s7502_s26 = sshll.u32 %s9168_s25, 4  ;;  %v305_v40 = vld [vmem:[%s9160_s1 + $0x40] sm:$0xf]  ;;  %v306_v41 = vld [vmem:[%s9160_s1 + $0x44] sm:$0xf]  ;;  %vm3214_vm5 = vcmask 728064  }
   0xf   : > { %s8232_s29 = scalar_lea.vmem %s9159_s0, %s7502_s26  ;;  %v307_v44 = vld [vmem:[%s9160_s1 + $0x48] sm:$0xf]  ;;  %v308_v45 = vld [vmem:[%s9160_s1 + $0x4c] sm:$0xf]  ;;  %v309_v48 = vld [vmem:[%s9160_s1 + $0x50] sm:$0xf] }
  0x10   : > { %v379_v1 = vld [vmem:[%s8232_s29] sm:$0xf]  ;;  %v8252_v3 = vld [vmem:[%s8232_s29 + $0x4] sm:$0xf]  ;;  %v8271_v4 = vld [vmem:[%s8232_s29 + $0x8] sm:$0xf] }
  0x11   : > { %384 = vrot.lane.b32.xlu0 %v379_v1, %s8162_s9  ;;  %616 = vrot.lane.b32.xlu1 %v379_v1, %s8163_s10  ;;  %v8290_v5 = vld [vmem:[%s8232_s29 + $0xc] sm:$0xf]  ;;  %v310_v49 = vld [vmem:[%s9160_s1 + $0x54] sm:$0xf]  ;;  %s7317_s22 = sshll.u32 %s9168_s25, 2  ;;  %vm7253_vm12 = vcmask 637952  }
  0x12   : > { %7690 = vmatpush3.msk.msra.mxu1 %vm390_vm1, %v379_v1  ;;  %v311_v52 = vld [vmem:[%s9160_s1 + $0x58] sm:$0xf]  ;;  %v312_v53 = vld [vmem:[%s9160_s1 + $0x5c] sm:$0xf]  ;;  %v313_v56 = vld [vmem:[%s9160_s1 + $0x60] sm:$0xf] }
  0x13   : > { %7692 = vmatmul.mubr.msk.f32.vlgmr.msra.gmra.mrb[0].mxu1 %vm386_vm2, %v289_v2  ;;  %7699 = vmatprep.subr.mxu1 %v8160_v0  ;;  %v314_v57 = vld [vmem:[%s9160_s1 + $0x64] sm:$0xf]  ;;  %v315_v60 = vld [vmem:[%s9160_s1 + $0x68] sm:$0xf]  ;;  %v316_v61 = vld [vmem:[%s9160_s1 + $0x6c] sm:$0xf] }
  0x14   : > { %7701 = vmatprep.mubr.msk.f32.mxu1 %vm8161_vm0, %v8160_v0  ;;  %v318_v2 = vld [vmem:[%s9160_s1 + $0x74] sm:$0xf]  ;;  %v322_v8 = vld [vmem:[%s9160_s1 + $0x84] sm:$0xf]  ;;  %vm7255_vm13 = vcmask 650240  }
  0x15   : > { %538 = vrot.lane.b32.xlu0 %v379_v1, %s8164_s11  ;;  %694 = vrot.lane.b32.xlu1 %v379_v1, %s8165_s12 }
  0x19   : > { %772 = vrot.lane.b32.xlu0 %v379_v1, %s8166_s13  ;;  %850 = vrot.lane.b32.xlu1 %v379_v1, %s8167_s14 }
  0x1d   : > { %928 = vrot.lane.b32.xlu0 %v379_v1, %s8168_s15  ;;  %1006 = vrot.lane.b32.xlu1 %v379_v1, %s8169_s16  ;;  %v317_v1 = vld [vmem:[%s9160_s1 + $0x70] sm:$0xf] }
  0x21   : > { %1239 = vrot.lane.b32.xlu1 %v8252_v3, %s8164_s11  ;;  %1161 = vrot.lane.b32.xlu0 %v8252_v3, %s8162_s9 }
  0x25   : > { %1395 = vrot.lane.b32.xlu1 %v8252_v3, %s8165_s12  ;;  %1317 = vrot.lane.b32.xlu0 %v8252_v3, %s8163_s10 }
  0x29   : > { %1551 = vrot.lane.b32.xlu1 %v8252_v3, %s8167_s14  ;;  %1473 = vrot.lane.b32.xlu0 %v8252_v3, %s8166_s13 }
  0x2d   : > { %1707 = vrot.lane.b32.xlu1 %v8252_v3, %s8169_s16  ;;  %1629 = vrot.lane.b32.xlu0 %v8252_v3, %s8168_s15 }
  0x31   : > { %1862 = vrot.lane.b32.xlu0 %v8271_v4, %s8162_s9  ;;  %1940 = vrot.lane.b32.xlu1 %v8271_v4, %s8164_s11 }
  0x35   : > { %2018 = vrot.lane.b32.xlu0 %v8271_v4, %s8163_s10  ;;  %2096 = vrot.lane.b32.xlu1 %v8271_v4, %s8165_s12 }
  0x39   : > { %2174 = vrot.lane.b32.xlu0 %v8271_v4, %s8166_s13  ;;  %2252 = vrot.lane.b32.xlu1 %v8271_v4, %s8167_s14 }
  0x3d   : > { %2330 = vrot.lane.b32.xlu0 %v8271_v4, %s8168_s15  ;;  %2408 = vrot.lane.b32.xlu1 %v8271_v4, %s8169_s16 }
  0x41   : > { %2641 = vrot.lane.b32.xlu1 %v8290_v5, %s8164_s11  ;;  %2563 = vrot.lane.b32.xlu0 %v8290_v5, %s8162_s9 }
  0x45   : > { %2797 = vrot.lane.b32.xlu1 %v8290_v5, %s8165_s12  ;;  %2719 = vrot.lane.b32.xlu0 %v8290_v5, %s8163_s10 }
  0x49   : > { %2953 = vrot.lane.b32.xlu1 %v8290_v5, %s8167_s14  ;;  %2875 = vrot.lane.b32.xlu0 %v8290_v5, %s8166_s13 }
  0x4d   : > { %3109 = vrot.lane.b32.xlu1 %v8290_v5, %s8169_s16  ;;  %3031 = vrot.lane.b32.xlu0 %v8290_v5, %s8168_s15 }
  0x51   : > { %3189 = vperm.xlu0 %8150, %v278_v6   ;;  %3196 = vperm.xlu1 %8151, %v283_v7   ;;  %v321_v7 = vld [vmem:[%s9160_s1 + $0x80] sm:$0xf] }
  0x83   : > { %v385_v10 = vpop.permute.xlu0 %384  ;;  %v617_v11 = vpop.permute.xlu1 %616 }
  0x84   : > { %7685 = vmatpush3.msk.msra.mxu0 %vm390_vm1, %v385_v10  ;;  %7700 = vmatpush3.msk.msra.mxu1 %vm390_vm1, %v617_v11  ;;  %v323_v11 = vld [vmem:[%s9160_s1 + $0x88] sm:$0xf] }
  0x85   : > { %7687 = vmatmul.mubr.msk.f32.vlgmr.msra.gmra.mrb[0].mxu0 %vm386_vm2, %v290_v9  ;;  %7694 = vmatprep.subr.mxu0 %v8160_v0 }
  0x86   : > { %7696 = vmatprep.mubr.msk.f32.mxu0 %vm8161_vm0, %v8160_v0  ;;  %7702 = vmatmul.mubr.msk.f32.vlgmr.msra.gmra.mrb[2].mxu1 %vm386_vm2, %v292_v12  ;;  %v324_v12 = vld [vmem:[%s9160_s1 + $0x8c] sm:$0xf] }
  0x87   : > { %v539_v14 = vpop.permute.xlu0 %538  ;;  %v8330_v15 = vpop.permute.xlu1 %694  ;;  %7709 = vmatprep.subr.mxu1 %v8160_v0  ;;  %7711 = vmatprep.mubr.msk.f32.mxu1 %vm8161_vm0, %v8160_v0 }
  0x88   : > { %7695 = vmatpush3.msk.msra.mxu0 %vm390_vm1, %v539_v14 }
  0x89   : > { %7697 = vmatmul.mubr.msk.f32.vlgmr.msra.gmra.mrb[2].mxu0 %vm386_vm2, %v291_v13  ;;  %7704 = vmatprep.subr.mxu0 %v8160_v0  ;;  %v287_v13 = vld [vmem:[%s9163_s4] sm:$0xf] }
  0x8a   : > { %7705 = vmatpush3.msk.msra.mxu0 %vm390_vm1, %v8330_v15  ;;  %7706 = vmatprep.mubr.msk.f32.mxu0 %vm8161_vm0, %v8160_v0 }
  0x8b   : > { %v773_v18 = vpop.permute.xlu0 %772  ;;  %v851_v19 = vpop.permute.xlu1 %850  ;;  %7714 = vmatprep.subr.mxu0 %v8160_v0 }
  0x8c   : > { %7710 = vmatpush3.msk.msra.mxu1 %vm390_vm1, %v773_v18 }
  0x8d   : > { %7707 = vmatmul.mubr.msk.f32.vlgmr.msra.gmra.mrb[4].mxu0 %vm386_vm2, %v293_v16  ;;  %7712 = vmatmul.mubr.msk.f32.vlgmr.msra.gmra.mrb[4].mxu1 %vm386_vm2, %v294_v17 }
  0x8e   : > { %7719 = vmatprep.subr.mxu1 %v8160_v0  ;;  %7715 = vmatpush3.msk.msra.mxu0 %vm390_vm1, %v851_v19 }
  0x8f   : > { %v929_v22 = vpop.permute.xlu0 %928  ;;  %7716 = vmatprep.mubr.msk.f32.mxu0 %vm8161_vm0, %v8160_v0  ;;  %7721 = vmatprep.mubr.msk.f32.mxu1 %vm8161_vm0, %v8160_v0  ;;  %v1007_v23 = vpop.permute.xlu1 %1006 }
  0x90   : > { %7720 = vmatpush3.msk.msra.mxu1 %vm390_vm1, %v929_v22  ;;  %7724 = vmatprep.subr.mxu0 %v8160_v0 }
  0x91   : > { %7717 = vmatmul.mubr.msk.f32.vlgmr.msra.gmra.mrb[6].mxu0 %vm386_vm2, %v295_v20  ;;  %7722 = vmatmul.mubr.msk.f32.vlgmr.msra.gmra.mrb[6].mxu1 %vm386_vm2, %v296_v21 }
  0x92   : > { %7729 = vmatprep.subr.mxu1 %v8160_v0  ;;  %7725 = vmatpush3.msk.msra.mxu0 %vm390_vm1, %v1007_v23 }
  0x93   : > { %7726 = vmatprep.mubr.msk.f32.mxu0 %vm8161_vm0, %v8160_v0  ;;  %7730 = vmatpush3.msk.msra.mxu1 %vm390_vm1, %v8252_v3  ;;  %v1240_v26 = vpop.permute.xlu1 %1239  ;;  %v1162_v27 = vpop.permute.xlu0 %1161 }
  0x94   : > { %7731 = vmatprep.mubr.msk.f32.mxu1 %vm8161_vm0, %v8160_v0  ;;  %7734 = vmatprep.subr.mxu0 %v8160_v0 }
  0x95   : > { %7727 = vmatmul.mubr.msk.f32.vlgmr.msra.gmra.mrb[8].mxu0 %vm386_vm2, %v297_v24  ;;  %7732 = vmatmul.mubr.msk.f32.vlgmr.msra.gmra.mrb[8].mxu1 %vm386_vm2, %v298_v25 }
  0x96   : > { %7739 = vmatprep.subr.mxu1 %v8160_v0  ;;  %7735 = vmatpush3.msk.msra.mxu0 %vm390_vm1, %v1162_v27 }
  0x97   : > { %7736 = vmatprep.mubr.msk.f32.mxu0 %vm8161_vm0, %v8160_v0  ;;  %7740 = vmatpush3.msk.msra.mxu1 %vm390_vm1, %v1240_v26  ;;  %v8396_v30 = vpop.permute.xlu1 %1395  ;;  %v1318_v31 = vpop.permute.xlu0 %1317 }
  0x98   : > { %7741 = vmatprep.mubr.msk.f32.mxu1 %vm8161_vm0, %v8160_v0  ;;  %7744 = vmatprep.subr.mxu0 %v8160_v0 }
  0x99   : > { %7737 = vmatmul.mubr.msk.f32.vlgmr.msra.gmra.mrb[10].mxu0 %vm386_vm2, %v299_v28  ;;  %7742 = vmatmul.mubr.msk.f32.vlgmr.msra.gmra.mrb[10].mxu1 %vm386_vm2, %v300_v29 }
  0x9a   : > { %7749 = vmatprep.subr.mxu1 %v8160_v0  ;;  %7745 = vmatpush3.msk.msra.mxu0 %vm390_vm1, %v1318_v31 }
  0x9b   : > { %7746 = vmatprep.mubr.msk.f32.mxu0 %vm8161_vm0, %v8160_v0  ;;  %7750 = vmatpush3.msk.msra.mxu1 %vm390_vm1, %v8396_v30  ;;  %v1552_v34 = vpop.permute.xlu1 %1551  ;;  %v1474_v35 = vpop.permute.xlu0 %1473 }
  0x9c   : > { %7751 = vmatprep.mubr.msk.f32.mxu1 %vm8161_vm0, %v8160_v0  ;;  %7754 = vmatprep.subr.mxu0 %v8160_v0 }
  0x9d   : > { %7747 = vmatmul.mubr.msk.f32.vlgmr.msra.gmra.mrb[12].mxu0 %vm386_vm2, %v301_v32  ;;  %7752 = vmatmul.mubr.msk.f32.vlgmr.msra.gmra.mrb[12].mxu1 %vm386_vm2, %v302_v33 }
  0x9e   : > { %7759 = vmatprep.subr.mxu1 %v8160_v0  ;;  %7755 = vmatpush3.msk.msra.mxu0 %vm390_vm1, %v1474_v35 }
  0x9f   : > { %7756 = vmatprep.mubr.msk.f32.mxu0 %vm8161_vm0, %v8160_v0  ;;  %7760 = vmatpush3.msk.msra.mxu1 %vm390_vm1, %v1552_v34  ;;  %v1708_v38 = vpop.permute.xlu1 %1707  ;;  %v1630_v39 = vpop.permute.xlu0 %1629 }
  0xa0   : > { %7761 = vmatprep.mubr.msk.f32.mxu1 %vm8161_vm0, %v8160_v0  ;;  %7764 = vmatprep.subr.mxu0 %v8160_v0 }
  0xa1   : > { %7757 = vmatmul.mubr.msk.f32.vlgmr.msra.gmra.mrb[14].mxu0 %vm386_vm2, %v303_v36  ;;  %7762 = vmatmul.mubr.msk.f32.vlgmr.msra.gmra.mrb[14].mxu1 %vm386_vm2, %v304_v37 }
  0xa2   : > { %7769 = vmatprep.subr.mxu1 %v8160_v0  ;;  %7765 = vmatpush3.msk.msra.mxu0 %vm390_vm1, %v1630_v39 }
  0xa3   : > { %7766 = vmatprep.mubr.msk.f32.mxu0 %vm8161_vm0, %v8160_v0  ;;  %7770 = vmatpush3.msk.msra.mxu1 %vm390_vm1, %v1708_v38  ;;  %v1863_v42 = vpop.permute.xlu0 %1862  ;;  %v1941_v43 = vpop.permute.xlu1 %1940 }
  0xa4   : > { %7771 = vmatprep.mubr.msk.f32.mxu1 %vm8161_vm0, %v8160_v0  ;;  %7774 = vmatprep.subr.mxu0 %v8160_v0 }
  0xa5   : > { %7767 = vmatmul.mubr.msk.f32.vlgmr.msra.gmra.mrb[16].mxu0 %vm386_vm2, %v305_v40  ;;  %7772 = vmatmul.mubr.msk.f32.vlgmr.msra.gmra.mrb[16].mxu1 %vm386_vm2, %v306_v41 }
  0xa6   : > { %7779 = vmatprep.subr.mxu1 %v8160_v0  ;;  %7775 = vmatpush3.msk.msra.mxu0 %vm390_vm1, %v8271_v4  ;;  %v319_v4 = vld [vmem:[%s9160_s1 + $0x78] sm:$0xf] }
  0xa7   : > { %7776 = vmatprep.mubr.msk.f32.mxu0 %vm8161_vm0, %v8160_v0  ;;  %7780 = vmatpush3.msk.msra.mxu1 %vm390_vm1, %v1863_v42  ;;  %v2019_v46 = vpop.permute.xlu0 %2018  ;;  %v8464_v47 = vpop.permute.xlu1 %2096 }
  0xa8   : > { %7781 = vmatprep.mubr.msk.f32.mxu1 %vm8161_vm0, %v8160_v0  ;;  %7784 = vmatprep.subr.mxu0 %v8160_v0 }
  0xa9   : > { %7777 = vmatmul.mubr.msk.f32.vlgmr.msra.gmra.mrb[18].mxu0 %vm386_vm2, %v307_v44  ;;  %7782 = vmatmul.mubr.msk.f32.vlgmr.msra.gmra.mrb[18].mxu1 %vm386_vm2, %v308_v45 }
  0xaa   : > { %7789 = vmatprep.subr.mxu1 %v8160_v0  ;;  %7785 = vmatpush3.msk.msra.mxu0 %vm390_vm1, %v1941_v43 }
  0xab   : > { %7786 = vmatprep.mubr.msk.f32.mxu0 %vm8161_vm0, %v8160_v0  ;;  %7790 = vmatpush3.msk.msra.mxu1 %vm390_vm1, %v2019_v46  ;;  %v2175_v50 = vpop.permute.xlu0 %2174  ;;  %v2253_v51 = vpop.permute.xlu1 %2252 }
  0xac   : > { %7791 = vmatprep.mubr.msk.f32.mxu1 %vm8161_vm0, %v8160_v0  ;;  %7794 = vmatprep.subr.mxu0 %v8160_v0 }
  0xad   : > { %7787 = vmatmul.mubr.msk.f32.vlgmr.msra.gmra.mrb[20].mxu0 %vm386_vm2, %v309_v48  ;;  %7792 = vmatmul.mubr.msk.f32.vlgmr.msra.gmra.mrb[20].mxu1 %vm386_vm2, %v310_v49 }
  0xae   : > { %7799 = vmatprep.subr.mxu1 %v8160_v0  ;;  %7795 = vmatpush3.msk.msra.mxu0 %vm390_vm1, %v8464_v47 }
  0xaf   : > { %7796 = vmatprep.mubr.msk.f32.mxu0 %vm8161_vm0, %v8160_v0  ;;  %7800 = vmatpush3.msk.msra.mxu1 %vm390_vm1, %v2175_v50  ;;  %v2331_v54 = vpop.permute.xlu0 %2330  ;;  %v2409_v55 = vpop.permute.xlu1 %2408 }
  0xb0   : > { %7801 = vmatprep.mubr.msk.f32.mxu1 %vm8161_vm0, %v8160_v0  ;;  %7804 = vmatprep.subr.mxu0 %v8160_v0 }
  0xb1   : > { %7797 = vmatmul.mubr.msk.f32.vlgmr.msra.gmra.mrb[22].mxu0 %vm386_vm2, %v311_v52  ;;  %7802 = vmatmul.mubr.msk.f32.vlgmr.msra.gmra.mrb[22].mxu1 %vm386_vm2, %v312_v53 }
  0xb2   : > { %7809 = vmatprep.subr.mxu1 %v8160_v0  ;;  %7805 = vmatpush3.msk.msra.mxu0 %vm390_vm1, %v2253_v51 }
  0xb3   : > { %7806 = vmatprep.mubr.msk.f32.mxu0 %vm8161_vm0, %v8160_v0  ;;  %7810 = vmatpush3.msk.msra.mxu1 %vm390_vm1, %v2331_v54  ;;  %v2642_v58 = vpop.permute.xlu1 %2641  ;;  %v2564_v59 = vpop.permute.xlu0 %2563 }
  0xb4   : > { %7811 = vmatprep.mubr.msk.f32.mxu1 %vm8161_vm0, %v8160_v0  ;;  %7814 = vmatprep.subr.mxu0 %v8160_v0 }
  0xb5   : > { %7807 = vmatmul.mubr.msk.f32.vlgmr.msra.gmra.mrb[24].mxu0 %vm386_vm2, %v313_v56  ;;  %7812 = vmatmul.mubr.msk.f32.vlgmr.msra.gmra.mrb[24].mxu1 %vm386_vm2, %v314_v57 }
  0xb6   : > { %7819 = vmatprep.subr.mxu1 %v8160_v0  ;;  %7815 = vmatpush3.msk.msra.mxu0 %vm390_vm1, %v2409_v55 }
  0xb7   : > { %7816 = vmatprep.mubr.msk.f32.mxu0 %vm8161_vm0, %v8160_v0  ;;  %7820 = vmatpush3.msk.msra.mxu1 %vm390_vm1, %v8290_v5  ;;  %v8532_v62 = vpop.permute.xlu1 %2797  ;;  %v2720_v63 = vpop.permute.xlu0 %2719  ;;  %v320_v5 = vld [vmem:[%s9160_s1 + $0x7c] sm:$0xf] }
  0xb8   : > { %7821 = vmatprep.mubr.msk.f32.mxu1 %vm8161_vm0, %v8160_v0  ;;  %7824 = vmatprep.subr.mxu0 %v8160_v0 }
  0xb9   : > { %7817 = vmatmul.mubr.msk.f32.vlgmr.msra.gmra.mrb[26].mxu0 %vm386_vm2, %v315_v60  ;;  %7822 = vmatmul.mubr.msk.f32.vlgmr.msra.gmra.mrb[26].mxu1 %vm386_vm2, %v316_v61 }
  0xba   : > { %7829 = vmatprep.subr.mxu1 %v8160_v0  ;;  %7825 = vmatpush3.msk.msra.mxu0 %vm390_vm1, %v2564_v59 }
  0xbb   : > { %7826 = vmatprep.mubr.msk.f32.mxu0 %vm8161_vm0, %v8160_v0  ;;  %7830 = vmatpush3.msk.msra.mxu1 %vm390_vm1, %v2642_v58  ;;  %v2954_v3 = vpop.permute.xlu1 %2953  ;;  %v2876_v6 = vpop.permute.xlu0 %2875 }
  0xbc   : > { %7831 = vmatprep.mubr.msk.f32.mxu1 %vm8161_vm0, %v8160_v0  ;;  %7834 = vmatprep.subr.mxu0 %v8160_v0 }
  0xbd   : > { %7827 = vmatmul.mubr.msk.f32.vlgmr.msra.gmra.mrb[28].mxu0 %vm386_vm2, %v317_v1  ;;  %7832 = vmatmul.mubr.msk.f32.vlgmr.msra.gmra.mrb[28].mxu1 %vm386_vm2, %v318_v2 }
  0xbe   : > { %7839 = vmatprep.subr.mxu1 %v8160_v0  ;;  %7835 = vmatpush3.msk.msra.mxu0 %vm390_vm1, %v2720_v63 }
  0xbf   : > { %7836 = vmatprep.mubr.msk.f32.mxu0 %vm8161_vm0, %v8160_v0  ;;  %7840 = vmatpush3.msk.msra.mxu1 %vm390_vm1, %v8532_v62  ;;  %v3110_v9 = vpop.permute.xlu1 %3109  ;;  %v3032_v10 = vpop.permute.xlu0 %3031 }
  0xc0   : > { %7841 = vmatprep.mubr.msk.f32.mxu1 %vm8161_vm0, %v8160_v0  ;;  %7844 = vmatprep.subr.mxu0 %v8160_v0 }
  0xc1   : > { %7837 = vmatmul.mubr.msk.f32.vlgmr.msra.gmra.mrb[30].mxu0 %vm386_vm2, %v319_v4  ;;  %7842 = vmatmul.mubr.msk.f32.vlgmr.msra.gmra.mrb[30].mxu1 %vm386_vm2, %v320_v5 }
  0xc2   : > { %7849 = vmatprep.subr.mxu1 %v8160_v0  ;;  %7845 = vmatpush3.msk.msra.mxu0 %vm390_vm1, %v2876_v6 }
  0xc3   : > { %7846 = vmatprep.mubr.msk.f32.mxu0 %vm8161_vm0, %v8160_v0  ;;  %7850 = vmatpush3.msk.msra.mxu1 %vm390_vm1, %v2954_v3 }
  0xc4   : > { %7851 = vmatprep.mubr.msk.f32.mxu1 %vm8161_vm0, %v8160_v0  ;;  %7859 = vmatprep.subr.mxu1 %v8160_v0 }
  0xc5   : > { %7847 = vmatmul.mubr.msk.f32.vlgmr.msra.gmra.mrb[32].mxu0 %vm386_vm2, %v321_v7  ;;  %7852 = vmatmul.mubr.msk.f32.vlgmr.msra.gmra.mrb[32].mxu1 %vm386_vm2, %v322_v8 }
  0xc6   : > { %7854 = vmatprep.subr.mxu0 %v8160_v0  ;;  %7860 = vmatpush3.msk.msra.mxu1 %vm390_vm1, %v3110_v9 }
  0xc7   : > { %7855 = vmatpush3.msk.msra.mxu0 %vm390_vm1, %v3032_v10  ;;  %7856 = vmatprep.mubr.msk.f32.mxu0 %vm8161_vm0, %v8160_v0 }
  0xc8   : > { %7861 = vmatprep.mubr.msk.f32.mxu1 %vm8161_vm0, %v8160_v0  ;;  %7909 = vmatprep.subr.mxu1 %v8160_v0 }
  0xc9   : > { %7857 = vmatmul.mubr.msk.f32.vlgmr.msra.gmra.mrb[34].mxu0 %vm386_vm2, %v323_v11  ;;  %7862 = vmatmul.mubr.msk.f32.vlgmr.msra.gmra.mrb[34].mxu1 %vm386_vm2, %v324_v12 }
  0xca   : > { %7910 = vmatpush3.msk.msra.mxu1 %vm390_vm1, %v8330_v15  ;;  %7911 = vmatprep.mubr.msk.f32.mxu1 %vm8161_vm0, %v8160_v0 }
  0xcb   : > { %7914 = vmatprep.subr.mxu1 %v8160_v0 }
  0xcd   : > { %7912 = vmatmul.mubr.msk.f32.vlgmr.msra.gmra.mrb[36].mxu1 %vm386_vm2, %v287_v13 }
  0xce   : > { %7915 = vmatpush3.msk.msra.mxu1 %vm390_vm1, %v8396_v30  ;;  %7916 = vmatprep.mubr.msk.f32.mxu1 %vm8161_vm0, %v8160_v0 }
  0xcf   : > { %7919 = vmatprep.subr.mxu1 %v8160_v0 }
  0xd1   : > { %7917 = vmatmul.mubr.msk.f32.vlgmr.msra.gmra.mrb[38].mxu1 %vm386_vm2, %v287_v13 }
  0xd2   : > { %7920 = vmatpush3.msk.msra.mxu1 %vm390_vm1, %v8464_v47  ;;  %7921 = vmatprep.mubr.msk.f32.mxu1 %vm8161_vm0, %v8160_v0 }
  0xd3   : > { %7924 = vmatprep.subr.mxu1 %v8160_v0 }
  0xd5   : > { %7922 = vmatmul.mubr.msk.f32.vlgmr.msra.gmra.mrb[40].mxu1 %vm386_vm2, %v287_v13 }
  0xd6   : > { %7925 = vmatpush3.msk.msra.mxu1 %vm390_vm1, %v8532_v62  ;;  %7926 = vmatprep.mubr.msk.f32.mxu1 %vm8161_vm0, %v8160_v0 }
  0xd7   : > { %7929 = vmatprep.subr.mxu1 %v8160_v0 }
  0xd9   : > { %7927 = vmatmul.mubr.msk.f32.vlgmr.msra.gmra.mrb[42].mxu1 %vm386_vm2, %v287_v13 }
  0xda   : > { %7931 = vmatprep.mubr.msk.f32.mxu1 %vm8161_vm0, %v8160_v0 }
  0xe6   : > { %v534_v14 = vpop.f32.mrb[0].mxu1 }
  0xe7   : > { %v7693_v15 = vpop.f32.mrb[1].mxu1 }
 0x158   : > { %v459_v16 = vpop.f32.mrb[0].mxu0 }
 0x159   : > { %v535_v17 = vadd.f32 %v534_v14, %v459_v16  ;;  %v7688_v18 = vpop.f32.mrb[1].mxu0  ;;  %v689_v19 = vpop.f32.mrb[2].mxu1 }
 0x15a   : > { %v7703_v20 = vpop.f32.mrb[3].mxu1 }
 0x15c   : > { %v611_v21 = vpop.f32.mrb[2].mxu0 }
 0x15d   : > { %v615_v22 = vadd.f32 %v611_v21, %v535_v17  ;;  %v7698_v23 = vpop.f32.mrb[3].mxu0 }
 0x15f   : > { %v693_v24 = vadd.f32 %v689_v19, %v615_v22 }
 0x160   : > { %v767_v25 = vpop.f32.mrb[4].mxu0  ;;  %v845_v26 = vpop.f32.mrb[4].mxu1 }
 0x161   : > { %v771_v27 = vadd.f32 %v767_v25, %v693_v24  ;;  %v7708_v28 = vpop.f32.mrb[5].mxu0  ;;  %v7713_v29 = vpop.f32.mrb[5].mxu1 }
 0x163   : > { %v849_v30 = vadd.f32 %v845_v26, %v771_v27 }
 0x164   : > { %v923_v31 = vpop.f32.mrb[6].mxu0  ;;  %v1001_v32 = vpop.f32.mrb[6].mxu1 }
 0x165   : > { %v927_v33 = vadd.f32 %v923_v31, %v849_v30  ;;  %v7718_v34 = vpop.f32.mrb[7].mxu0  ;;  %v7723_v35 = vpop.f32.mrb[7].mxu1 }
 0x167   : > { %v1005_v36 = vadd.f32 %v1001_v32, %v927_v33 }
 0x168   : > { %v1079_v37 = vpop.f32.mrb[8].mxu0  ;;  %v1156_v38 = vpop.f32.mrb[8].mxu1 }
 0x169   : > { %v1083_v39 = vadd.f32 %v1079_v37, %v1005_v36  ;;  %v7728_v40 = vpop.f32.mrb[9].mxu0  ;;  %v7733_v41 = vpop.f32.mrb[9].mxu1 }
 0x16b   : > { %v1160_v42 = vadd.f32 %v1156_v38, %v1083_v39 }
 0x16c   : > { %v1234_v43 = vpop.f32.mrb[10].mxu0  ;;  %v1312_v44 = vpop.f32.mrb[10].mxu1 }
 0x16d   : > { %v1238_v45 = vadd.f32 %v1234_v43, %v1160_v42  ;;  %v7738_v46 = vpop.f32.mrb[11].mxu0  ;;  %v7743_v47 = vpop.f32.mrb[11].mxu1 }
 0x16f   : > { %v1316_v48 = vadd.f32 %v1312_v44, %v1238_v45 }
 0x170   : > { %v1390_v49 = vpop.f32.mrb[12].mxu0  ;;  %v1468_v50 = vpop.f32.mrb[12].mxu1 }
 0x171   : > { %v1394_v51 = vadd.f32 %v1390_v49, %v1316_v48  ;;  %v7748_v52 = vpop.f32.mrb[13].mxu0  ;;  %v7753_v53 = vpop.f32.mrb[13].mxu1 }
 0x173   : > { %v1472_v54 = vadd.f32 %v1468_v50, %v1394_v51 }
 0x174   : > { %v1546_v55 = vpop.f32.mrb[14].mxu0  ;;  %v1624_v56 = vpop.f32.mrb[14].mxu1 }
 0x175   : > { %v1550_v57 = vadd.f32 %v1546_v55, %v1472_v54  ;;  %v7758_v58 = vpop.f32.mrb[15].mxu0  ;;  %v7763_v59 = vpop.f32.mrb[15].mxu1 }
 0x176   : > { %v3197_v59 = vpop.permute.xlu1 %3196 }
 0x177   : > { %v1628_v60 = vadd.f32 %v1624_v56, %v1550_v57  ;;  %v3190_v57 = vpop.permute.xlu0 %3189 }
 0x178   : > { %v1702_v61 = vpop.f32.mrb[16].mxu0  ;;  %v1780_v62 = vpop.f32.mrb[16].mxu1 }
 0x179   : > { %v1706_v63 = vadd.f32 %v1702_v61, %v1628_v60  ;;  %v7768_v1 = vpop.f32.mrb[17].mxu0  ;;  %v7773_v2 = vpop.f32.mrb[17].mxu1 }
 0x17a   : > { %v327_v2 = vld [vmem:[%s9161_s2 + $0x10] sm:$0xff] }
 0x17b   : > { %v1784_v3 = vadd.f32 %v1780_v62, %v1706_v63  ;;  %v8636_v62 = vld [vmem:[%s9165_s6] ss:$0 sm:$0xff]  ;;  %7866 = vmatprep.mubr.msk.f32.mxu0 %vm386_vm2, %v327_v2 }
 0x17c   : > { %v1857_v4 = vpop.f32.mrb[18].mxu0  ;;  %v1935_v5 = vpop.f32.mrb[18].mxu1 }
 0x17d   : > { %v1861_v6 = vadd.f32 %v1857_v4, %v1784_v3  ;;  %v7778_v7 = vpop.f32.mrb[19].mxu0  ;;  %v7783_v8 = vpop.f32.mrb[19].mxu1 }
 0x17f   : > { %v1939_v9 = vadd.f32 %v1935_v5, %v1861_v6 }
 0x180   : > { %v2013_v10 = vpop.f32.mrb[20].mxu0  ;;  %v2091_v11 = vpop.f32.mrb[20].mxu1 }
 0x181   : > { %v2017_v12 = vadd.f32 %v2013_v10, %v1939_v9  ;;  %v7788_v13 = vpop.f32.mrb[21].mxu0  ;;  %v7793_v14 = vpop.f32.mrb[21].mxu1  ;;  %v284_v10 = vld [vmem:[%s9164_s5 + $0x18] sm:$0xf] }
 0x183   : > { %v2095_v15 = vadd.f32 %v2091_v11, %v2017_v12  ;;  %v281_v11 = vld [vmem:[%s9164_s5 + $0xc] sm:$0xf] }
 0x184   : > { %v2169_v16 = vpop.f32.mrb[22].mxu0  ;;  %v2247_v17 = vpop.f32.mrb[22].mxu1 }
 0x185   : > { %v2173_v18 = vadd.f32 %v2169_v16, %v2095_v15  ;;  %v7798_v19 = vpop.f32.mrb[23].mxu0  ;;  %v7803_v20 = vpop.f32.mrb[23].mxu1  ;;  %v279_v15 = vld [vmem:[%s9164_s5 + $0x4] sm:$0xf] }
 0x186   : > { %v325_v19 = vld [vmem:[%s9161_s2] sm:$0xff] }
 0x187   : > { %v2251_v21 = vadd.f32 %v2247_v17, %v2173_v18  ;;  %v328_v18 = vld [vmem:[%s9161_s2 + $0x18] sm:$0xff] }
 0x188   : > { %v2325_v22 = vpop.f32.mrb[24].mxu0  ;;  %v2403_v23 = vpop.f32.mrb[24].mxu1 }
 0x189   : > { %v2329_v24 = vadd.f32 %v2325_v22, %v2251_v21  ;;  %v7808_v25 = vpop.f32.mrb[25].mxu0  ;;  %v7813_v26 = vpop.f32.mrb[25].mxu1  ;;  %v326_v21 = vld [vmem:[%s9161_s2 + $0x8] sm:$0xff]  ;;  %v329_v22 = vld [vmem:[%s9161_s2 + $0x20] sm:$0xff] }
 0x18a   : > { %v331_v25 = vld [vmem:[%s9161_s2 + $0x30] sm:$0xff] }
 0x18b   : > { %v2407_v27 = vadd.f32 %v2403_v23, %v2329_v24  ;;  %v330_v24 = vld [vmem:[%s9161_s2 + $0x28] sm:$0xff] }
 0x18c   : > { %v2481_v28 = vpop.f32.mrb[26].mxu0  ;;  %v2558_v29 = vpop.f32.mrb[26].mxu1 }
 0x18d   : > { %v2485_v30 = vadd.f32 %v2481_v28, %v2407_v27  ;;  %v7818_v31 = vpop.f32.mrb[27].mxu0  ;;  %v7823_v32 = vpop.f32.mrb[27].mxu1  ;;  %v332_v27 = vld [vmem:[%s9161_s2 + $0x38] sm:$0xff]  ;;  %v333_v28 = vld [vmem:[%s9161_s2 + $0x40] sm:$0xff] }
 0x18e   : > { %v335_v31 = vld [vmem:[%s9161_s2 + $0x50] sm:$0xff] }
 0x18f   : > { %v2562_v33 = vadd.f32 %v2558_v29, %v2485_v30  ;;  %v334_v30 = vld [vmem:[%s9161_s2 + $0x48] sm:$0xff] }
 0x190   : > { %v2636_v34 = vpop.f32.mrb[28].mxu0  ;;  %v2714_v35 = vpop.f32.mrb[28].mxu1 }
 0x191   : > { %v2640_v36 = vadd.f32 %v2636_v34, %v2562_v33  ;;  %v7828_v37 = vpop.f32.mrb[29].mxu0  ;;  %v7833_v38 = vpop.f32.mrb[29].mxu1  ;;  %v336_v33 = vld [vmem:[%s9161_s2 + $0x58] sm:$0xff]  ;;  %v337_v34 = vld [vmem:[%s9161_s2 + $0x60] sm:$0xff] }
 0x192   : > { %v339_v37 = vld [vmem:[%s9161_s2 + $0x70] sm:$0xff] }
 0x193   : > { %v2718_v39 = vadd.f32 %v2714_v35, %v2640_v36  ;;  %v338_v36 = vld [vmem:[%s9161_s2 + $0x68] sm:$0xff] }
 0x194   : > { %v2792_v40 = vpop.f32.mrb[30].mxu0  ;;  %v2870_v41 = vpop.f32.mrb[30].mxu1 }
 0x195   : > { %v2796_v42 = vadd.f32 %v2792_v40, %v2718_v39  ;;  %v7838_v43 = vpop.f32.mrb[31].mxu0  ;;  %v7843_v44 = vpop.f32.mrb[31].mxu1  ;;  %v340_v39 = vld [vmem:[%s9161_s2 + $0x78] sm:$0xff]  ;;  %v341_v40 = vld [vmem:[%s9161_s2 + $0x80] sm:$0xff] }
 0x197   : > { %v2874_v45 = vadd.f32 %v2870_v41, %v2796_v42  ;;  %v342_v41 = vld [vmem:[%s9161_s2 + $0x88] sm:$0xff] }
 0x198   : > { %v2948_v46 = vpop.f32.mrb[32].mxu0  ;;  %v3026_v47 = vpop.f32.mrb[32].mxu1 }
 0x199   : > { %v2952_v48 = vadd.f32 %v2948_v46, %v2874_v45  ;;  %v7848_v49 = vpop.f32.mrb[33].mxu0  ;;  %v7853_v50 = vpop.f32.mrb[33].mxu1 }
 0x19b   : > { %v3030_v51 = vadd.f32 %v3026_v47, %v2952_v48 }
 0x19c   : > { %v3104_v52 = vpop.f32.mrb[34].mxu0  ;;  %v3182_v53 = vpop.f32.mrb[34].mxu1 }
 0x19d   : > { %v3108_v54 = vadd.f32 %v3104_v52, %v3030_v51  ;;  %v7858_v55 = vpop.f32.mrb[35].mxu0  ;;  %v7863_v56 = vpop.f32.mrb[35].mxu1 }
 0x19f   : > { %v3186_v58 = vadd.f32 %v3182_v53, %v3108_v54 }
 0x1a0   : > { %v8650_v6 = vpop.f32.mrb[36].mxu1 }
 0x1a1   : > { %v3192_v60 = vadd.f32 %v3190_v57, %v3186_v58  ;;  %v7913_v7 = vpop.f32.mrb[37].mxu1 }
 0x1a3   : > { %vm3193_vm3 = vcmp.ge.f32.partialorder %v3192_v60, 0.0  ;;  %v3199_v61 = vmul.f32 %v3197_v59, %v3192_v60 }
 0x1a4   : > { %v8654_v8 = vpop.f32.mrb[38].mxu1 }
 0x1a5   : > { %v3200_v63 = vsel %vm3193_vm3, %v3192_v60, %v3199_v61  ;;  %v7918_v9 = vpop.f32.mrb[39].mxu1 }
 0x1a6   : > { %v3207_v1 = vmul.f32 %v8636_v62, %v3200_v63 }
 0x1a8   : > { %3209 = vrot.lane.b32.xlu1 %v3207_v1, %s8171_s17  ;;  %v8664_v12 = vpop.f32.mrb[40].mxu1 }
 0x1a9   : > { %v7923_v13 = vpop.f32.mrb[41].mxu1 }
 0x1ac   : > { %v8666_v14 = vpop.f32.mrb[42].mxu1 }
 0x1ad   : > { %v7928_v16 = vpop.f32.mrb[43].mxu1 }
 0x21a   : > { %v3210_v3 = vpop.permute.xlu1 %3209 }
 0x21b   : > { %v3213_v4 = vsel %vm3212_vm4, 0.0, %v3210_v3 }
 0x21c   : > { %v3215_v5 = vsel %vm3214_vm5, %v3213_v4, 0.0 }
 0x21d   : > { %3385 = vrot.lane.b32.xlu1 %v3215_v5, %s8164_s11  ;;  %3217 = vrot.lane.b32.xlu0 %v3215_v5, %s8162_s9 }
 0x221   : > { %3559 = vrot.lane.b32.xlu1 %v3215_v5, %s8165_s12  ;;  %3472 = vrot.lane.b32.xlu0 %v3215_v5, %s8163_s10 }
 0x225   : > { %3733 = vrot.lane.b32.xlu1 %v3215_v5, %s8167_s14  ;;  %3646 = vrot.lane.b32.xlu0 %v3215_v5, %s8166_s13 }
 0x229   : > { %3907 = vrot.lane.b32.xlu1 %v3215_v5, %s8169_s16  ;;  %3820 = vrot.lane.b32.xlu0 %v3215_v5, %s8168_s15 }
 0x22d   : > { %4081 = vperm.xlu1 %8151, %v284_v10   ;;  %4002 = vperm.xlu0 %8150, %v281_v11  }
 0x231   : > { %3996 = vperm.xlu0 %8150, %v279_v15  }
 0x28f   : > { %v3218_v17 = vpop.permute.xlu0 %3217  ;;  %v3386_v20 = vpop.permute.xlu1 %3385 }
 0x290   : > { %7864 = vmatprep.subr.msk.mxu0 %vm390_vm1, %v3218_v17 }
 0x291   : > { %7865 = vmatpush3.msk.msra.mxu0 %vm390_vm1, %v3218_v17 }
 0x292   : > { %7867 = vmatmul.mubr.msk.f32.vlgmr.msra.gmra.mrb[36].mxu0 %vm386_vm2, %v328_v18  ;;  %7869 = vmatprep.subr.msk.mxu0 %vm390_vm1, %v3215_v5 }
 0x293   : > { %7870 = vmatpush3.msk.msra.mxu0 %vm390_vm1, %v3215_v5  ;;  %7871 = vmatprep.mubr.msk.f32.mxu0 %vm386_vm2, %v325_v19  ;;  %v3473_v23 = vpop.permute.xlu0 %3472  ;;  %v8701_v26 = vpop.permute.xlu1 %3559 }
 0x294   : > { %7874 = vmatprep.subr.msk.mxu0 %vm390_vm1, %v3386_v20 }
 0x297   : > { %v3647_v29 = vpop.permute.xlu0 %3646  ;;  %v3734_v32 = vpop.permute.xlu1 %3733 }
 0x29a   : > { %7872 = vmatmul.mubr.msk.f32.vlgmr.msra.gmra.mrb[36].mxu0 %vm386_vm2, %v326_v21 }
 0x29b   : > { %7875 = vmatpush3.msk.msra.mxu0 %vm390_vm1, %v3386_v20  ;;  %7876 = vmatprep.mubr.msk.f32.mxu0 %vm386_vm2, %v329_v22  ;;  %v3821_v35 = vpop.permute.xlu0 %3820  ;;  %v3908_v38 = vpop.permute.xlu1 %3907 }
 0x29c   : > { %7879 = vmatprep.subr.msk.mxu0 %vm390_vm1, %v3473_v23 }
 0x2a2   : > { %7877 = vmatmul.mubr.msk.f32.vlgmr.msra.gmra.mrb[36].mxu0 %vm386_vm2, %v330_v24 }
 0x2a3   : > { %7880 = vmatpush3.msk.msra.mxu0 %vm390_vm1, %v3473_v23  ;;  %7881 = vmatprep.mubr.msk.f32.mxu0 %vm386_vm2, %v331_v25  ;;  %v280_v25 = vld [vmem:[%s9164_s5 + $0x8] sm:$0xf] }
 0x2a4   : > { %7884 = vmatprep.subr.msk.mxu0 %vm390_vm1, %v8701_v26 }
 0x2aa   : > { %7882 = vmatmul.mubr.msk.f32.vlgmr.msra.gmra.mrb[36].mxu0 %vm386_vm2, %v332_v27  ;;  %v285_v27 = vld [vmem:[%s9164_s5 + $0x1c] sm:$0xf] }
 0x2ab   : > { %7885 = vmatpush3.msk.msra.mxu0 %vm390_vm1, %v8701_v26  ;;  %7886 = vmatprep.mubr.msk.f32.mxu0 %vm386_vm2, %v333_v28  ;;  %v282_v28 = vld [vmem:[%s9164_s5 + $0x10] sm:$0xf] }
 0x2ac   : > { %7889 = vmatprep.subr.msk.mxu0 %vm390_vm1, %v3647_v29  ;;  %v4003_v42 = vpop.permute.xlu0 %4002  ;;  %v4082_v45 = vpop.permute.xlu1 %4081 }
 0x2ad   : > { %v4332_v43 = vadd.f32 %v8666_v14, %v4003_v42  ;;  %v4164_v44 = vadd.f32 %v8654_v8, %v4003_v42  ;;  %v4250_v46 = vadd.f32 %v8664_v12, %v4003_v42  ;;  %v4075_v48 = vadd.f32 %v8650_v6, %v4003_v42 }
 0x2af   : > { %v4336_v47 = vmul.f32 %v4332_v43, %v4082_v45  ;;  %v4168_v49 = vmul.f32 %v4164_v44, %v4082_v45  ;;  %vm4335_vm6 = vcmp.ge.f32.partialorder %v4332_v43, 0.0  ;;  %vm4167_vm7 = vcmp.ge.f32.partialorder %v4164_v44, 0.0 }
 0x2b0   : > { %v3997_v50 = vpop.permute.xlu0 %3996  ;;  %v4254_v52 = vmul.f32 %v4250_v46, %v4082_v45  ;;  %vm4253_vm8 = vcmp.ge.f32.partialorder %v4250_v46, 0.0  ;;  %v4084_v54 = vmul.f32 %v4082_v45, %v4075_v48  ;;  %vm4078_vm9 = vcmp.ge.f32.partialorder %v4075_v48, 0.0  ;;  %v347_v45 = vld [vmem:[%s9162_s3 + $0x10] sm:$0xf] }
 0x2b1   : > { %v4337_v51 = vsel %vm4335_vm6, %v4332_v43, %v4336_v47  ;;  %v4094_v53 = vrot.slane %v3997_v50, 4  ;;  %v4169_v55 = vsel %vm4167_vm7, %v4164_v44, %v4168_v49  ;;  %v352_v44 = vld [vmem:[%s9162_s3 + $0x24] sm:$0xf]  ;;  %v354_v49 = vld [vmem:[%s9162_s3 + $0x2c] sm:$0xf] }
 0x2b2   : > { %7887 = vmatmul.mubr.msk.f32.vlgmr.msra.gmra.mrb[36].mxu0 %vm386_vm2, %v334_v30  ;;  %v4339_v57 = vrot.slane %v4337_v51, 4  ;;  %v4255_v61 = vsel %vm4253_vm8, %v4250_v46, %v4254_v52  ;;  %v4171_v2 = vrot.slane %v4169_v55, 4  ;;  %v4085_v5 = vsel %vm4078_vm9, %v4075_v48, %v4084_v54  ;;  %v344_v30 = vld [vmem:[%s9162_s3 + $0x4] sm:$0xf]  ;;  %v349_v48 = vld [vmem:[%s9162_s3 + $0x18] sm:$0xf] }
 0x2b3   : > { %7890 = vmatpush3.msk.msra.mxu0 %vm390_vm1, %v3647_v29  ;;  %7891 = vmatprep.mubr.msk.f32.mxu0 %vm386_vm2, %v335_v31  ;;  %v286_v29 = vld [vmem:[%s9164_s5 + $0x20] sm:$0xf] }
 0x2b4   : > { %7894 = vmatprep.subr.msk.mxu0 %vm390_vm1, %v3734_v32  ;;  %v351_v52 = vld [vmem:[%s9162_s3 + $0x20] sm:$0xf] }
 0x2ba   : > { %7892 = vmatmul.mubr.msk.f32.vlgmr.msra.gmra.mrb[36].mxu0 %vm386_vm2, %v336_v33  ;;  %v343_v33 = vld [vmem:[%s9162_s3] sm:$0xf] }
 0x2bb   : > { %7895 = vmatpush3.msk.msra.mxu0 %vm390_vm1, %v3734_v32  ;;  %7896 = vmatprep.mubr.msk.f32.mxu0 %vm386_vm2, %v337_v34  ;;  %v348_v34 = vld [vmem:[%s9162_s3 + $0x14] sm:$0xf] }
 0x2bc   : > { %7899 = vmatprep.subr.msk.mxu0 %vm390_vm1, %v3821_v35 }
 0x2c2   : > { %7897 = vmatmul.mubr.msk.f32.vlgmr.msra.gmra.mrb[36].mxu0 %vm386_vm2, %v338_v36 }
 0x2c3   : > { %7900 = vmatpush3.msk.msra.mxu0 %vm390_vm1, %v3821_v35  ;;  %7901 = vmatprep.mubr.msk.f32.mxu0 %vm386_vm2, %v339_v37  ;;  %v345_v37 = vld [vmem:[%s9162_s3 + $0x8] sm:$0xf] }
 0x2c4   : > { %7904 = vmatprep.subr.msk.mxu0 %vm390_vm1, %v3908_v38 }
 0x2ca   : > { %7902 = vmatmul.mubr.msk.f32.vlgmr.msra.gmra.mrb[36].mxu0 %vm386_vm2, %v340_v39 }
 0x2cb   : > { %7905 = vmatpush3.msk.msra.mxu0 %vm390_vm1, %v3908_v38  ;;  %7906 = vmatprep.mubr.msk.f32.mxu0 %vm386_vm2, %v341_v40  ;;  %v350_v40 = vld [vmem:[%s9162_s3 + $0x1c] sm:$0xf] }
 0x2cc   : > { %7954 = vmatprep.subr.mxu0 %v8160_v0 }
 0x2d2   : > { %7907 = vmatmul.mubr.msk.f32.vlgmr.msra.gmra.mrb[36].mxu0 %vm386_vm2, %v342_v41  ;;  %v346_v41 = vld [vmem:[%s9162_s3 + $0xc] sm:$0xf] }
 0x2d3   : > { %7956 = vmatprep.mubr.msk.f32.mxu0 %vm8161_vm0, %v8160_v0 }
 0x3a5   : > { %v7908_v56 = vpop.f32.mrb[36].mxu0 }
 0x3a6   : > { %v4182_v58 = vadd.f32 %v7908_v56, %v3997_v50  ;;  %v4264_v59 = vadd.f32 %v7908_v56, %v4094_v53  ;;  %v3983_v60 = vpop.f32.mrb[37].mxu0  ;;  %v353_v56 = vld [vmem:[%s9162_s3 + $0x28] sm:$0xf] }
 0x3a7   : > { %v3999_v63 = vadd.f32 %v3997_v50, %v3983_v60  ;;  %v4096_v1 = vadd.f32 %v4094_v53, %v3983_v60  ;;  %v356_v53 = vld [vmem:[%s9162_s3 + $0x34] sm:$0xf]  ;;  %v355_v60 = vld [vmem:[%s9162_s3 + $0x30] sm:$0xf] }
 0x3a8   : > { %v4256_v3 = vsub.f32 %v4182_v58, %v4255_v61  ;;  %v4341_v4 = vsub.f32 %v4264_v59, %v4339_v57  ;;  %v358_v57 = vld [vmem:[%s9162_s3 + $0x3c] sm:$0xf]  ;;  %v360_v61 = vld [vmem:[%s9162_s3 + $0x44] sm:$0xf] }
 0x3a9   : > { %v4086_v6 = vsub.f32 %v3999_v63, %v4085_v5  ;;  %v4173_v7 = vsub.f32 %v4096_v1, %v4171_v2  ;;  %v357_v2 = vld [vmem:[%s9162_s3 + $0x38] sm:$0xf]  ;;  %v359_v5 = vld [vmem:[%s9162_s3 + $0x40] sm:$0xf] }
 0x3aa   : > { %v4257_v11 = vmul.f32 %v8636_v62, %v4256_v3  ;;  %v4342_v12 = vmul.f32 %v8636_v62, %v4341_v4  ;;  %v362_v4 = vld [vmem:[%s9162_s3 + $0x4c] sm:$0xf] }
 0x3ab   : > { %v4087_v8 = vmul.f32 %v8636_v62, %v4086_v6  ;;  %v4174_v9 = vmul.f32 %v8636_v62, %v4173_v7  ;;  %v364_v7 = vld [vmem:[%s9162_s3 + $0x54] sm:$0xf] }
 0x3ac   : > { %v4344_v13 = vrot.slane %v4342_v12, 4 }
 0x3ad   : > { %4089 = vrot.lane.b32.xlu1 %v4087_v8, %s8171_s17  ;;  %v4176_v10 = vrot.slane %v4174_v9, 4  ;;  %v361_v9 = vld [vmem:[%s9162_s3 + $0x48] sm:$0xf] }
 0x3af   : > { %4177 = vrot.lane.b32.xlu0 %v4176_v10, %s8171_s17 }
 0x3b1   : > { %4259 = vrot.lane.b32.xlu1 %v4257_v11, %s8171_s17  ;;  %v366_v11 = vld [vmem:[%s9162_s3 + $0x5c] sm:$0xf] }
 0x3b5   : > { %4345 = vrot.lane.b32.xlu1 %v4344_v13, %s8171_s17  ;;  %v363_v13 = vld [vmem:[%s9162_s3 + $0x50] sm:$0xf] }
 0x41f   : > { %v4090_v14 = vpop.permute.xlu1 %4089 }
 0x420   : > { %v4092_v15 = vsel %vm3212_vm4, 0.0, %v4090_v14 }
 0x421   : > { %v4093_v16 = vsel %vm3214_vm5, %v4092_v15, 0.0  ;;  %v4178_v17 = vpop.permute.xlu0 %4177  ;;  %v368_v15 = vld [vmem:[%s9162_s3 + $0x64] sm:$0xf] }
 0x422   : > { %4351 = vrot.lane.b32.xlu0 %v4093_v16, %s8162_s9  ;;  %4581 = vrot.lane.b32.xlu1 %v4093_v16, %s8163_s10  ;;  %v4180_v62 = vsel %vm3212_vm4, 0.0, %v4178_v17 }
 0x423   : > { %v8786_v18 = vsel %vm3214_vm5, %v4180_v62, 0.0  ;;  %v4260_v19 = vpop.permute.xlu1 %4259  ;;  %v370_v62 = vld [vmem:[%s9162_s3 + $0x6c] sm:$0xf] }
 0x424   : > { %v4262_v20 = vsel %vm3212_vm4, 0.0, %v4260_v19 }
 0x425   : > { %v8804_v21 = vsel %vm3214_vm5, %v4262_v20, 0.0 }
 0x426   : > { %4503 = vrot.lane.b32.xlu0 %v4093_v16, %s8164_s11  ;;  %4737 = vrot.lane.b32.xlu1 %v4093_v16, %s8166_s13 }
 0x427   : > { %v4346_v22 = vpop.permute.xlu1 %4345 }
 0x428   : > { %v4348_v23 = vsel %vm3212_vm4, 0.0, %v4346_v22  ;;  %v369_v22 = vld [vmem:[%s9162_s3 + $0x68] sm:$0xf] }
 0x429   : > { %v8824_v24 = vsel %vm3214_vm5, %v4348_v23, 0.0 }
 0x42a   : > { %4659 = vrot.lane.b32.xlu0 %v4093_v16, %s8165_s12  ;;  %4893 = vrot.lane.b32.xlu1 %v4093_v16, %s8168_s15 }
 0x42e   : > { %4815 = vrot.lane.b32.xlu0 %v4093_v16, %s8167_s14  ;;  %5126 = vrot.lane.b32.xlu1 %v8786_v18, %s8162_s9 }
 0x432   : > { %4971 = vrot.lane.b32.xlu0 %v4093_v16, %s8169_s16  ;;  %5282 = vrot.lane.b32.xlu1 %v8786_v18, %s8163_s10 }
 0x436   : > { %5204 = vrot.lane.b32.xlu0 %v8786_v18, %s8164_s11  ;;  %5438 = vrot.lane.b32.xlu1 %v8786_v18, %s8166_s13 }
 0x43a   : > { %5360 = vrot.lane.b32.xlu0 %v8786_v18, %s8165_s12  ;;  %5594 = vrot.lane.b32.xlu1 %v8786_v18, %s8168_s15 }
 0x43e   : > { %5516 = vrot.lane.b32.xlu0 %v8786_v18, %s8167_s14  ;;  %5827 = vrot.lane.b32.xlu1 %v8804_v21, %s8162_s9 }
 0x442   : > { %5672 = vrot.lane.b32.xlu0 %v8786_v18, %s8169_s16  ;;  %5983 = vrot.lane.b32.xlu1 %v8804_v21, %s8163_s10 }
 0x446   : > { %5905 = vrot.lane.b32.xlu0 %v8804_v21, %s8164_s11  ;;  %6139 = vrot.lane.b32.xlu1 %v8804_v21, %s8166_s13 }
 0x44a   : > { %6061 = vrot.lane.b32.xlu0 %v8804_v21, %s8165_s12  ;;  %6295 = vrot.lane.b32.xlu1 %v8804_v21, %s8168_s15 }
 0x44e   : > { %6217 = vrot.lane.b32.xlu0 %v8804_v21, %s8167_s14  ;;  %6528 = vrot.lane.b32.xlu1 %v8824_v24, %s8162_s9  ;;  %s276_s9 = scalar_lea.vmem %s9166_s7, %s7317_s22 }
 0x452   : > { %6373 = vrot.lane.b32.xlu0 %v8804_v21, %s8169_s16  ;;  %6684 = vrot.lane.b32.xlu1 %v8824_v24, %s8163_s10 }
 0x456   : > { %6606 = vrot.lane.b32.xlu0 %v8824_v24, %s8164_s11  ;;  %6840 = vrot.lane.b32.xlu1 %v8824_v24, %s8166_s13 }
 0x45a   : > { %6762 = vrot.lane.b32.xlu0 %v8824_v24, %s8165_s12  ;;  %6996 = vrot.lane.b32.xlu1 %v8824_v24, %s8168_s15 }
 0x45e   : > { %6918 = vrot.lane.b32.xlu0 %v8824_v24, %s8167_s14  ;;  %7154 = vperm.xlu1 %8151, %v280_v25  }
 0x462   : > { %7074 = vrot.lane.b32.xlu0 %v8824_v24, %s8169_s16  ;;  %7161 = vperm.xlu1 %8151, %v285_v27   ;;  %v371_v27 = vld [vmem:[%s9162_s3 + $0x70] sm:$0xf] }
 0x466   : > { %7168 = vperm.xlu0 %8150, %v282_v28   ;;  %v376_v28 = vld [vmem:[%s9162_s3 + $0x84] sm:$0xf] }
 0x46a   : > { %7247 = vperm.xlu0 %8150, %v286_v29  }
 0x494   : > { %v4352_v31 = vpop.permute.xlu0 %4351  ;;  %v4582_v32 = vpop.permute.xlu1 %4581 }
 0x495   : > { %7930 = vmatpush3.msk.msra.mxu1 %vm390_vm1, %v4352_v31 }
 0x496   : > { %7932 = vmatmul.mubr.msk.f32.vlgmr.msra.gmra.mrb[44].mxu1 %vm386_vm2, %v344_v30  ;;  %7934 = vmatprep.subr.mxu1 %v8160_v0  ;;  %v373_v30 = vld [vmem:[%s9162_s3 + $0x78] sm:$0xf] }
 0x497   : > { %7935 = vmatpush3.msk.msra.mxu1 %vm390_vm1, %v4093_v16  ;;  %7936 = vmatprep.mubr.msk.f32.mxu1 %vm8161_vm0, %v8160_v0  ;;  %v365_v16 = vld [vmem:[%s9162_s3 + $0x58] sm:$0xf] }
 0x498   : > { %v4504_v35 = vpop.permute.xlu0 %4503  ;;  %v4738_v36 = vpop.permute.xlu1 %4737  ;;  %7939 = vmatprep.subr.mxu1 %v8160_v0 }
 0x499   : > { %7955 = vmatpush3.msk.msra.mxu0 %vm390_vm1, %v4738_v36  ;;  %v288_v36 = vld [vmem:[%s9163_s4 + $0x4] sm:$0xf] }
 0x49a   : > { %7937 = vmatmul.mubr.msk.f32.vlgmr.msra.gmra.mrb[46].mxu1 %vm386_vm2, %v343_v33  ;;  %7957 = vmatmul.mubr.msk.f32.vlgmr.msra.gmra.mrb[38].mxu0 %vm386_vm2, %v348_v34  ;;  %v375_v33 = vld [vmem:[%s9162_s3 + $0x80] sm:$0xf] }
 0x49b   : > { %7940 = vmatpush3.msk.msra.mxu1 %vm390_vm1, %v4504_v35  ;;  %7964 = vmatprep.subr.mxu0 %v8160_v0  ;;  %v377_v35 = vld [vmem:[%s9162_s3 + $0x88] sm:$0xf] }
 0x49c   : > { %v4660_v38 = vpop.permute.xlu0 %4659  ;;  %v4894_v39 = vpop.permute.xlu1 %4893  ;;  %7941 = vmatprep.mubr.msk.f32.mxu1 %vm8161_vm0, %v8160_v0  ;;  %7944 = vmatprep.subr.mxu1 %v8160_v0 }
 0x49d   : > { %7965 = vmatpush3.msk.msra.mxu0 %vm390_vm1, %v4894_v39  ;;  %7966 = vmatprep.mubr.msk.f32.mxu0 %vm8161_vm0, %v8160_v0 }
 0x49e   : > { %7942 = vmatmul.mubr.msk.f32.vlgmr.msra.gmra.mrb[48].mxu1 %vm386_vm2, %v345_v37  ;;  %7974 = vmatprep.subr.mxu0 %v8160_v0 }
 0x49f   : > { %7945 = vmatpush3.msk.msra.mxu1 %vm390_vm1, %v4582_v32  ;;  %7967 = vmatmul.mubr.msk.f32.vlgmr.msra.gmra.mrb[40].mxu0 %vm386_vm2, %v350_v40  ;;  %v378_v32 = vld [vmem:[%s9162_s3 + $0x8c] sm:$0xf] }
 0x4a0   : > { %7975 = vmatpush3.msk.msra.mxu0 %vm390_vm1, %v8786_v18  ;;  %v4816_v42 = vpop.permute.xlu0 %4815  ;;  %v5127_v43 = vpop.permute.xlu1 %5126  ;;  %7946 = vmatprep.mubr.msk.f32.mxu1 %vm8161_vm0, %v8160_v0  ;;  %v367_v18 = vld [vmem:[%s9162_s3 + $0x60] sm:$0xf] }
 0x4a1   : > { %7949 = vmatprep.subr.mxu1 %v8160_v0  ;;  %7976 = vmatprep.mubr.msk.f32.mxu0 %vm8161_vm0, %v8160_v0 }
 0x4a2   : > { %7947 = vmatmul.mubr.msk.f32.vlgmr.msra.gmra.mrb[50].mxu1 %vm386_vm2, %v346_v41  ;;  %7984 = vmatprep.subr.mxu0 %v8160_v0 }
 0x4a3   : > { %7950 = vmatpush3.msk.msra.mxu1 %vm390_vm1, %v4660_v38  ;;  %7951 = vmatprep.mubr.msk.f32.mxu1 %vm8161_vm0, %v8160_v0 }
 0x4a4   : > { %v4972_v46 = vpop.permute.xlu0 %4971  ;;  %v5283_v47 = vpop.permute.xlu1 %5282  ;;  %7959 = vmatprep.subr.mxu1 %v8160_v0  ;;  %7977 = vmatmul.mubr.msk.f32.vlgmr.msra.gmra.mrb[42].mxu0 %vm386_vm2, %v352_v44 }
 0x4a5   : > { %7986 = vmatprep.mubr.msk.f32.mxu0 %vm8161_vm0, %v8160_v0 }
 0x4a6   : > { %7952 = vmatmul.mubr.msk.f32.vlgmr.msra.gmra.mrb[52].mxu1 %vm386_vm2, %v347_v45 }
 0x4a7   : > { %7960 = vmatpush3.msk.msra.mxu1 %vm390_vm1, %v4816_v42  ;;  %7961 = vmatprep.mubr.msk.f32.mxu1 %vm8161_vm0, %v8160_v0 }
 0x4a8   : > { %v5205_v50 = vpop.permute.xlu0 %5204  ;;  %v5439_v51 = vpop.permute.xlu1 %5438  ;;  %7969 = vmatprep.subr.mxu1 %v8160_v0 }
 0x4a9   : > { %7985 = vmatpush3.msk.msra.mxu0 %vm390_vm1, %v5205_v50 }
 0x4aa   : > { %7962 = vmatmul.mubr.msk.f32.vlgmr.msra.gmra.mrb[54].mxu1 %vm386_vm2, %v349_v48  ;;  %7987 = vmatmul.mubr.msk.f32.vlgmr.msra.gmra.mrb[44].mxu0 %vm386_vm2, %v354_v49 }
 0x4ab   : > { %7970 = vmatpush3.msk.msra.mxu1 %vm390_vm1, %v4972_v46  ;;  %7994 = vmatprep.subr.mxu0 %v8160_v0 }
 0x4ac   : > { %v5361_v54 = vpop.permute.xlu0 %5360  ;;  %v5595_v55 = vpop.permute.xlu1 %5594  ;;  %7971 = vmatprep.mubr.msk.f32.mxu1 %vm8161_vm0, %v8160_v0  ;;  %7979 = vmatprep.subr.mxu1 %v8160_v0 }
 0x4ad   : > { %7995 = vmatpush3.msk.msra.mxu0 %vm390_vm1, %v5361_v54  ;;  %7996 = vmatprep.mubr.msk.f32.mxu0 %vm8161_vm0, %v8160_v0 }
 0x4ae   : > { %7972 = vmatmul.mubr.msk.f32.vlgmr.msra.gmra.mrb[56].mxu1 %vm386_vm2, %v351_v52  ;;  %7997 = vmatmul.mubr.msk.f32.vlgmr.msra.gmra.mrb[46].mxu0 %vm386_vm2, %v356_v53 }
 0x4af   : > { %7980 = vmatpush3.msk.msra.mxu1 %vm390_vm1, %v5127_v43  ;;  %8004 = vmatprep.subr.mxu0 %v8160_v0 }
 0x4b0   : > { %v5517_v58 = vpop.permute.xlu0 %5516  ;;  %7981 = vmatprep.mubr.msk.f32.mxu1 %vm8161_vm0, %v8160_v0  ;;  %7989 = vmatprep.subr.mxu1 %v8160_v0  ;;  %v5828_v59 = vpop.permute.xlu1 %5827 }
 0x4b1   : > { %8005 = vmatpush3.msk.msra.mxu0 %vm390_vm1, %v5517_v58  ;;  %8006 = vmatprep.mubr.msk.f32.mxu0 %vm8161_vm0, %v8160_v0 }
 0x4b2   : > { %7982 = vmatmul.mubr.msk.f32.vlgmr.msra.gmra.mrb[58].mxu1 %vm386_vm2, %v353_v56  ;;  %8007 = vmatmul.mubr.msk.f32.vlgmr.msra.gmra.mrb[48].mxu0 %vm386_vm2, %v358_v57 }
 0x4b3   : > { %7990 = vmatpush3.msk.msra.mxu1 %vm390_vm1, %v5283_v47  ;;  %8014 = vmatprep.subr.mxu0 %v8160_v0 }
 0x4b4   : > { %v5673_v63 = vpop.permute.xlu0 %5672  ;;  %7991 = vmatprep.mubr.msk.f32.mxu1 %vm8161_vm0, %v8160_v0  ;;  %7999 = vmatprep.subr.mxu1 %v8160_v0  ;;  %v5984_v1 = vpop.permute.xlu1 %5983 }
 0x4b5   : > { %8015 = vmatpush3.msk.msra.mxu0 %vm390_vm1, %v5673_v63  ;;  %8016 = vmatprep.mubr.msk.f32.mxu0 %vm8161_vm0, %v8160_v0 }
 0x4b6   : > { %7992 = vmatmul.mubr.msk.f32.vlgmr.msra.gmra.mrb[60].mxu1 %vm386_vm2, %v355_v60  ;;  %8017 = vmatmul.mubr.msk.f32.vlgmr.msra.gmra.mrb[50].mxu0 %vm386_vm2, %v360_v61 }
 0x4b7   : > { %8000 = vmatpush3.msk.msra.mxu1 %vm390_vm1, %v5439_v51  ;;  %8024 = vmatprep.subr.mxu0 %v8160_v0 }
 0x4b8   : > { %8025 = vmatpush3.msk.msra.mxu0 %vm390_vm1, %v5828_v59  ;;  %v5906_v3 = vpop.permute.xlu0 %5905  ;;  %8001 = vmatprep.mubr.msk.f32.mxu1 %vm8161_vm0, %v8160_v0  ;;  %v6140_v8 = vpop.permute.xlu1 %6139 }
 0x4b9   : > { %8009 = vmatprep.subr.mxu1 %v8160_v0  ;;  %8026 = vmatprep.mubr.msk.f32.mxu0 %vm8161_vm0, %v8160_v0 }
 0x4ba   : > { %8034 = vmatprep.subr.mxu0 %v8160_v0  ;;  %8002 = vmatmul.mubr.msk.f32.vlgmr.msra.gmra.mrb[62].mxu1 %vm386_vm2, %v357_v2 }
 0x4bb   : > { %8010 = vmatpush3.msk.msra.mxu1 %vm390_vm1, %v5595_v55  ;;  %8027 = vmatmul.mubr.msk.f32.vlgmr.msra.gmra.mrb[52].mxu0 %vm386_vm2, %v362_v4 }
 0x4bc   : > { %8035 = vmatpush3.msk.msra.mxu0 %vm390_vm1, %v5984_v1  ;;  %v6062_v6 = vpop.permute.xlu0 %6061  ;;  %8011 = vmatprep.mubr.msk.f32.mxu1 %vm8161_vm0, %v8160_v0  ;;  %v6296_v12 = vpop.permute.xlu1 %6295 }
 0x4bd   : > { %8019 = vmatprep.subr.mxu1 %v8160_v0  ;;  %8036 = vmatprep.mubr.msk.f32.mxu0 %vm8161_vm0, %v8160_v0 }
 0x4be   : > { %8044 = vmatprep.subr.mxu0 %v8160_v0  ;;  %8012 = vmatmul.mubr.msk.f32.vlgmr.msra.gmra.mrb[64].mxu1 %vm386_vm2, %v359_v5 }
 0x4bf   : > { %8020 = vmatpush3.msk.msra.mxu1 %vm390_vm1, %v8804_v21  ;;  %8037 = vmatmul.mubr.msk.f32.vlgmr.msra.gmra.mrb[54].mxu0 %vm386_vm2, %v364_v7  ;;  %v372_v21 = vld [vmem:[%s9162_s3 + $0x74] sm:$0xf] }
 0x4c0   : > { %8045 = vmatpush3.msk.msra.mxu0 %vm390_vm1, %v6140_v8  ;;  %v6218_v10 = vpop.permute.xlu0 %6217  ;;  %8021 = vmatprep.mubr.msk.f32.mxu1 %vm8161_vm0, %v8160_v0  ;;  %v6529_v19 = vpop.permute.xlu1 %6528 }
 0x4c1   : > { %8029 = vmatprep.subr.mxu1 %v8160_v0  ;;  %8046 = vmatprep.mubr.msk.f32.mxu0 %vm8161_vm0, %v8160_v0 }
 0x4c2   : > { %8054 = vmatprep.subr.mxu0 %v8160_v0  ;;  %8022 = vmatmul.mubr.msk.f32.vlgmr.msra.gmra.mrb[66].mxu1 %vm386_vm2, %v361_v9 }
 0x4c3   : > { %8030 = vmatpush3.msk.msra.mxu1 %vm390_vm1, %v5906_v3  ;;  %8047 = vmatmul.mubr.msk.f32.vlgmr.msra.gmra.mrb[56].mxu0 %vm386_vm2, %v366_v11 }
 0x4c4   : > { %8055 = vmatpush3.msk.msra.mxu0 %vm390_vm1, %v6296_v12  ;;  %v6374_v14 = vpop.permute.xlu0 %6373  ;;  %8031 = vmatprep.mubr.msk.f32.mxu1 %vm8161_vm0, %v8160_v0  ;;  %v6685_v25 = vpop.permute.xlu1 %6684 }
 0x4c5   : > { %8039 = vmatprep.subr.mxu1 %v8160_v0  ;;  %8056 = vmatprep.mubr.msk.f32.mxu0 %vm8161_vm0, %v8160_v0 }
 0x4c6   : > { %8064 = vmatprep.subr.mxu0 %v8160_v0  ;;  %8032 = vmatmul.mubr.msk.f32.vlgmr.msra.gmra.mrb[68].mxu1 %vm386_vm2, %v363_v13 }
 0x4c7   : > { %8040 = vmatpush3.msk.msra.mxu1 %vm390_vm1, %v6062_v6  ;;  %8057 = vmatmul.mubr.msk.f32.vlgmr.msra.gmra.mrb[58].mxu0 %vm386_vm2, %v368_v15 }
 0x4c8   : > { %8065 = vmatpush3.msk.msra.mxu0 %vm390_vm1, %v8824_v24  ;;  %v6607_v17 = vpop.permute.xlu0 %6606  ;;  %8041 = vmatprep.mubr.msk.f32.mxu1 %vm8161_vm0, %v8160_v0  ;;  %v374_v24 = vld [vmem:[%s9162_s3 + $0x7c] sm:$0xf]  ;;  %v6841_v31 = vpop.permute.xlu1 %6840 }
 0x4c9   : > { %8049 = vmatprep.subr.mxu1 %v8160_v0  ;;  %8066 = vmatprep.mubr.msk.f32.mxu0 %vm8161_vm0, %v8160_v0 }
 0x4ca   : > { %8074 = vmatprep.subr.mxu0 %v8160_v0  ;;  %8042 = vmatmul.mubr.msk.f32.vlgmr.msra.gmra.mrb[70].mxu1 %vm386_vm2, %v365_v16 }
 0x4cb   : > { %8050 = vmatpush3.msk.msra.mxu1 %vm390_vm1, %v6218_v10  ;;  %8067 = vmatmul.mubr.msk.f32.vlgmr.msra.gmra.mrb[60].mxu0 %vm386_vm2, %v370_v62 }
 0x4cc   : > { %8075 = vmatpush3.msk.msra.mxu0 %vm390_vm1, %v6607_v17  ;;  %v6763_v20 = vpop.permute.xlu0 %6762  ;;  %8051 = vmatprep.mubr.msk.f32.mxu1 %vm8161_vm0, %v8160_v0  ;;  %v6997_v34 = vpop.permute.xlu1 %6996 }
 0x4cd   : > { %8059 = vmatprep.subr.mxu1 %v8160_v0  ;;  %8076 = vmatprep.mubr.msk.f32.mxu0 %vm8161_vm0, %v8160_v0 }
 0x4ce   : > { %8084 = vmatprep.subr.mxu0 %v8160_v0  ;;  %8052 = vmatmul.mubr.msk.f32.vlgmr.msra.gmra.mrb[72].mxu1 %vm386_vm2, %v367_v18 }
 0x4cf   : > { %8060 = vmatpush3.msk.msra.mxu1 %vm390_vm1, %v6374_v14  ;;  %8077 = vmatmul.mubr.msk.f32.vlgmr.msra.gmra.mrb[62].mxu0 %vm386_vm2, %v372_v21 }
 0x4d0   : > { %8085 = vmatpush3.msk.msra.mxu0 %vm390_vm1, %v6763_v20  ;;  %v6919_v23 = vpop.permute.xlu0 %6918  ;;  %8061 = vmatprep.mubr.msk.f32.mxu1 %vm8161_vm0, %v8160_v0 }
 0x4d1   : > { %8069 = vmatprep.subr.mxu1 %v8160_v0  ;;  %8086 = vmatprep.mubr.msk.f32.mxu0 %vm8161_vm0, %v8160_v0 }
 0x4d2   : > { %8094 = vmatprep.subr.mxu0 %v8160_v0  ;;  %8062 = vmatmul.mubr.msk.f32.vlgmr.msra.gmra.mrb[74].mxu1 %vm386_vm2, %v369_v22 }
 0x4d3   : > { %8070 = vmatpush3.msk.msra.mxu1 %vm390_vm1, %v6529_v19  ;;  %8087 = vmatmul.mubr.msk.f32.vlgmr.msra.gmra.mrb[64].mxu0 %vm386_vm2, %v374_v24 }
 0x4d4   : > { %8095 = vmatpush3.msk.msra.mxu0 %vm390_vm1, %v6919_v23  ;;  %8071 = vmatprep.mubr.msk.f32.mxu1 %vm8161_vm0, %v8160_v0  ;;  %v7075_v29 = vpop.permute.xlu0 %7074 }
 0x4d5   : > { %8079 = vmatprep.subr.mxu1 %v8160_v0  ;;  %8096 = vmatprep.mubr.msk.f32.mxu0 %vm8161_vm0, %v8160_v0 }
 0x4d6   : > { %8104 = vmatprep.subr.mxu0 %v8160_v0  ;;  %8072 = vmatmul.mubr.msk.f32.vlgmr.msra.gmra.mrb[76].mxu1 %vm386_vm2, %v371_v27 }
 0x4d7   : > { %8080 = vmatpush3.msk.msra.mxu1 %vm390_vm1, %v6685_v25  ;;  %8097 = vmatmul.mubr.msk.f32.vlgmr.msra.gmra.mrb[66].mxu0 %vm386_vm2, %v376_v28 }
 0x4d8   : > { %8105 = vmatpush3.msk.msra.mxu0 %vm390_vm1, %v7075_v29  ;;  %8081 = vmatprep.mubr.msk.f32.mxu1 %vm8161_vm0, %v8160_v0 }
 0x4d9   : > { %8089 = vmatprep.subr.mxu1 %v8160_v0  ;;  %8106 = vmatprep.mubr.msk.f32.mxu0 %vm8161_vm0, %v8160_v0 }
 0x4da   : > { %8082 = vmatmul.mubr.msk.f32.vlgmr.msra.gmra.mrb[78].mxu1 %vm386_vm2, %v373_v30 }
 0x4db   : > { %8090 = vmatpush3.msk.msra.mxu1 %vm390_vm1, %v6841_v31  ;;  %8091 = vmatprep.mubr.msk.f32.mxu1 %vm8161_vm0, %v8160_v0 }
 0x4dc   : > { %8099 = vmatprep.subr.mxu1 %v8160_v0  ;;  %8107 = vmatmul.mubr.msk.f32.vlgmr.msra.gmra.mrb[68].mxu0 %vm386_vm2, %v378_v32 }
 0x4de   : > { %8092 = vmatmul.mubr.msk.f32.vlgmr.msra.gmra.mrb[80].mxu1 %vm386_vm2, %v375_v33 }
 0x4df   : > { %8100 = vmatpush3.msk.msra.mxu1 %vm390_vm1, %v6997_v34  ;;  %8101 = vmatprep.mubr.msk.f32.mxu1 %vm8161_vm0, %v8160_v0 }
 0x4e0   : > { %8109 = vmatprep.subr.mxu1 %v8160_v0 }
 0x4e2   : > { %8102 = vmatmul.mubr.msk.f32.vlgmr.msra.gmra.mrb[82].mxu1 %vm386_vm2, %v377_v35 }
 0x4e3   : > { %8110 = vmatpush3.msk.msra.mxu1 %vm390_vm1, %v8701_v26  ;;  %8111 = vmatprep.mubr.msk.f32.mxu1 %vm8161_vm0, %v8160_v0 }
 0x4e6   : > { %8112 = vmatmul.mubr.msk.f32.vlgmr.msra.gmra.mrb[84].mxu1 %vm386_vm2, %v288_v36 }
 0x569   : > { %v4424_v37 = vpop.f32.mrb[44].mxu1 }
 0x56a   : > { %v7933_v38 = vpop.f32.mrb[45].mxu1 }
 0x56d   : > { %v4499_v39 = vpop.f32.mrb[46].mxu1  ;;  %v4810_v40 = vpop.f32.mrb[38].mxu0 }
 0x56e   : > { %v4500_v41 = vadd.f32 %v4499_v39, %v4424_v37  ;;  %v7938_v42 = vpop.f32.mrb[47].mxu1  ;;  %v7958_v43 = vpop.f32.mrb[39].mxu0 }
 0x571   : > { %v4576_v44 = vpop.f32.mrb[48].mxu1 }
 0x572   : > { %v4580_v45 = vadd.f32 %v4576_v44, %v4500_v41  ;;  %v7943_v46 = vpop.f32.mrb[49].mxu1  ;;  %v4966_v26 = vpop.f32.mrb[40].mxu0 }
 0x573   : > { %v7968_v47 = vpop.f32.mrb[41].mxu0 }
 0x575   : > { %v4654_v48 = vpop.f32.mrb[50].mxu1 }
 0x576   : > { %v4658_v0 = vadd.f32 %v4654_v48, %v4580_v45  ;;  %v7948_v49 = vpop.f32.mrb[51].mxu1 }
 0x577   : > { %v5121_v50 = vpop.f32.mrb[42].mxu0 }
 0x578   : > { %v7978_v51 = vpop.f32.mrb[43].mxu0 }
 0x579   : > { %v4732_v52 = vpop.f32.mrb[52].mxu1 }
 0x57a   : > { %v4736_v53 = vadd.f32 %v4732_v52, %v4658_v0  ;;  %v7953_v54 = vpop.f32.mrb[53].mxu1 }
 0x57c   : > { %v4814_v55 = vadd.f32 %v4810_v40, %v4736_v53 }
 0x57d   : > { %v4888_v56 = vpop.f32.mrb[54].mxu1  ;;  %v5277_v57 = vpop.f32.mrb[44].mxu0 }
 0x57e   : > { %v4892_v58 = vadd.f32 %v4888_v56, %v4814_v55  ;;  %v7963_v59 = vpop.f32.mrb[55].mxu1  ;;  %v7988_v60 = vpop.f32.mrb[45].mxu0 }
 0x580   : > { %v4970_v61 = vadd.f32 %v4966_v26, %v4892_v58 }
 0x581   : > { %v5044_v63 = vpop.f32.mrb[56].mxu1  ;;  %v5433_v1 = vpop.f32.mrb[46].mxu0 }
 0x582   : > { %v5048_v2 = vadd.f32 %v5044_v63, %v4970_v61  ;;  %v7973_v3 = vpop.f32.mrb[57].mxu1  ;;  %v7998_v4 = vpop.f32.mrb[47].mxu0 }
 0x584   : > { %v5125_v5 = vadd.f32 %v5121_v50, %v5048_v2 }
 0x585   : > { %v5199_v6 = vpop.f32.mrb[58].mxu1  ;;  %v5589_v7 = vpop.f32.mrb[48].mxu0 }
 0x586   : > { %v5203_v8 = vadd.f32 %v5199_v6, %v5125_v5  ;;  %v7983_v9 = vpop.f32.mrb[59].mxu1  ;;  %v8008_v10 = vpop.f32.mrb[49].mxu0 }
 0x588   : > { %v5281_v11 = vadd.f32 %v5277_v57, %v5203_v8 }
 0x589   : > { %v5355_v12 = vpop.f32.mrb[60].mxu1  ;;  %v5745_v13 = vpop.f32.mrb[50].mxu0 }
 0x58a   : > { %v5359_v14 = vadd.f32 %v5355_v12, %v5281_v11  ;;  %v7993_v15 = vpop.f32.mrb[61].mxu1  ;;  %v8018_v16 = vpop.f32.mrb[51].mxu0 }
 0x58b   : > { %v7155_v11 = vpop.permute.xlu1 %7154 }
 0x58c   : > { %v5437_v17 = vadd.f32 %v5433_v1, %v5359_v14 }
 0x58d   : > { %v5511_v62 = vpop.f32.mrb[62].mxu1 }
 0x58e   : > { %v5515_v18 = vadd.f32 %v5511_v62, %v5437_v17  ;;  %v8003_v19 = vpop.f32.mrb[63].mxu1  ;;  %v5900_v20 = vpop.f32.mrb[52].mxu0 }
 0x58f   : > { %v8028_v21 = vpop.f32.mrb[53].mxu0 }
 0x590   : > { %v5593_v22 = vadd.f32 %v5589_v7, %v5515_v18  ;;  %v7162_v21 = vpop.permute.xlu1 %7161 }
 0x591   : > { %v5667_v23 = vpop.f32.mrb[64].mxu1 }
 0x592   : > { %v5671_v24 = vadd.f32 %v5667_v23, %v5593_v22  ;;  %v8013_v25 = vpop.f32.mrb[65].mxu1  ;;  %v6056_v27 = vpop.f32.mrb[54].mxu0 }
 0x593   : > { %v8038_v28 = vpop.f32.mrb[55].mxu0 }
 0x594   : > { %v5749_v29 = vadd.f32 %v5745_v13, %v5671_v24  ;;  %v7169_v13 = vpop.permute.xlu0 %7168 }
 0x595   : > { %v5822_v30 = vpop.f32.mrb[66].mxu1 }
 0x596   : > { %v5826_v31 = vadd.f32 %v5822_v30, %v5749_v29  ;;  %v8023_v32 = vpop.f32.mrb[67].mxu1  ;;  %v6212_v33 = vpop.f32.mrb[56].mxu0 }
 0x597   : > { %v8048_v34 = vpop.f32.mrb[57].mxu0 }
 0x598   : > { %v5904_v35 = vadd.f32 %v5900_v20, %v5826_v31  ;;  %v7248_v22 = vpop.permute.xlu0 %7247 }
 0x599   : > { %v5978_v36 = vpop.f32.mrb[68].mxu1 }
 0x59a   : > { %v5982_v37 = vadd.f32 %v5978_v36, %v5904_v35  ;;  %v8033_v38 = vpop.f32.mrb[69].mxu1  ;;  %v6368_v39 = vpop.f32.mrb[58].mxu0 }
 0x59b   : > { %v8058_v40 = vpop.f32.mrb[59].mxu0 }
 0x59c   : > { %v6060_v41 = vadd.f32 %v6056_v27, %v5982_v37 }
 0x59d   : > { %v6134_v42 = vpop.f32.mrb[70].mxu1 }
 0x59e   : > { %v6138_v43 = vadd.f32 %v6134_v42, %v6060_v41  ;;  %v8043_v44 = vpop.f32.mrb[71].mxu1  ;;  %v6523_v45 = vpop.f32.mrb[60].mxu0 }
 0x59f   : > { %v8068_v46 = vpop.f32.mrb[61].mxu0 }
 0x5a0   : > { %v6216_v26 = vadd.f32 %v6212_v33, %v6138_v43 }
 0x5a1   : > { %v6290_v47 = vpop.f32.mrb[72].mxu1 }
 0x5a2   : > { %v6294_v48 = vadd.f32 %v6290_v47, %v6216_v26  ;;  %v8053_v0 = vpop.f32.mrb[73].mxu1  ;;  %v6679_v49 = vpop.f32.mrb[62].mxu0 }
 0x5a3   : > { %v8078_v50 = vpop.f32.mrb[63].mxu0 }
 0x5a4   : > { %v6372_v51 = vadd.f32 %v6368_v39, %v6294_v48 }
 0x5a5   : > { %v6446_v52 = vpop.f32.mrb[74].mxu1 }
 0x5a6   : > { %v6450_v53 = vadd.f32 %v6446_v52, %v6372_v51  ;;  %v8063_v54 = vpop.f32.mrb[75].mxu1  ;;  %v6835_v55 = vpop.f32.mrb[64].mxu0 }
 0x5a7   : > { %v8088_v56 = vpop.f32.mrb[65].mxu0 }
 0x5a8   : > { %v6527_v57 = vadd.f32 %v6523_v45, %v6450_v53 }
 0x5a9   : > { %v6601_v58 = vpop.f32.mrb[76].mxu1 }
 0x5aa   : > { %v6605_v59 = vadd.f32 %v6601_v58, %v6527_v57  ;;  %v8073_v60 = vpop.f32.mrb[77].mxu1  ;;  %v6991_v61 = vpop.f32.mrb[66].mxu0 }
 0x5ab   : > { %v8098_v63 = vpop.f32.mrb[67].mxu0 }
 0x5ac   : > { %v6683_v1 = vadd.f32 %v6679_v49, %v6605_v59 }
 0x5ad   : > { %v6757_v2 = vpop.f32.mrb[78].mxu1 }
 0x5ae   : > { %v6761_v3 = vadd.f32 %v6757_v2, %v6683_v1  ;;  %v8083_v4 = vpop.f32.mrb[79].mxu1 }
 0x5af   : > { %v7147_v5 = vpop.f32.mrb[68].mxu0 }
 0x5b0   : > { %v6839_v6 = vadd.f32 %v6835_v55, %v6761_v3  ;;  %v8108_v7 = vpop.f32.mrb[69].mxu0 }
 0x5b1   : > { %v6913_v8 = vpop.f32.mrb[80].mxu1 }
 0x5b2   : > { %v6917_v9 = vadd.f32 %v6913_v8, %v6839_v6  ;;  %v8093_v10 = vpop.f32.mrb[81].mxu1 }
 0x5b4   : > { %v6995_v12 = vadd.f32 %v6991_v61, %v6917_v9 }
 0x5b5   : > { %v7069_v14 = vpop.f32.mrb[82].mxu1 }
 0x5b6   : > { %v7073_v15 = vadd.f32 %v7069_v14, %v6995_v12  ;;  %v8103_v16 = vpop.f32.mrb[83].mxu1 }
 0x5b8   : > { %v7151_v17 = vadd.f32 %v7147_v5, %v7073_v15 }
 0x5b9   : > { %v7240_v62 = vpop.f32.mrb[84].mxu1 }
 0x5ba   : > { %v7157_v18 = vadd.f32 %v7155_v11, %v7151_v17  ;;  %v7241_v19 = vadd.f32 %v7240_v62, %v7169_v13  ;;  %v8113_v20 = vpop.f32.mrb[85].mxu1 }
 0x5bc   : > { %vm7158_vm10 = vcmp.ge.f32.partialorder %v7157_v18, 0.0  ;;  %v7164_v23 = vmul.f32 %v7162_v21, %v7157_v18  ;;  %vm7244_vm11 = vcmp.ge.f32.partialorder %v7241_v19, 0.0  ;;  %v7250_v24 = vmul.f32 %v7248_v22, %v7241_v19 }
 0x5be   : > { %v7165_v25 = vsel %vm7158_vm10, %v7157_v18, %v7164_v23  ;;  %v7251_v27 = vsel %vm7244_vm11, %v7241_v19, %v7250_v24 }
 0x5bf   : > { %v7252_v28 = vadd.f32 %v7251_v27, %v7165_v25 }
 0x5c1   : > { %v7254_v29 = vsel %vm7253_vm12, %v7252_v28, 0.0 }
 0x5c2   : > { %7256 = vst.msk [vmem:[%s276_s9] sm:$0xf] %vm7255_vm13, %v7254_v29 }
 0x5c3 PF: > { %s17_s24 = sadd.s32 1, %s8158_s24  }
 0x5c4   : > { %p14_p4 = scmp.ge.s32.totalorder %s17_s24, 4  }
 0x5c6   :  { %16 = sbr.rel (!%p14_p4) target bundleno = 1 (0x1), region = 78 }

</bundles_post_ra>
